<compile_context>
chip_gen: v7x
topology: tpu7x:2x2x1
jax: 0.10.0
libtpu: 0.0.40
codegen_flags: <defaults>
</compile_context>

<pallas_src>
import jax
import jax.numpy as jnp
from jax.experimental import pallas as pl
from jax.experimental.pallas import tpu as pltpu


def gnn_encoder_kernel(a_ref, xs_ref, xd_ref, invdeg_ref,
                       wlr_ref, bl_ref,
                       wf_ref, bf_ref,
                       wp_ref, bp_ref,
                       out_ref, acc_ref):
    """Grid = (dst-row tiles [parallel], src-col tiles [reduction, innermost]).

    a_ref     : [T, T]      int8 adjacency tile (dst rows x src cols, edge counts)
    xs_ref    : [T, Fp]     bf16 source-node features (indexed by k)
    xd_ref    : [T, Fp]     bf16 destination-node features (root branch, indexed by i)
    invdeg_ref: [T, 1]      f32  1/deg of destination rows (mean normalization)
    wlr_ref   : [2*Fp, Hp]  bf16 fused SAGEConv weight [lin_l ; lin_r]
    bl_ref    : [1, Hp]     f32  SAGEConv lin_l bias
    wf_ref    : [Hp, Hp]    bf16 ffw linear         bf_ref: [1, Hp] f32
    wp_ref    : [Hp, Cp]    bf16 projection         bp_ref: [1, Cp] f32
    out_ref   : [T, Cp]     f32
    acc_ref   : [T, Fp]     f32  VMEM scratch: running sum_j A[i,j] * x[j]
    """
    k = pl.program_id(1)

    @pl.when(k == 0)
    def _():
        acc_ref[...] = jnp.zeros_like(acc_ref)

    # int8 -> bf16 is a VPU cast that hides under the MXU matmul; neighbor-sum
    # accumulation over source-column tiles with f32 accumulate.
    acc_ref[...] += jnp.dot(a_ref[...].astype(jnp.bfloat16), xs_ref[...],
                            preferred_element_type=jnp.float32)

    @pl.when(k == pl.num_programs(1) - 1)
    def _():
        # Mean aggregation: per-destination-row 1/deg scale (f32 VPU op).
        agg = (acc_ref[...] * invdeg_ref[...]).astype(jnp.bfloat16)

        # --- conv layer 0: SAGEConv(mean), lin_l/lin_r fused in one MXU pass:
        #     lin_l(agg) + lin_r(x_dst) == [agg | x_dst] @ [wl ; wr] ---
        fused = jnp.concatenate([agg, xd_ref[...]], axis=-1)
        h = jnp.dot(fused, wlr_ref[...],
                    preferred_element_type=jnp.float32) + bl_ref[...]
        h = jnp.maximum(h, 0.0)          # relu; dropout(p=0.0) == identity

        # --- ffw layer 0: Linear + relu ---
        h = jnp.dot(h.astype(jnp.bfloat16), wf_ref[...],
                    preferred_element_type=jnp.float32) + bf_ref[...]
        h = jnp.maximum(h, 0.0)

        # --- projection (out_channels is not None) ---
        out_ref[...] = (jnp.dot(h.astype(jnp.bfloat16), wp_ref[...],
                                preferred_element_type=jnp.float32)
                        + bp_ref[...]).astype(out_ref.dtype)


def _round_up(v, m):
    return ((v + m - 1) // m) * m


def _pad2(w, rows, cols, dtype):
    out = jnp.zeros((rows, cols), jnp.float32)
    out = out.at[:w.shape[0], :w.shape[1]].set(w.astype(jnp.float32))
    return out.astype(dtype)


def _vmem_limit_bytes():
    """Generation-specific scoped-VMEM limit: ~48 MiB on v7x (64 MiB physical),
    ~100 MiB on v5e/v6e (128 MiB physical)."""
    cap = 128 << 20
    try:
        cap = int(getattr(pltpu.get_tpu_info(), "vmem_capacity_bytes", cap))
    except Exception:
        pass
    return max(32 << 20, min(cap - (16 << 20), 100 << 20))


def _select_tile(n, requested, f_p, h_p, c_p, vmem_limit):
    """Largest 128-aligned square tile that (a) fits the VMEM budget with ~40%
    headroom for Mosaic internal epilogue scratch and (b) keeps >= 2
    destination-row tiles so the 'parallel' axis shards across both v7x TCs."""
    t = max(128, (min(requested, 1024) // 128) * 128)

    def fits(tt):
        n_bytes = (2 * tt * tt                                    # int8 A (x2 bufs)
                   + 2 * 2 * tt * f_p * 2                         # bf16 xs + xd (x2 bufs each)
                   + 2 * tt * 4                                   # f32 1/deg (x2 bufs)
                   + 2 * tt * c_p * 4                             # f32 out (x2 bufs)
                   + tt * f_p * 4                                 # f32 accumulator scratch
                   + 2 * (2 * f_p * h_p + h_p * h_p + h_p * c_p)  # bf16 weights (resident)
                   + 4 * (2 * h_p + c_p))                         # f32 biases
        return n_bytes <= int(0.6 * vmem_limit)

    while t > 128 and not fits(t):
        t -= 128
    while t > 128 and _round_up(n, t) // t < 2:
        t -= 128
    return t


def _build_call(tile, np_, f_p, h_p, c_p, vmem_limit, cost, weight_pipeline_mode):
    wkw = {} if weight_pipeline_mode is None else {
        "pipeline_mode": weight_pipeline_mode}
    grid = (np_ // tile, np_ // tile)
    return pl.pallas_call(
        gnn_encoder_kernel,
        out_shape=jax.ShapeDtypeStruct((np_, c_p), jnp.float32),
        grid_spec=pltpu.PrefetchScalarGridSpec(
            num_scalar_prefetch=0,
            grid=grid,
            in_specs=[
                pl.BlockSpec((tile, tile), lambda i, k: (i, k)),      # A (int8)
                pl.BlockSpec((tile, f_p), lambda i, k: (k, 0)),       # x (src rows)
                pl.BlockSpec((tile, f_p), lambda i, k: (i, 0)),       # x (dst rows)
                pl.BlockSpec((tile, 1), lambda i, k: (i, 0)),         # 1/deg
                pl.BlockSpec((2 * f_p, h_p), lambda i, k: (0, 0), **wkw),  # [wl;wr]
                pl.BlockSpec((1, h_p), lambda i, k: (0, 0), **wkw),        # bl
                pl.BlockSpec((h_p, h_p), lambda i, k: (0, 0), **wkw),      # wf
                pl.BlockSpec((1, h_p), lambda i, k: (0, 0), **wkw),        # bf
                pl.BlockSpec((h_p, c_p), lambda i, k: (0, 0), **wkw),      # wp
                pl.BlockSpec((1, c_p), lambda i, k: (0, 0), **wkw),        # bp
            ],
            out_specs=pl.BlockSpec((tile, c_p), lambda i, k: (i, 0)),
            scratch_shapes=[pltpu.VMEM((tile, f_p), jnp.float32)],
        ),
        compiler_params=pltpu.CompilerParams(
            dimension_semantics=("parallel", "arbitrary"),
            vmem_limit_bytes=vmem_limit,
        ),
        cost_estimate=cost,
    )


def gnn_encoder_forward(x, edge_index, params, *, tile=512):
    """x: [N, F_in] f32; edge_index: [2, E] int32 (row0 = src, row1 = dst)."""
    N, F_in = x.shape
    H = params["wl"].shape[1]
    C = params["wp"].shape[1]

    Fp = _round_up(F_in, 128)
    Hp = _round_up(H, 128)
    Cp = _round_up(C, 128)

    vmem_limit = _vmem_limit_bytes()
    tile = _select_tile(N, tile, Fp, Hp, Cp, vmem_limit)
    Np = _round_up(N, tile)
    grid = (Np // tile, Np // tile)

    src, dst = edge_index[0], edge_index[1]

    # ---- plain-JAX glue: int8 adjacency (dst x src) + 1/deg row scale ----
    # TODO(synk): for large sparse graphs replace this O(N^2) dense adjacency
    # with a CSR/edge-list aggregation kernel (PrefetchScalarGridSpec + manual
    # DMA gather of neighbor feature rows), reducing traffic to O(E*F + N*F).
    deg = jnp.zeros((N,), jnp.float32).at[dst].add(1.0)
    # int8 halves the dominant HBM stream vs bf16; exact for per-(dst,src)
    # edge multiplicities <= 127.
    a = jnp.zeros((Np, Np), jnp.int32).at[dst, src].add(1).astype(jnp.int8)
    # isolated nodes (deg == 0) get agg == 0, matching PyG mean aggregation
    inv_deg = jnp.zeros((Np, 1), jnp.float32).at[:N, 0].set(
        1.0 / jnp.maximum(deg, 1.0))

    xp = _pad2(x, Np, Fp, jnp.bfloat16)

    # fused SAGEConv weight: [wl ; wr]  (lin_l applied to agg, lin_r to x_dst)
    wlr = jnp.zeros((2 * Fp, Hp), jnp.float32)
    wlr = wlr.at[:F_in, :H].set(params["wl"].astype(jnp.float32))
    wlr = wlr.at[Fp:Fp + F_in, :H].set(params["wr"].astype(jnp.float32))
    wlr = wlr.astype(jnp.bfloat16)

    wf = _pad2(params["wf"], Hp, Hp, jnp.bfloat16)
    wp = _pad2(params["wp"], Hp, Cp, jnp.bfloat16)
    bl = _pad2(params["bl"], 1, Hp, jnp.float32)
    bf = _pad2(params["bf"], 1, Hp, jnp.float32)
    bp = _pad2(params["bp"], 1, Cp, jnp.float32)

    cost = pl.CostEstimate(
        flops=(2 * Np * Np * Fp              # A @ x aggregation
               + 4 * Np * Fp * Hp            # fused lin_l + lin_r
               + 2 * Np * Hp * Hp            # ffw
               + 2 * Np * Hp * Cp),          # proj
        transcendentals=0,
        bytes_accessed=(Np * Np                            # int8 adjacency (dominant)
                        + 2 * Np * Fp * (1 + grid[0])      # x (src re-read per row tile)
                        + 2 * (2 * Fp * Hp + Hp * Hp + Hp * Cp)
                        + 4 * (2 * Hp + Cp)
                        + 4 * Np * Cp),
    )

    args = (a, xp, xp, inv_deg, wlr, bl, wf, bf, wp, bp)
    try:
        # grid-invariant weights/biases: single buffer (constant index_map)
        out = _build_call(tile, Np, Fp, Hp, Cp, vmem_limit, cost,
                          pl.Buffered(1))(*args)
    except Exception:
        # some jax versions reject per-BlockSpec pipeline_mode in a top-level
        # pallas_call; fall back to default double-buffering for the weights.
        out = _build_call(tile, Np, Fp, Hp, Cp, vmem_limit, cost, None)(*args)

    return out[:N, :C]


def init_params(key, f_in, hidden, out_channels):
    ks = jax.random.split(key, 7)
    s = lambda k, shape, fan_in: (jax.random.normal(k, shape, jnp.float32)
                                  / jnp.sqrt(jnp.float32(fan_in)))
    return {
        "wl": s(ks[0], (f_in, hidden), f_in),            # SAGEConv.lin_l.weight^T
        "bl": s(ks[1], (1, hidden), f_in),               # SAGEConv.lin_l.bias
        "wr": s(ks[2], (f_in, hidden), f_in),            # SAGEConv.lin_r.weight^T
        "wf": s(ks[3], (hidden, hidden), hidden),        # ffw_lins[0]
        "bf": s(ks[4], (1, hidden), hidden),
        "wp": s(ks[5], (hidden, out_channels), hidden),  # proj
        "bp": s(ks[6], (1, out_channels), hidden),
    }


def reference_forward(x, edge_index, params, cast_dtype=None):
    """Pure-JAX reference. cast_dtype=jnp.bfloat16 mimics the kernel's storage
    precision (f32 accumulation), cast_dtype=None is the full-f32 module."""
    def c(v):
        return (v.astype(cast_dtype).astype(jnp.float32)
                if cast_dtype is not None else v)

    N = x.shape[0]
    src, dst = edge_index[0], edge_index[1]
    deg = jnp.zeros((N,), jnp.float32).at[dst].add(1.0)
    A = jnp.zeros((N, N), jnp.float32).at[dst, src].add(1.0)
    inv_deg = 1.0 / jnp.maximum(deg, 1.0)

    xr = c(x)
    agg = (A @ xr) * inv_deg[:, None]                       # mean aggregation
    h = jnp.maximum(c(agg) @ c(params["wl"]) + params["bl"]
                    + xr @ c(params["wr"]), 0.0)
    h = jnp.maximum(c(h) @ c(params["wf"]) + params["bf"], 0.0)
    return c(h) @ c(params["wp"]) + params["bp"]


if __name__ == "__main__":
    key = jax.random.PRNGKey(0)
    k_x, k_e, k_p = jax.random.split(key, 3)

    # small demo: 300 nodes -> tile auto-selects 256 -> Np=512, a real 2x2 grid
    N, F_IN, HIDDEN, OUT = 300, 8, 32, 16
    E = 1200

    x = jax.random.normal(k_x, (N, F_IN), jnp.float32)
    edge_index = jax.random.randint(k_e, (2, E), 0, N, dtype=jnp.int32)
    params = init_params(k_p, F_IN, HIDDEN, OUT)

    out = gnn_encoder_forward(x, edge_index, params)
    out = jax.block_until_ready(out)
    assert out.shape == (N, OUT)

    # tight check vs a reference using the same bf16 storage precision
    ref_bf16 = reference_forward(x, edge_index, params, cast_dtype=jnp.bfloat16)
    assert jnp.allclose(out, ref_bf16, atol=1e-2, rtol=1e-2), \
        "mismatch vs bf16-matched reference"

    # loose check vs the full-f32 module semantics (bf16 storage drift only)
    ref_f32 = reference_forward(x, edge_index, params)
    assert jnp.allclose(out, ref_f32, atol=1e-1, rtol=1e-1), \
        "mismatch vs f32 reference"

    print("KERNEL_OK")
</pallas_src>

<mosaic_0001>
module attributes {stable_mosaic.version = 11 : i64} {
  func.func @gnn_encoder_kernel(%arg0: i32, %arg1: i32, %arg2: memref<256x256xi8, #tpu.memory_space<vmem>>, %arg3: memref<256x128xbf16, #tpu.memory_space<vmem>>, %arg4: memref<256x128xbf16, #tpu.memory_space<vmem>>, %arg5: memref<256x1xf32, #tpu.memory_space<vmem>>, %arg6: memref<256x128xbf16, #tpu.memory_space<vmem>>, %arg7: memref<1x128xf32, #tpu.memory_space<vmem>>, %arg8: memref<128x128xbf16, #tpu.memory_space<vmem>>, %arg9: memref<1x128xf32, #tpu.memory_space<vmem>>, %arg10: memref<128x128xbf16, #tpu.memory_space<vmem>>, %arg11: memref<1x128xf32, #tpu.memory_space<vmem>>, %arg12: memref<256x128xf32, #tpu.memory_space<vmem>>, %arg13: memref<256x128xf32, #tpu.memory_space<vmem>>) attributes {dimension_semantics = [#tpu.dimension_semantics<parallel>, #tpu.dimension_semantics<arbitrary>], iteration_bounds = array<i64: 2, 2>, scalar_prefetch = 0 : i64, scratch_operands = 1 : i64, tpu.core_type = #tpu.core_type<tc>, window_params = [{transform_indices = @transform_0, window_bounds = array<i64: 256, 256>}, {transform_indices = @transform_1, window_bounds = array<i64: 256, 128>}, {transform_indices = @transform_2, window_bounds = array<i64: 256, 128>}, {transform_indices = @transform_3, window_bounds = array<i64: 256, 1>}, {pipeline_mode = #tpu.pipeline_mode<synchronous>, transform_indices = @transform_4, window_bounds = array<i64: 256, 128>}, {pipeline_mode = #tpu.pipeline_mode<synchronous>, transform_indices = @transform_5, window_bounds = array<i64: 1, 128>}, {pipeline_mode = #tpu.pipeline_mode<synchronous>, transform_indices = @transform_6, window_bounds = array<i64: 128, 128>}, {pipeline_mode = #tpu.pipeline_mode<synchronous>, transform_indices = @transform_7, window_bounds = array<i64: 1, 128>}, {pipeline_mode = #tpu.pipeline_mode<synchronous>, transform_indices = @transform_8, window_bounds = array<i64: 128, 128>}, {pipeline_mode = #tpu.pipeline_mode<synchronous>, transform_indices = @transform_9, window_bounds = array<i64: 1, 128>}, {transform_indices = @transform_10, window_bounds = array<i64: 256, 128>}]} {
    %c0_i32 = arith.constant 0 : i32
    %0 = arith.cmpi eq, %arg1, %c0_i32 : i32
    %1 = arith.extui %0 : i1 to i32
    %c0_i32_0 = arith.constant 0 : i32
    %2 = arith.cmpi ne, %1, %c0_i32_0 : i32
    scf.if %2 {
      %cst_9 = arith.constant 0.000000e+00 : f32
      %13 = vector.broadcast %cst_9 : f32 to vector<256x128xf32>
      %c0_10 = arith.constant 0 : index
      %c0_11 = arith.constant 0 : index
      %14 = vector.load %arg13[%c0_10, %c0_11] : memref<256x128xf32, #tpu.memory_space<vmem>>, vector<256x128xf32>
      tpu.vector_store %arg13[%c0_10, %c0_11], %13 {strides = array<i32>} : memref<256x128xf32, #tpu.memory_space<vmem>>, vector<256x128xf32>,
    } else {
    }
    %c0 = arith.constant 0 : index
    %c0_1 = arith.constant 0 : index
    %3 = vector.load %arg13[%c0, %c0_1] : memref<256x128xf32, #tpu.memory_space<vmem>>, vector<256x128xf32>
    %c0_2 = arith.constant 0 : index
    %c0_3 = arith.constant 0 : index
    %4 = vector.load %arg2[%c0_2, %c0_3] : memref<256x256xi8, #tpu.memory_space<vmem>>, vector<256x256xi8>
    %5 = arith.sitofp %4 : vector<256x256xi8> to vector<256x256xbf16>
    %c0_4 = arith.constant 0 : index
    %c0_5 = arith.constant 0 : index
    %6 = vector.load %arg3[%c0_4, %c0_5] : memref<256x128xbf16, #tpu.memory_space<vmem>>, vector<256x128xbf16>
    %cst = arith.constant dense<0.000000e+00> : vector<256x128xf32>
    %7 = tpu.matmul %5, %6, %cst {dimension_numbers = #tpu.dot_dimension_numbers<[1], [0], [0], [1], [0, 0, 1, 1], [], []>} : vector<256x256xbf16>, vector<256x128xbf16>, vector<256x128xf32> -> vector<256x128xf32>
    %8 = arith.addf %3, %7 : vector<256x128xf32>
    %c0_6 = arith.constant 0 : index
    %c0_7 = arith.constant 0 : index
    %9 = vector.load %arg13[%c0_6, %c0_7] : memref<256x128xf32, #tpu.memory_space<vmem>>, vector<256x128xf32>
    tpu.vector_store %arg13[%c0_6, %c0_7], %8 {strides = array<i32>} : memref<256x128xf32, #tpu.memory_space<vmem>>, vector<256x128xf32>,
    %c1_i32 = arith.constant 1 : i32
    %10 = arith.cmpi eq, %arg1, %c1_i32 : i32
    %11 = arith.extui %10 : i1 to i32
    %c0_i32_8 = arith.constant 0 : i32
    %12 = arith.cmpi ne, %11, %c0_i32_8 : i32
    scf.if %12 {
      %c0_9 = arith.constant 0 : index
      %c0_10 = arith.constant 0 : index
      %13 = vector.load %arg13[%c0_9, %c0_10] : memref<256x128xf32, #tpu.memory_space<vmem>>, vector<256x128xf32>
      %c0_11 = arith.constant 0 : index
      %c0_12 = arith.constant 0 : index
      %14 = vector.load %arg5[%c0_11, %c0_12] : memref<256x1xf32, #tpu.memory_space<vmem>>, vector<256x1xf32>
      %15 = vector.broadcast %14 : vector<256x1xf32> to vector<256x128xf32>
      %16 = arith.mulf %13, %15 : vector<256x128xf32>
      %17 = arith.truncf %16 : vector<256x128xf32> to vector<256x128xbf16>
      %c0_13 = arith.constant 0 : index
      %c0_14 = arith.constant 0 : index
      %18 = vector.load %arg4[%c0_13, %c0_14] : memref<256x128xbf16, #tpu.memory_space<vmem>>, vector<256x128xbf16>
      %19 = tpu.concatenate %17, %18 in 1 : vector<256x128xbf16>, vector<256x128xbf16> -> vector<256x256xbf16>
      %c0_15 = arith.constant 0 : index
      %c0_16 = arith.constant 0 : index
      %20 = vector.load %arg6[%c0_15, %c0_16] : memref<256x128xbf16, #tpu.memory_space<vmem>>, vector<256x128xbf16>
      %cst_17 = arith.constant dense<0.000000e+00> : vector<256x128xf32>
      %21 = tpu.matmul %19, %20, %cst_17 {dimension_numbers = #tpu.dot_dimension_numbers<[1], [0], [0], [1], [0, 0, 1, 1], [], []>} : vector<256x256xbf16>, vector<256x128xbf16>, vector<256x128xf32> -> vector<256x128xf32>
      %c0_18 = arith.constant 0 : index
      %c0_19 = arith.constant 0 : index
      %22 = vector.load %arg7[%c0_18, %c0_19] : memref<1x128xf32, #tpu.memory_space<vmem>>, vector<1x128xf32>
      %23 = vector.broadcast %22 : vector<1x128xf32> to vector<256x128xf32>
      %24 = arith.addf %21, %23 : vector<256x128xf32>
      %cst_20 = arith.constant 0.000000e+00 : f32
      %25 = vector.broadcast %cst_20 : f32 to vector<256x128xf32>
      %26 = arith.maximumf %24, %25 : vector<256x128xf32>
      %27 = arith.truncf %26 : vector<256x128xf32> to vector<256x128xbf16>
      %c0_21 = arith.constant 0 : index
      %c0_22 = arith.constant 0 : index
      %28 = vector.load %arg8[%c0_21, %c0_22] : memref<128x128xbf16, #tpu.memory_space<vmem>>, vector<128x128xbf16>
      %cst_23 = arith.constant dense<0.000000e+00> : vector<256x128xf32>
      %29 = tpu.matmul %27, %28, %cst_23 {dimension_numbers = #tpu.dot_dimension_numbers<[1], [0], [0], [1], [0, 0, 1, 1], [], []>} : vector<256x128xbf16>, vector<128x128xbf16>, vector<256x128xf32> -> vector<256x128xf32>
      %c0_24 = arith.constant 0 : index
      %c0_25 = arith.constant 0 : index
      %30 = vector.load %arg9[%c0_24, %c0_25] : memref<1x128xf32, #tpu.memory_space<vmem>>, vector<1x128xf32>
      %31 = vector.broadcast %30 : vector<1x128xf32> to vector<256x128xf32>
      %32 = arith.addf %29, %31 : vector<256x128xf32>
      %cst_26 = arith.constant 0.000000e+00 : f32
      %33 = vector.broadcast %cst_26 : f32 to vector<256x128xf32>
      %34 = arith.maximumf %32, %33 : vector<256x128xf32>
      %35 = arith.truncf %34 : vector<256x128xf32> to vector<256x128xbf16>
      %c0_27 = arith.constant 0 : index
      %c0_28 = arith.constant 0 : index
      %36 = vector.load %arg10[%c0_27, %c0_28] : memref<128x128xbf16, #tpu.memory_space<vmem>>, vector<128x128xbf16>
      %cst_29 = arith.constant dense<0.000000e+00> : vector<256x128xf32>
      %37 = tpu.matmul %35, %36, %cst_29 {dimension_numbers = #tpu.dot_dimension_numbers<[1], [0], [0], [1], [0, 0, 1, 1], [], []>} : vector<256x128xbf16>, vector<128x128xbf16>, vector<256x128xf32> -> vector<256x128xf32>
      %c0_30 = arith.constant 0 : index
      %c0_31 = arith.constant 0 : index
      %38 = vector.load %arg11[%c0_30, %c0_31] : memref<1x128xf32, #tpu.memory_space<vmem>>, vector<1x128xf32>
      %39 = vector.broadcast %38 : vector<1x128xf32> to vector<256x128xf32>
      %40 = arith.addf %37, %39 : vector<256x128xf32>
      %c0_32 = arith.constant 0 : index
      %c0_33 = arith.constant 0 : index
      %41 = vector.load %arg12[%c0_32, %c0_33] : memref<256x128xf32, #tpu.memory_space<vmem>>, vector<256x128xf32>
      tpu.vector_store %arg12[%c0_32, %c0_33], %40 {strides = array<i32>} : memref<256x128xf32, #tpu.memory_space<vmem>>, vector<256x128xf32>,
    } else {
    }
    return
  }
  func.func @transform_0(%arg0: i32, %arg1: i32) -> (i32, i32) {
    %c0_i32 = arith.constant 0 : i32
    return %arg0, %arg1 : i32, i32
  }
  func.func @transform_1(%arg0: i32, %arg1: i32) -> (i32, i32) {
    %c0_i32 = arith.constant 0 : i32
    %c0_i32_0 = arith.constant 0 : i32
    return %arg1, %c0_i32 : i32, i32
  }
  func.func @transform_2(%arg0: i32, %arg1: i32) -> (i32, i32) {
    %c0_i32 = arith.constant 0 : i32
    %c0_i32_0 = arith.constant 0 : i32
    return %arg0, %c0_i32 : i32, i32
  }
  func.func @transform_3(%arg0: i32, %arg1: i32) -> (i32, i32) {
    %c0_i32 = arith.constant 0 : i32
    %c0_i32_0 = arith.constant 0 : i32
    return %arg0, %c0_i32 : i32, i32
  }
  func.func @transform_4(%arg0: i32, %arg1: i32) -> (i32, i32) {
    %c0_i32 = arith.constant 0 : i32
    %c0_i32_0 = arith.constant 0 : i32
    %c0_i32_1 = arith.constant 0 : i32
    return %c0_i32, %c0_i32_0 : i32, i32
  }
  func.func @transform_5(%arg0: i32, %arg1: i32) -> (i32, i32) {
    %c0_i32 = arith.constant 0 : i32
    %c0_i32_0 = arith.constant 0 : i32
    %c0_i32_1 = arith.constant 0 : i32
    return %c0_i32, %c0_i32_0 : i32, i32
  }
  func.func @transform_6(%arg0: i32, %arg1: i32) -> (i32, i32) {
    %c0_i32 = arith.constant 0 : i32
    %c0_i32_0 = arith.constant 0 : i32
    %c0_i32_1 = arith.constant 0 : i32
    return %c0_i32, %c0_i32_0 : i32, i32
  }
  func.func @transform_7(%arg0: i32, %arg1: i32) -> (i32, i32) {
    %c0_i32 = arith.constant 0 : i32
    %c0_i32_0 = arith.constant 0 : i32
    %c0_i32_1 = arith.constant 0 : i32
    return %c0_i32, %c0_i32_0 : i32, i32
  }
  func.func @transform_8(%arg0: i32, %arg1: i32) -> (i32, i32) {
    %c0_i32 = arith.constant 0 : i32
    %c0_i32_0 = arith.constant 0 : i32
    %c0_i32_1 = arith.constant 0 : i32
    return %c0_i32, %c0_i32_0 : i32, i32
  }
  func.func @transform_9(%arg0: i32, %arg1: i32) -> (i32, i32) {
    %c0_i32 = arith.constant 0 : i32
    %c0_i32_0 = arith.constant 0 : i32
    %c0_i32_1 = arith.constant 0 : i32
    return %c0_i32, %c0_i32_0 : i32, i32
  }
  func.func @transform_10(%arg0: i32, %arg1: i32) -> (i32, i32) {
    %c0_i32 = arith.constant 0 : i32
    %c0_i32_0 = arith.constant 0 : i32
    return %arg0, %c0_i32 : i32, i32
  }
}

module attributes {stable_mosaic.version = 11 : i64} {
  func.func @gnn_encoder_kernel(%arg0: i32, %arg1: i32, %arg2: memref<256x256xi8, #tpu.memory_space<vmem>>, %arg3: memref<256x128xbf16, #tpu.memory_space<vmem>>, %arg4: memref<256x128xbf16, #tpu.memory_space<vmem>>, %arg5: memref<256x1xf32, #tpu.memory_space<vmem>>, %arg6: memref<256x128xbf16, #tpu.memory_space<vmem>>, %arg7: memref<1x128xf32, #tpu.memory_space<vmem>>, %arg8: memref<128x128xbf16, #tpu.memory_space<vmem>>, %arg9: memref<1x128xf32, #tpu.memory_space<vmem>>, %arg10: memref<128x128xbf16, #tpu.memory_space<vmem>>, %arg11: memref<1x128xf32, #tpu.memory_space<vmem>>, %arg12: memref<256x128xf32, #tpu.memory_space<vmem>>, %arg13: memref<256x128xf32, #tpu.memory_space<vmem>>) attributes {dimension_semantics = [#tpu.dimension_semantics<parallel>, #tpu.dimension_semantics<arbitrary>], iteration_bounds = array<i64: 2, 2>, scalar_prefetch = 0 : i64, scratch_operands = 1 : i64, tpu.core_type = #tpu.core_type<tc>, window_params = [{transform_indices = @transform_0, window_bounds = array<i64: 256, 256>}, {transform_indices = @transform_1, window_bounds = array<i64: 256, 128>}, {transform_indices = @transform_2, window_bounds = array<i64: 256, 128>}, {transform_indices = @transform_3, window_bounds = array<i64: 256, 1>}, {pipeline_mode = #tpu.pipeline_mode<synchronous>, transform_indices = @transform_4, window_bounds = array<i64: 256, 128>}, {pipeline_mode = #tpu.pipeline_mode<synchronous>, transform_indices = @transform_5, window_bounds = array<i64: 1, 128>}, {pipeline_mode = #tpu.pipeline_mode<synchronous>, transform_indices = @transform_6, window_bounds = array<i64: 128, 128>}, {pipeline_mode = #tpu.pipeline_mode<synchronous>, transform_indices = @transform_7, window_bounds = array<i64: 1, 128>}, {pipeline_mode = #tpu.pipeline_mode<synchronous>, transform_indices = @transform_8, window_bounds = array<i64: 128, 128>}, {pipeline_mode = #tpu.pipeline_mode<synchronous>, transform_indices = @transform_9, window_bounds = array<i64: 1, 128>}, {transform_indices = @transform_10, window_bounds = array<i64: 256, 128>}]} {
    %c0_i32 = arith.constant 0 : i32
    %0 = arith.cmpi eq, %arg1, %c0_i32 : i32
    %1 = arith.extui %0 : i1 to i32
    %c0_i32_0 = arith.constant 0 : i32
    %2 = arith.cmpi ne, %1, %c0_i32_0 : i32
    scf.if %2 {
      %cst_9 = arith.constant 0.000000e+00 : f32
      %13 = vector.broadcast %cst_9 : f32 to vector<256x128xf32>
      %c0_10 = arith.constant 0 : index
      %c0_11 = arith.constant 0 : index
      %14 = vector.load %arg13[%c0_10, %c0_11] : memref<256x128xf32, #tpu.memory_space<vmem>>, vector<256x128xf32>
      tpu.vector_store %arg13[%c0_10, %c0_11], %13 {strides = array<i32>} : memref<256x128xf32, #tpu.memory_space<vmem>>, vector<256x128xf32>,
    } else {
    }
    %c0 = arith.constant 0 : index
    %c0_1 = arith.constant 0 : index
    %3 = vector.load %arg13[%c0, %c0_1] : memref<256x128xf32, #tpu.memory_space<vmem>>, vector<256x128xf32>
    %c0_2 = arith.constant 0 : index
    %c0_3 = arith.constant 0 : index
    %4 = vector.load %arg2[%c0_2, %c0_3] : memref<256x256xi8, #tpu.memory_space<vmem>>, vector<256x256xi8>
    %5 = arith.sitofp %4 : vector<256x256xi8> to vector<256x256xbf16>
    %c0_4 = arith.constant 0 : index
    %c0_5 = arith.constant 0 : index
    %6 = vector.load %arg3[%c0_4, %c0_5] : memref<256x128xbf16, #tpu.memory_space<vmem>>, vector<256x128xbf16>
    %cst = arith.constant dense<0.000000e+00> : vector<256x128xf32>
    %7 = tpu.matmul %5, %6, %cst {dimension_numbers = #tpu.dot_dimension_numbers<[1], [0], [0], [1], [0, 0, 1, 1], [], []>} : vector<256x256xbf16>, vector<256x128xbf16>, vector<256x128xf32> -> vector<256x128xf32>
    %8 = arith.addf %3, %7 : vector<256x128xf32>
    %c0_6 = arith.constant 0 : index
    %c0_7 = arith.constant 0 : index
    %9 = vector.load %arg13[%c0_6, %c0_7] : memref<256x128xf32, #tpu.memory_space<vmem>>, vector<256x128xf32>
    tpu.vector_store %arg13[%c0_6, %c0_7], %8 {strides = array<i32>} : memref<256x128xf32, #tpu.memory_space<vmem>>, vector<256x128xf32>,
    %c1_i32 = arith.constant 1 : i32
    %10 = arith.cmpi eq, %arg1, %c1_i32 : i32
    %11 = arith.extui %10 : i1 to i32
    %c0_i32_8 = arith.constant 0 : i32
    %12 = arith.cmpi ne, %11, %c0_i32_8 : i32
    scf.if %12 {
      %c0_9 = arith.constant 0 : index
      %c0_10 = arith.constant 0 : index
      %13 = vector.load %arg13[%c0_9, %c0_10] : memref<256x128xf32, #tpu.memory_space<vmem>>, vector<256x128xf32>
      %c0_11 = arith.constant 0 : index
      %c0_12 = arith.constant 0 : index
      %14 = vector.load %arg5[%c0_11, %c0_12] : memref<256x1xf32, #tpu.memory_space<vmem>>, vector<256x1xf32>
      %15 = vector.broadcast %14 : vector<256x1xf32> to vector<256x128xf32>
      %16 = arith.mulf %13, %15 : vector<256x128xf32>
      %17 = arith.truncf %16 : vector<256x128xf32> to vector<256x128xbf16>
      %c0_13 = arith.constant 0 : index
      %c0_14 = arith.constant 0 : index
      %18 = vector.load %arg4[%c0_13, %c0_14] : memref<256x128xbf16, #tpu.memory_space<vmem>>, vector<256x128xbf16>
      %19 = tpu.concatenate %17, %18 in 1 : vector<256x128xbf16>, vector<256x128xbf16> -> vector<256x256xbf16>
      %c0_15 = arith.constant 0 : index
      %c0_16 = arith.constant 0 : index
      %20 = vector.load %arg6[%c0_15, %c0_16] : memref<256x128xbf16, #tpu.memory_space<vmem>>, vector<256x128xbf16>
      %cst_17 = arith.constant dense<0.000000e+00> : vector<256x128xf32>
      %21 = tpu.matmul %19, %20, %cst_17 {dimension_numbers = #tpu.dot_dimension_numbers<[1], [0], [0], [1], [0, 0, 1, 1], [], []>} : vector<256x256xbf16>, vector<256x128xbf16>, vector<256x128xf32> -> vector<256x128xf32>
      %c0_18 = arith.constant 0 : index
      %c0_19 = arith.constant 0 : index
      %22 = vector.load %arg7[%c0_18, %c0_19] : memref<1x128xf32, #tpu.memory_space<vmem>>, vector<1x128xf32>
      %23 = vector.broadcast %22 : vector<1x128xf32> to vector<256x128xf32>
      %24 = arith.addf %21, %23 : vector<256x128xf32>
      %cst_20 = arith.constant 0.000000e+00 : f32
      %25 = vector.broadcast %cst_20 : f32 to vector<256x128xf32>
      %26 = arith.maximumf %24, %25 : vector<256x128xf32>
      %27 = arith.truncf %26 : vector<256x128xf32> to vector<256x128xbf16>
      %c0_21 = arith.constant 0 : index
      %c0_22 = arith.constant 0 : index
      %28 = vector.load %arg8[%c0_21, %c0_22] : memref<128x128xbf16, #tpu.memory_space<vmem>>, vector<128x128xbf16>
      %cst_23 = arith.constant dense<0.000000e+00> : vector<256x128xf32>
      %29 = tpu.matmul %27, %28, %cst_23 {dimension_numbers = #tpu.dot_dimension_numbers<[1], [0], [0], [1], [0, 0, 1, 1], [], []>} : vector<256x128xbf16>, vector<128x128xbf16>, vector<256x128xf32> -> vector<256x128xf32>
      %c0_24 = arith.constant 0 : index
      %c0_25 = arith.constant 0 : index
      %30 = vector.load %arg9[%c0_24, %c0_25] : memref<1x128xf32, #tpu.memory_space<vmem>>, vector<1x128xf32>
      %31 = vector.broadcast %30 : vector<1x128xf32> to vector<256x128xf32>
      %32 = arith.addf %29, %31 : vector<256x128xf32>
      %cst_26 = arith.constant 0.000000e+00 : f32
      %33 = vector.broadcast %cst_26 : f32 to vector<256x128xf32>
      %34 = arith.maximumf %32, %33 : vector<256x128xf32>
      %35 = arith.truncf %34 : vector<256x128xf32> to vector<256x128xbf16>
      %c0_27 = arith.constant 0 : index
      %c0_28 = arith.constant 0 : index
      %36 = vector.load %arg10[%c0_27, %c0_28] : memref<128x128xbf16, #tpu.memory_space<vmem>>, vector<128x128xbf16>
      %cst_29 = arith.constant dense<0.000000e+00> : vector<256x128xf32>
      %37 = tpu.matmul %35, %36, %cst_29 {dimension_numbers = #tpu.dot_dimension_numbers<[1], [0], [0], [1], [0, 0, 1, 1], [], []>} : vector<256x128xbf16>, vector<128x128xbf16>, vector<256x128xf32> -> vector<256x128xf32>
      %c0_30 = arith.constant 0 : index
      %c0_31 = arith.constant 0 : index
      %38 = vector.load %arg11[%c0_30, %c0_31] : memref<1x128xf32, #tpu.memory_space<vmem>>, vector<1x128xf32>
      %39 = vector.broadcast %38 : vector<1x128xf32> to vector<256x128xf32>
      %40 = arith.addf %37, %39 : vector<256x128xf32>
      %c0_32 = arith.constant 0 : index
      %c0_33 = arith.constant 0 : index
      %41 = vector.load %arg12[%c0_32, %c0_33] : memref<256x128xf32, #tpu.memory_space<vmem>>, vector<256x128xf32>
      tpu.vector_store %arg12[%c0_32, %c0_33], %40 {strides = array<i32>} : memref<256x128xf32, #tpu.memory_space<vmem>>, vector<256x128xf32>,
    } else {
    }
    return
  }
  func.func @transform_0(%arg0: i32, %arg1: i32) -> (i32, i32) {
    %c0_i32 = arith.constant 0 : i32
    return %arg0, %arg1 : i32, i32
  }
  func.func @transform_1(%arg0: i32, %arg1: i32) -> (i32, i32) {
    %c0_i32 = arith.constant 0 : i32
    %c0_i32_0 = arith.constant 0 : i32
    return %arg1, %c0_i32 : i32, i32
  }
  func.func @transform_2(%arg0: i32, %arg1: i32) -> (i32, i32) {
    %c0_i32 = arith.constant 0 : i32
    %c0_i32_0 = arith.constant 0 : i32
    return %arg0, %c0_i32 : i32, i32
  }
  func.func @transform_3(%arg0: i32, %arg1: i32) -> (i32, i32) {
    %c0_i32 = arith.constant 0 : i32
    %c0_i32_0 = arith.constant 0 : i32
    return %arg0, %c0_i32 : i32, i32
  }
  func.func @transform_4(%arg0: i32, %arg1: i32) -> (i32, i32) {
    %c0_i32 = arith.constant 0 : i32
    %c0_i32_0 = arith.constant 0 : i32
    %c0_i32_1 = arith.constant 0 : i32
    return %c0_i32, %c0_i32_0 : i32, i32
  }
  func.func @transform_5(%arg0: i32, %arg1: i32) -> (i32, i32) {
    %c0_i32 = arith.constant 0 : i32
    %c0_i32_0 = arith.constant 0 : i32
    %c0_i32_1 = arith.constant 0 : i32
    return %c0_i32, %c0_i32_0 : i32, i32
  }
  func.func @transform_6(%arg0: i32, %arg1: i32) -> (i32, i32) {
    %c0_i32 = arith.constant 0 : i32
    %c0_i32_0 = arith.constant 0 : i32
    %c0_i32_1 = arith.constant 0 : i32
    return %c0_i32, %c0_i32_0 : i32, i32
  }
  func.func @transform_7(%arg0: i32, %arg1: i32) -> (i32, i32) {
    %c0_i32 = arith.constant 0 : i32
    %c0_i32_0 = arith.constant 0 : i32
    %c0_i32_1 = arith.constant 0 : i32
    return %c0_i32, %c0_i32_0 : i32, i32
  }
  func.func @transform_8(%arg0: i32, %arg1: i32) -> (i32, i32) {
    %c0_i32 = arith.constant 0 : i32
    %c0_i32_0 = arith.constant 0 : i32
    %c0_i32_1 = arith.constant 0 : i32
    return %c0_i32, %c0_i32_0 : i32, i32
  }
  func.func @transform_9(%arg0: i32, %arg1: i32) -> (i32, i32) {
    %c0_i32 = arith.constant 0 : i32
    %c0_i32_0 = arith.constant 0 : i32
    %c0_i32_1 = arith.constant 0 : i32
    return %c0_i32, %c0_i32_0 : i32, i32
  }
  func.func @transform_10(%arg0: i32, %arg1: i32) -> (i32, i32) {
    %c0_i32 = arith.constant 0 : i32
    %c0_i32_0 = arith.constant 0 : i32
    return %arg0, %c0_i32 : i32, i32
  }
}

</mosaic_0001>

<bundles_post_ra>
// kernel: tpu_custom_call.1
= control target key start
LH: loop header
LB: loop body
LE: loop exit
PB: predicated region body
PF: predicated region fallthrough
CT: control target
= control target key end

     0   :  { %s4754_s0 = inlined_call_operand.hbm [shape: s8[512,512], index: 0, kind: input, shape index: {}]   ;;  %s4755_s1 = inlined_call_operand.hbm [shape: bf16[512,128], index: 1, kind: input, shape index: {}]   ;;  %s4756_s2 = inlined_call_operand.hbm [shape: bf16[512,128], index: 2, kind: input, shape index: {}]   ;;  %s4757_s3 = inlined_call_operand.hbm [shape: f32[512,1], index: 3, kind: input, shape index: {}]   ;;  %s4758_s4 = inlined_call_operand.hbm [shape: bf16[256,128], index: 4, kind: input, shape index: {}]   ;;  %s4759_s5 = inlined_call_operand.hbm [shape: f32[1,128], index: 5, kind: input, shape index: {}]   ;;  %s4760_s6 = inlined_call_operand.hbm [shape: bf16[128,128], index: 6, kind: input, shape index: {}]   ;;  %s4761_s7 = inlined_call_operand.hbm [shape: f32[1,128], index: 7, kind: input, shape index: {}]   ;;  %s4762_s8 = inlined_call_operand.hbm [shape: bf16[128,128], index: 8, kind: input, shape index: {}]   ;;  %s4763_s9 = inlined_call_operand.hbm [shape: f32[1,128], index: 9, kind: input, shape index: {}]   ;;  %s4764_s10 = inlined_call_operand.hbm [shape: f32[512,128], index: 10, kind: output, shape index: {}]  }
   0x1   :  { %4792 = sst [smem:[#allocation42_spill]] %s4754_s0 }
   0x2   :  { %4793 = sst [smem:[#allocation43_spill]] %s4755_s1 }
   0x3   :  { %4794 = sst [smem:[#allocation44_spill]] %s4756_s2 }
   0x4   :  { %4795 = sst [smem:[#allocation45_spill]] %s4757_s3 }
   0x5   :  { %4796 = sst [smem:[#allocation46_spill]] %s4758_s4 }
   0x6   :  { %4797 = sst [smem:[#allocation47_spill]] %s4759_s5 }
   0x7   :  { %4798 = sst [smem:[#allocation48_spill]] %s4760_s6 }
   0x8   :  { %4799 = sst [smem:[#allocation49_spill]] %s4761_s7 }
   0x9   :  { %4800 = sst [smem:[#allocation50_spill]] %s4762_s8 }
   0xa   :  { %4801 = sst [smem:[#allocation51_spill]] %s4763_s9 }
   0xb   :  { %4802 = sst [smem:[#allocation52_spill]] %s4764_s10 }
   0xc   :  { %15 = vsyncpa [#allocation4], 0 }
   0xd   :  { %17 = vsyncpa [#allocation4 + $0x1], 0 }
   0xe   :  { %18 = vsyncpa [#allocation7], 0 }
   0xf   :  { %20 = vsyncpa [#allocation7 + $0x1], 0 }
  0x10   :  { %21 = vsyncpa [#allocation10], 0 }
  0x11   :  { %23 = vsyncpa [#allocation10 + $0x1], 0 }
  0x12   :  { %24 = vsyncpa [#allocation13], 0 }
  0x13   :  { %25 = vsyncpa [#allocation16], 0 }
  0x14   :  { %26 = vsyncpa [#allocation19], 0 }
  0x15   :  { %27 = vsyncpa [#allocation5], 0 }
  0x16   :  { %29 = vsyncpa [#allocation5 + $0x1], 0  ;;  %s3904_s13 = smov 0   ;;  %s3906_s14 = smov 0  }
  0x17   :  { %s3908_s15 = smov 0   ;;  %s3910_s16 = smov 0  }
  0x18   :  { %s3912_s17 = smov 0   ;;  %s3914_s18 = smov 0  }
  0x19   :  { %s3916_s19 = smov 0   ;;  %s3918_s20 = smov 0  }
  0x1a   :  { %s3920_s21 = smov 0   ;;  %s3922_s22 = smov 0  }
  0x1b   :  { %s3924_s23 = smov 0   ;;  %s3926_s24 = smov 0  }
  0x1c   :  { %s3928_s25 = smov 0   ;;  %s3930_s26 = smov 0  }
  0x1d LB: > { %4803 = sst [smem:[#allocation30_spill]] %s3773_s13  ;;  %s3975_s27 = sadd.s32 4294967295, %s3825_s26   ;;  %s3825_s26 = sphi %s3930_s26, %s35_s26   ;;  %s3821_s25 = sphi %s3928_s25, %s4895_s25   ;;  %s3817_s24 = sphi %s3926_s24, %s4886_s24   ;;  %s3813_s23 = sphi %s3924_s23, %s4894_s23   ;;  %s3809_s22 = sphi %s3922_s22, %s4885_s22   ;;  %s3805_s21 = sphi %s3920_s21, %s4893_s21   ;;  %s3801_s20 = sphi %s3918_s20, %s4892_s20   ;;  %s3797_s19 = sphi %s3916_s19, %s4884_s19   ;;  %s3793_s18 = sphi %s3914_s18, %s4891_s18   ;;  %s3789_s17 = sphi %s3912_s17, %s4890_s17   ;;  %s3785_s16 = sphi %s3910_s16, %s4889_s16   ;;  %s3781_s15 = sphi %s3908_s15, %s4888_s15   ;;  %s3777_s14 = sphi %s3906_s14, %s4882_s14   ;;  %s3773_s13 = sphi %s3904_s13, %s4881_s13  }
  0x1e   : > { %4804 = sst [smem:[#allocation31_spill]] %s3777_s14  ;;  %p2587_p0 = scmp.ge.s32.totalorder %s3825_s26, 1 }
  0x1f   : > { %4805 = sst [smem:[#allocation32_spill]] %s3781_s15  ;;  %p4773_p1 = scmp.eq.s32.totalorder %s3975_s27, 0 }
  0x20   : > { %4806 = sst [smem:[#allocation33_spill]] %s3797_s19  ;;  %p310_p2 = scmp.lt.s32.totalorder %s3825_s26, 5 }
  0x21   : > { %4807 = sst [smem:[#allocation34_spill]] %s3801_s20  ;;  %s3827_s29 = smov [#allocation11]  }
  0x22   : > { %4808 = sst [smem:[#allocation35_spill]] %s3809_s22  ;;  %p3980_p3 = pnand %p2587_p0, %p310_p2 }
  0x23   : > { %4809 = sst [smem:[#allocation36_spill]] %s3813_s23  ;;  %s322_s30 = sshll.u32 %s3827_s29, 4  ;;  %s3984_s30 = int_to_ptr.vmem [resolvable:$true] %s322_s30 }
  0x24   : > { %4810 = sst [smem:[#allocation37_spill]] %s3817_s24  ;;  %p3118_p4 = pneg %p3980_p3 }
  0x25   : > { %s4811_s28 = scalar_select %p3980_p3, 1, 0 }
  0x26   : > { %p3990_p5 = pnand %p3118_p4, %p4773_p1  ;;  %s3828_s12 = smov [#allocation12]  }
  0x27   : > { %4812 = sst [smem:[#allocation38_spill]] %s4811_s28  ;;  %s336_s10 = sshll.u32 %s3828_s12, 4  ;;  %s3994_s10 = int_to_ptr.vmem [resolvable:$true] %s336_s10 }
  0x28   : > { %s4813_s11 = scalar_select %p3990_p5, 1, 0 }
  0x29   : > { %s3829_s23 = smov [#allocation15]   ;;  %s4814_s4 = sld [smem:[#allocation46_spill]] }
  0x2a   : > { %s3996_s22 = sshll.u32 %s3829_s23, 4  ;;  %p4006_p7 = pneg %p3990_p5  ;;  %s361_s22 = int_to_ptr.vmem [resolvable:$true] %s3996_s22 }
  0x2f   : > { %s3363_s29 = scalar_lea.hbm %s4814_s4, 2048 }
  0x30   : > { %p3364_p6 = scmp.ne.s32.totalorder %s4814_s4, %s3363_s29  ;;  %p3370_p10 = scmp.lt.u32.totalorder %s3363_s29, %s4814_s4 }
  0x32   : > { %p3366_p8 = pnand %p4006_p7, %p3364_p6 }
  0x34   : > { %p3367_p9 = pneg %p3366_p8 }
  0x36   : > { %p3372_p11 = pnand %p3370_p10, %p3367_p9 }
  0x38   : > { %3375 = shalt.err (!%p3372_p11)
}
  0x39   : > { %s3376_s2 = scalar_lea.vmem %s3984_s30, 2048  ;;  %p3384_p2 = scmp.lt.s32.totalorder %s3984_s30, %s3984_s30 }
  0x3a   : > { %p3377_p12 = scmp.ne.s32.totalorder %s3984_s30, %s3376_s2  ;;  %p3385_p4 = scmp.lt.s32.totalorder %s3376_s2, %s3376_s2 }
  0x3c   : > { %p3379_p13 = pnand %p3377_p12, %p4006_p7  ;;  %p3386_p6 = por %p3385_p4, %p3384_p2 }
  0x3e   : > { %p3380_p0 = pneg %p3379_p13 }
  0x40   : > { %p3387_p8 = pnand %p3386_p6, %p3380_p0 }
  0x42   : > { %3390 = shalt.err (!%p3387_p8)
}
  0x43   : > { %s4775_s3 = smov 64   ;;  %s4777_s13 = smov 4  }
  0x44   : > { %3121 = dma.hbm_to_vmem [thread:$0]  (!%p3990_p5), %s4814_s4, 2048, %s3984_s30, [#allocation10], %s4775_s3, %s4775_s3, %s4777_s13  }
  0x45   : > { %s4816_s5 = sld [smem:[#allocation47_spill]] }
  0x4b   : > { %s3391_s2 = scalar_lea.hbm %s4816_s5, 16 }
  0x4c   : > { %p3392_p9 = scmp.ne.s32.totalorder %s4816_s5, %s3391_s2  ;;  %p3398_p12 = scmp.lt.u32.totalorder %s3391_s2, %s4816_s5 }
  0x4e   : > { %p3394_p10 = pnand %p3392_p9, %p4006_p7 }
  0x50   : > { %p3395_p11 = pneg %p3394_p10 }
  0x52   : > { %p3400_p13 = pnand %p3398_p12, %p3395_p11 }
  0x54   : > { %3403 = shalt.err (!%p3400_p13)
}
  0x55   : > { %s3404_s30 = scalar_lea.vmem %s3994_s10, 16  ;;  %s3411_s0 = scalar_lea.vmem %s3994_s10, 32 }
  0x56   : > { %p3405_p0 = scmp.ne.s32.totalorder %s3994_s10, %s3404_s30  ;;  %p3412_p6 = scmp.lt.s32.totalorder %s3994_s10, %s3994_s10 }
  0x57   : > { %p3413_p8 = scmp.lt.s32.totalorder %s3411_s0, %s3404_s30 }
  0x58   : > { %p3407_p2 = pnand %p3405_p0, %p4006_p7 }
  0x59   : > { %p3414_p9 = por %p3413_p8, %p3412_p6 }
  0x5a   : > { %p3408_p4 = pneg %p3407_p2 }
  0x5c   : > { %p3415_p10 = pnand %p3414_p9, %p3408_p4 }
  0x5e   : > { %3418 = shalt.err (!%p3415_p10)
}
  0x5f   : > { %3124 = dma.hbm_to_vmem [thread:$0]  (!%p3990_p5), %s4816_s5, 16, %s3994_s10, [#allocation13]  }
  0x60   : > { %s4817_s7 = sld [smem:[#allocation49_spill]] }
  0x66   : > { %s3419_s29 = scalar_lea.hbm %s4817_s7, 16 }
  0x67   : > { %p3420_p11 = scmp.ne.s32.totalorder %s4817_s7, %s3419_s29  ;;  %p3426_p0 = scmp.lt.u32.totalorder %s3419_s29, %s4817_s7 }
  0x69   : > { %p3422_p12 = pnand %p3420_p11, %p4006_p7 }
  0x6b   : > { %p3423_p13 = pneg %p3422_p12 }
  0x6d   : > { %p3428_p2 = pnand %p3426_p0, %p3423_p13 }
  0x6f   : > { %3431 = shalt.err (!%p3428_p2)
}
  0x70   : > { %s3432_s0 = scalar_lea.vmem %s361_s22, 16  ;;  %s3439_s10 = scalar_lea.vmem %s361_s22, 32 }
  0x71   : > { %p3433_p4 = scmp.ne.s32.totalorder %s361_s22, %s3432_s0  ;;  %p3440_p9 = scmp.lt.s32.totalorder %s361_s22, %s361_s22 }
  0x72   : > { %p3441_p10 = scmp.lt.s32.totalorder %s3439_s10, %s3432_s0 }
  0x73   : > { %p3435_p6 = pnand %p3433_p4, %p4006_p7 }
  0x74   : > { %p3442_p1 = por %p3441_p10, %p3440_p9 }
  0x75   : > { %p3436_p8 = pneg %p3435_p6 }
  0x77   : > { %p3443_p3 = pnand %p3442_p1, %p3436_p8 }
  0x79   : > { %3446 = shalt.err (!%p3443_p3)
}
  0x7a   : > { %3130 = dma.hbm_to_vmem [thread:$0]  (!%p3990_p5), %s4817_s7, 16, %s361_s22, [#allocation16]  }
  0x7b   : > { %s44_s20 = sadd.s32 1, %s3817_s24  ;;  %s47_s28 = sadd.s32 1, %s3821_s25 }
  0x7c   : > { %p45_p1 = scmp.ge.s32.totalorder %s44_s20, 2  ;;  %p4781_p3 = scmp.eq.s32.totalorder %s3825_s26, 0 }
  0x7d   : > { %s82_s29 = sadd.s32 1, %s3793_s18  ;;  %p89_p11 = scmp.ne.s32.totalorder %s3793_s18, %s3789_s17 }
  0x7e   : > { %s4897_s20 = smov (%p45_p1, %s44_s20), 0  ;;  %s4899_s28 = smov (!%p45_p1, %s47_s28), %s3821_s25 }
  0x7f   : > { %4818 = sst [smem:[#allocation39_spill]] %s4897_s20  ;;  %s52_s12 = ssub.s32 %s3817_s24, %s4897_s20 }
  0x80   : > { %p49_p12 = scmp.ge.s32.totalorder %s4899_s28, 2  ;;  %p80_p13 = scmp.eq.s32.totalorder %s52_s12, 0 }
  0x81   : > { %p4086_p0 = por %p89_p11, %p4781_p3  ;;  %p95_p2 = scmp.ne.s32.totalorder %s3789_s17, %s3785_s16 }
  0x82   : > { %s4901_s28 = smov (%p49_p12, %s4899_s28), 0  ;;  %p4822_p4 = scmp.eq.s32.totalorder %s3975_s27, 0 }
  0x83   : > { %4820 = sst [smem:[#allocation40_spill]] %s4901_s28  ;;  %s4099_s2 = ssub.s32 %s3821_s25, %s4901_s28 }
  0x84   : > { %s4095_s23 = scalar_select %p80_p13, %s3793_s18, %s82_s29  }
  0x85   : > { %p4103_p6 = por %p95_p2, %p4822_p4  ;;  %s53_s0 = sor.u32 %s52_s12, %s4099_s2 }
  0x86   : > { %4821 = sst [smem:[#allocation41_spill]] %s4095_s23  ;;  %p4109_p9 = scmp.eq.s32.totalorder %s53_s0, 0 }
  0x87   : > { %s4823_s30 = scalar_select %p4103_p6, 1, 0 }
  0x88   : > { %s4824_s16 = scalar_select %p4109_p9, 1, 0 }
  0x89   : > { %p4780_p10 = scmp.lt.s32.totalorder %s3825_s26, 4  ;;  %s4785_s10 = sand.u32 1, %s3825_s26  }
  0x8a   : > { %s421_s15 = sand.u32 1, %s3793_s18   ;;  %s2696_s29 = sshll.u32 %s3817_s24, 11 }
  0x8b   : > { %s2600_s19 = sshll.u32 %s421_s15, 7  ;;  %s4825_s1 = sld [smem:[#allocation43_spill]] }
  0x8c   : > { %s423_s5 = scalar_lea.vmem [#allocation6], %s2600_s19  ;;  %p4128_p1 = pnand %p4780_p10, %p4086_p0 }
  0x8d   : > { %s430_s12 = sshll.u32 %s423_s5, 4  ;;  %s3832_s15 = smov [#allocation14]   ;;  %s4122_s12 = int_to_ptr.vmem [resolvable:$true] %s430_s12 }
  0x8e   : > { %s4132_s3 = sshll.u32 %s3832_s15, 4  ;;  %s4136_s13 = scalar_lea.sflag [#allocation7], %s4785_s10  ;;  %s347_s3 = int_to_ptr.vmem [resolvable:$true] %s4132_s3 }
  0x8f   : > { %p3449_p12 = pneg %p4128_p1 }
  0x91   : > { %s4120_s4 = scalar_lea.hbm %s4825_s1, %s2696_s29  ;;  %s3452_s19 = scalar_lea.hbm %s4825_s1, 4096 }
  0x92   : > { %s3447_s29 = scalar_lea.hbm %s4120_s4, 2048  ;;  %p3453_p0 = scmp.lt.u32.totalorder %s4120_s4, %s4825_s1 }
  0x93   : > { %p3448_p11 = scmp.ne.s32.totalorder %s4120_s4, %s3447_s29  ;;  %p3454_p4 = scmp.lt.u32.totalorder %s3452_s19, %s3447_s29 }
  0x94   : > { %p3456_p10 = scmp.lt.u32.totalorder %s3447_s29, %s4120_s4 }
  0x95   : > { %p3450_p13 = pnand %p3449_p12, %p3448_p11  ;;  %p3455_p8 = por %p3454_p4, %p3453_p0 }
  0x97   : > { %p3451_p2 = pneg %p3450_p13  ;;  %p3457_p3 = por %p3456_p10, %p3455_p8 }
  0x99   : > { %p3458_p6 = pnand %p3457_p3, %p3451_p2 }
  0x9b   : > { %3461 = shalt.err (!%p3458_p6)
}
  0x9c   : > { %s3462_s15 = scalar_lea.vmem %s4122_s12, 2048  ;;  %s3833_s5 = smov [#allocation6]  }
  0x9d   : > { %p3463_p11 = scmp.ne.s32.totalorder %s4122_s12, %s3462_s15  ;;  %s3467_s22 = sshll.u32 %s3833_s5, 4  ;;  %s3468_s22 = int_to_ptr.vmem [resolvable:$false] %s3467_s22 }
  0x9e   : > { %s3469_s7 = scalar_lea.vmem %s3468_s22, 4096  ;;  %p3470_p5 = scmp.lt.s32.totalorder %s4122_s12, %s3468_s22 }
  0x9f   : > { %p3465_p13 = pnand %p3463_p11, %p3449_p12  ;;  %p3471_p0 = scmp.lt.s32.totalorder %s3469_s7, %s3462_s15 }
  0xa1   : > { %p3466_p9 = pneg %p3465_p13  ;;  %p3472_p4 = por %p3471_p0, %p3470_p5 }
  0xa3   : > { %p3473_p8 = pnand %p3472_p4, %p3466_p9 }
  0xa5   : > { %3476 = shalt.err (!%p3473_p8)
}
  0xa6   : > { %s4827_s28 = smov 4   ;;  %s4828_s29 = smov 64  }
  0xa7   : > { %3143 = dma.hbm_to_vmem [thread:$0]  (!%p4128_p1), %s4120_s4, 2048, %s4122_s12, %s4136_s13, %s4828_s29, %s4828_s29, %s4827_s28  }
  0xa8   : > { %s4829_s6 = sld [smem:[#allocation48_spill]] }
  0xae   : > { %s3477_s22 = scalar_lea.hbm %s4829_s6, 1024 }
  0xaf   : > { %p3478_p5 = scmp.ne.s32.totalorder %s4829_s6, %s3477_s22  ;;  %p3484_p9 = scmp.lt.u32.totalorder %s3477_s22, %s4829_s6 }
  0xb1   : > { %p3480_p3 = pnand %p3478_p5, %p4006_p7 }
  0xb3   : > { %p3481_p6 = pneg %p3480_p3 }
  0xb5   : > { %p3486_p10 = pnand %p3484_p9, %p3481_p6 }
  0xb7   : > { %3489 = shalt.err (!%p3486_p10)
}
  0xb8   : > { %s3490_s1 = scalar_lea.vmem %s347_s3, 1024  ;;  %p3498_p11 = scmp.lt.s32.totalorder %s347_s3, %s347_s3 }
  0xb9   : > { %p3491_p1 = scmp.ne.s32.totalorder %s347_s3, %s3490_s1  ;;  %p3499_p13 = scmp.lt.s32.totalorder %s3490_s1, %s3490_s1 }
  0xbb   : > { %p3493_p12 = pnand %p3491_p1, %p4006_p7  ;;  %p3500_p0 = por %p3499_p13, %p3498_p11 }
  0xbd   : > { %p3494_p2 = pneg %p3493_p12 }
  0xbf   : > { %p3501_p4 = pnand %p3500_p0, %p3494_p2 }
  0xc1   : > { %3504 = shalt.err (!%p3501_p4)
}
  0xc2   : > { %p4830_p8 = scmp.ne.s32.totalorder %s4813_s11, 0  ;;  %s3834_s12 = smov [#allocation17]  }
  0xc3   : > { %s370_s19 = sshll.u32 %s3834_s12, 4  ;;  %s3835_s5 = smov [#allocation18]   ;;  %s371_s19 = int_to_ptr.vmem [resolvable:$true] %s370_s19 }
  0xc4   : > { %3127 = dma.hbm_to_vmem [thread:$0]  (!%p4830_p8), %s4829_s6, 1024, %s347_s3, [#allocation13], %s4828_s29, %s4828_s29, %s4827_s28  }
  0xc5   : > { %s384_s22 = sshll.u32 %s3835_s5, 4  ;;  %s4831_s8 = sld [smem:[#allocation50_spill]]  ;;  %s385_s22 = int_to_ptr.vmem [resolvable:$true] %s384_s22 }
  0xcb   : > { %s3505_s7 = scalar_lea.hbm %s4831_s8, 1024 }
  0xcc   : > { %p3506_p5 = scmp.ne.s32.totalorder %s4831_s8, %s3505_s7  ;;  %p3512_p9 = scmp.lt.u32.totalorder %s3505_s7, %s4831_s8 }
  0xce   : > { %p3508_p3 = pnand %p3506_p5, %p4006_p7 }
  0xd0   : > { %p3509_p6 = pneg %p3508_p3 }
  0xd2   : > { %p3514_p10 = pnand %p3512_p9, %p3509_p6 }
  0xd4   : > { %3517 = shalt.err (!%p3514_p10)
}
  0xd5   : > { %s3518_s3 = scalar_lea.vmem %s371_s19, 1024  ;;  %p3526_p11 = scmp.lt.s32.totalorder %s371_s19, %s371_s19 }
  0xd6   : > { %p3519_p1 = scmp.ne.s32.totalorder %s371_s19, %s3518_s3  ;;  %p3527_p13 = scmp.lt.s32.totalorder %s3518_s3, %s3518_s3 }
  0xd8   : > { %p3521_p12 = pnand %p3519_p1, %p4006_p7  ;;  %p3528_p0 = por %p3527_p13, %p3526_p11 }
  0xda   : > { %p3522_p2 = pneg %p3521_p12 }
  0xdc   : > { %p3529_p4 = pnand %p3528_p0, %p3522_p2 }
  0xde   : > { %3532 = shalt.err (!%p3529_p4)
}
  0xdf   : > { %3133 = dma.hbm_to_vmem [thread:$0]  (!%p4830_p8), %s4831_s8, 1024, %s371_s19, [#allocation16], %s4828_s29, %s4828_s29, %s4827_s28  }
  0xe0   : > { %s4832_s9 = sld [smem:[#allocation51_spill]] }
  0xe6   : > { %s3533_s5 = scalar_lea.hbm %s4832_s9, 16 }
  0xe7   : > { %p3534_p5 = scmp.ne.s32.totalorder %s4832_s9, %s3533_s5  ;;  %p3540_p9 = scmp.lt.u32.totalorder %s3533_s5, %s4832_s9 }
  0xe9   : > { %p3536_p3 = pnand %p3534_p5, %p4006_p7 }
  0xeb   : > { %p3537_p6 = pneg %p3536_p3 }
  0xed   : > { %p3542_p10 = pnand %p3540_p9, %p3537_p6 }
  0xef   : > { %3545 = shalt.err (!%p3542_p10)
}
  0xf0   : > { %s3546_s4 = scalar_lea.vmem %s385_s22, 16  ;;  %s3553_s19 = scalar_lea.vmem %s385_s22, 32 }
  0xf1   : > { %p3547_p1 = scmp.ne.s32.totalorder %s385_s22, %s3546_s4  ;;  %p3554_p11 = scmp.lt.s32.totalorder %s385_s22, %s385_s22 }
  0xf2   : > { %p3555_p13 = scmp.lt.s32.totalorder %s3553_s19, %s3546_s4 }
  0xf3   : > { %p3549_p12 = pnand %p3547_p1, %p4006_p7 }
  0xf4   : > { %p3556_p0 = por %p3555_p13, %p3554_p11 }
  0xf5   : > { %p3550_p2 = pneg %p3549_p12 }
  0xf7   : > { %p3557_p4 = pnand %p3556_p0, %p3550_p2 }
  0xf9   : > { %3560 = shalt.err (!%p3557_p4)
}
  0xfa   : > { %s4833_s23 = sld [smem:[#allocation34_spill]]  ;;  %s4834_s10 = sld [smem:[#allocation33_spill]] }
  0xfb   : > { %3136 = dma.hbm_to_vmem [thread:$0]  (!%p4830_p8), %s4832_s9, 16, %s385_s22, [#allocation19]  }
  0xfc   : > { %s56_s14 = sadd.s32 1, %s3805_s21  ;;  %p4835_p7 = scmp.ne.s32.totalorder %s4824_s16, 0 }
  0xfd   : > { %s395_s12 = sand.u32 1, %s3805_s21   ;;  %s2597_s5 = sshll.u32 %s3817_s24, 1 }
  0xfe   : > { %s4232_s11 = scalar_select %p4835_p7, %s3805_s21, %s56_s14  }
  0xff   : > { %p4836_p6 = scmp.eq.s32.totalorder %s3825_s26, 0  ;;  %p4837_p10 = scmp.eq.s32.totalorder %s3975_s27, 0 }
 0x100   : > { %p63_p5 = scmp.ne.s32.totalorder %s3805_s21, %s4833_s23  ;;  %p69_p3 = scmp.ne.s32.totalorder %s4833_s23, %s4834_s10 }
 0x101   : > { %s2595_s1 = sshll.u32 %s395_s12, 7  ;;  %s2695_s7 = sshll.u32 %s3821_s25, 5 }
 0x102   : > { %p65_p9 = por %p4836_p6, %p63_p5  ;;  %p4244_p1 = por %p4837_p10, %p69_p3 }
 0x103   : > { %s406_s0 = sadd.s32 %s2695_s7, %s2597_s5  ;;  %s399_s22 = scalar_lea.vmem [#allocation3], %s2595_s1 }
 0x104   : > { %s409_s4 = sshll.u32 %s399_s22, 4  ;;  %s2599_s16 = sshll.u32 %s406_s0, 7  ;;  %s4249_s4 = int_to_ptr.vmem [resolvable:$true] %s409_s4 }
 0x105   : > { %s4839_s20 = sld [smem:[#allocation42_spill]]  ;;  %p4841_p8 = scmp.lt.s32.totalorder %s3825_s26, 4 }
 0x106   : > { %s4262_s5 = scalar_lea.sflag [#allocation4], %s395_s12 }
 0x107   : > { %p4258_p12 = pnand %p4841_p8, %p65_p9 }
 0x109   : > { %p3563_p11 = pneg %p4258_p12 }
 0x10b   : > { %s4840_s10 = smov %s4839_s20  ;;  %s4254_s23 = scalar_lea.hbm %s4839_s20, %s2599_s16 }
 0x10c   : > { %s3561_s1 = scalar_lea.hbm %s4254_s23, 2048  ;;  %s3566_s22 = scalar_lea.hbm %s4840_s10, 8192 }
 0x10d   : > { %p3562_p2 = scmp.ne.s32.totalorder %s4254_s23, %s3561_s1  ;;  %p3567_p4 = scmp.lt.u32.totalorder %s4254_s23, %s4840_s10 }
 0x10e   : > { %p3568_p7 = scmp.lt.u32.totalorder %s3566_s22, %s3561_s1  ;;  %p3570_p3 = scmp.lt.u32.totalorder %s3561_s1, %s4254_s23 }
 0x10f   : > { %p3564_p13 = pnand %p3563_p11, %p3562_p2 }
 0x110   : > { %p3569_p5 = por %p3568_p7, %p3567_p4 }
 0x111   : > { %p3565_p0 = pneg %p3564_p13 }
 0x112   : > { %p3571_p6 = por %p3570_p3, %p3569_p5 }
 0x114   : > { %p3572_p9 = pnand %p3571_p6, %p3565_p0 }
 0x116   : > { %3575 = shalt.err (!%p3572_p9)
}
 0x117   : > { %s3576_s12 = scalar_lea.vmem %s4249_s4, 2048  ;;  %s3836_s3 = smov [#allocation3]  }
 0x118   : > { %p3577_p10 = scmp.ne.s32.totalorder %s4249_s4, %s3576_s12  ;;  %s3581_s20 = sshll.u32 %s3836_s3, 4  ;;  %s3582_s20 = int_to_ptr.vmem [resolvable:$false] %s3581_s20 }
 0x119   : > { %s3583_s7 = scalar_lea.vmem %s3582_s20, 4096  ;;  %p3584_p13 = scmp.lt.s32.totalorder %s4249_s4, %s3582_s20 }
 0x11a   : > { %p3579_p8 = pnand %p3577_p10, %p3563_p11  ;;  %p3585_p4 = scmp.lt.s32.totalorder %s3583_s7, %s3576_s12 }
 0x11c   : > { %p3580_p2 = pneg %p3579_p8  ;;  %p3586_p7 = por %p3585_p4, %p3584_p13 }
 0x11e   : > { %p3587_p5 = pnand %p3586_p7, %p3580_p2 }
 0x120   : > { %3590 = shalt.err (!%p3587_p5)
}
 0x121   : > { %s3837_s1 = smov 512   ;;  %s4843_s0 = sld [smem:[#allocation32_spill]] }
 0x122   : > { %s4844_s22 = sld [smem:[#allocation31_spill]]  ;;  %s4845_s16 = sld [smem:[#allocation30_spill]] }
 0x123   : > { %s3838_s19 = smov 256   ;;  %s3839_s12 = smov 16  }
 0x124   : > { %3140 = dma.hbm_to_vmem [thread:$0]  (!%p4258_p12), %s4254_s23, 2048, %s4249_s4, %s4262_s5, %s3837_s1, %s3838_s19, %s3839_s12  }
 0x125   : > { %s2586_s3 = sadd.s32 4294967294, %s3825_s26   ;;  %p4846_p11 = scmp.eq.s32.totalorder %s4099_s2, 0 }
 0x126   : > { %p297_p6 = scmp.eq.s32.totalorder %s3975_s27, 3  ;;  %p303_p9 = scmp.eq.s32.totalorder %s2586_s3, 3 }
 0x127   : > { %s108_s20 = sadd.s32 1, %s4843_s0  ;;  %p4847_p10 = scmp.eq.s32.totalorder %s3825_s26, 0 }
 0x128   : > { %s4295_s7 = scalar_select %p4846_p11, %s4843_s0, %s108_s20  }
 0x129   : > { %p115_p0 = scmp.ne.s32.totalorder %s4843_s0, %s4844_s22  ;;  %p121_p3 = scmp.ne.s32.totalorder %s4844_s22, %s4845_s16 }
 0x12a   : > { %p4848_p2 = scmp.eq.s32.totalorder %s3975_s27, 0  ;;  %s442_s2 = sand.u32 1, %s4843_s0  }
 0x12b   : > { %p117_p8 = por %p115_p0, %p4847_p10  ;;  %p4310_p4 = por %p297_p6, %p115_p0 }
 0x12c   : > { %p4306_p13 = por %p121_p3, %p4848_p2  ;;  %p4314_p12 = por %p303_p9, %p121_p3 }
 0x12d   : > { %s4850_s14 = scalar_select %p4310_p4, 1, 0 }
 0x12e   : > { %s4849_s6 = scalar_select %p4306_p13, 1, 0 }
 0x12f   : > { %s4851_s4 = scalar_select %p4314_p12, 1, 0 }
 0x130   : > { %s2697_s23 = sshll.u32 %s3821_s25, 11  ;;  %s2603_s5 = sshll.u32 %s442_s2, 7 }
 0x131   : > { %s4852_s16 = sld [smem:[#allocation44_spill]]  ;;  %p4854_p7 = scmp.lt.s32.totalorder %s3825_s26, 4 }
 0x132   : > { %s444_s20 = scalar_lea.vmem [#allocation8], %s2603_s5  ;;  %s4331_s8 = sshll.u32 %s442_s2, 8 }
 0x133   : > { %p4327_p5 = pnand %p4854_p7, %p117_p8  ;;  %s451_s0 = sshll.u32 %s444_s20, 4  ;;  %s4333_s0 = int_to_ptr.vmem [resolvable:$true] %s451_s0 }
 0x135   : > { %p3593_p0 = pneg %p4327_p5 }
 0x137   : > { %s4853_s12 = smov %s4852_s16  ;;  %s4323_s19 = scalar_lea.hbm %s4852_s16, %s2697_s23 }
 0x138   : > { %s3591_s1 = scalar_lea.hbm %s4323_s19, 2048  ;;  %s3596_s16 = scalar_lea.hbm %s4853_s12, 4096 }
 0x139   : > { %p3592_p11 = scmp.ne.s32.totalorder %s4323_s19, %s3591_s1  ;;  %p3597_p9 = scmp.lt.u32.totalorder %s4323_s19, %s4853_s12 }
 0x13a   : > { %p3598_p10 = scmp.lt.u32.totalorder %s3596_s16, %s3591_s1  ;;  %p3600_p2 = scmp.lt.u32.totalorder %s3591_s1, %s4323_s19 }
 0x13b   : > { %p3594_p3 = pnand %p3593_p0, %p3592_p11 }
 0x13c   : > { %p3599_p8 = por %p3598_p10, %p3597_p9 }
 0x13d   : > { %p3595_p6 = pneg %p3594_p3 }
 0x13e   : > { %p3601_p7 = por %p3600_p2, %p3599_p8 }
 0x140   : > { %p3602_p12 = pnand %p3601_p7, %p3595_p6 }
 0x142   : > { %3605 = shalt.err (!%p3602_p12)
}
 0x143   : > { %s3606_s2 = scalar_lea.vmem %s4333_s0, 2048  ;;  %s3840_s5 = smov [#allocation8]  }
 0x144   : > { %p3607_p11 = scmp.ne.s32.totalorder %s4333_s0, %s3606_s2  ;;  %s3611_s20 = sshll.u32 %s3840_s5, 4  ;;  %s3612_s20 = int_to_ptr.vmem [resolvable:$false] %s3611_s20 }
 0x145   : > { %s3613_s9 = scalar_lea.vmem %s3612_s20, 4096  ;;  %p3614_p13 = scmp.lt.s32.totalorder %s4333_s0, %s3612_s20 }
 0x146   : > { %p3609_p3 = pnand %p3607_p11, %p3593_p0  ;;  %p3615_p9 = scmp.lt.s32.totalorder %s3613_s9, %s3606_s2 }
 0x148   : > { %p3610_p4 = pneg %p3609_p3  ;;  %p3616_p10 = por %p3615_p9, %p3614_p13 }
 0x14a   : > { %p3617_p8 = pnand %p3616_p10, %p3610_p4 }
 0x14c   : > { %3620 = shalt.err (!%p3617_p8)
}
 0x14d   : > { %3146 = dma.hbm_to_vmem [thread:$0]  (!%p4327_p5), %s4323_s19, 2048, %s4333_s0, %s4136_s13, %s4828_s29, %s4828_s29, %s4827_s28  }
 0x14e   : > { %s2698_s10 = sshll.u32 %s3821_s25, 12  ;;  %s4856_s22 = sld [smem:[#allocation45_spill]] }
 0x14f   : > { %s465_s5 = scalar_lea.vmem [#allocation9], %s4331_s8  ;;  %s4858_s9 = sand.u32 1, %s3825_s26  }
 0x150   : > { %s472_s20 = sshll.u32 %s465_s5, 4  ;;  %s4375_s12 = scalar_lea.sflag [#allocation10], %s4858_s9  ;;  %s4371_s20 = int_to_ptr.vmem [resolvable:$true] %s472_s20 }
 0x154   : > { %s4857_s2 = smov %s4856_s22  ;;  %s4368_s16 = scalar_lea.hbm %s4856_s22, %s2698_s10 }
 0x155   : > { %s3621_s24 = scalar_lea.hbm %s4368_s16, 4096  ;;  %s3626_s29 = scalar_lea.hbm %s4857_s2, 8192 }
 0x156   : > { %p3622_p13 = scmp.ne.s32.totalorder %s4368_s16, %s3621_s24  ;;  %p3627_p6 = scmp.lt.u32.totalorder %s4368_s16, %s4857_s2 }
 0x157   : > { %p3628_p2 = scmp.lt.u32.totalorder %s3626_s29, %s3621_s24  ;;  %p3630_p11 = scmp.lt.u32.totalorder %s3621_s24, %s4368_s16 }
 0x158   : > { %p3624_p4 = pnand %p3622_p13, %p3593_p0 }
 0x159   : > { %p3629_p7 = por %p3628_p2, %p3627_p6 }
 0x15a   : > { %p3625_p12 = pneg %p3624_p4 }
 0x15b   : > { %p3631_p3 = por %p3630_p11, %p3629_p7 }
 0x15d   : > { %p3632_p9 = pnand %p3631_p3, %p3625_p12 }
 0x15f   : > { %3635 = shalt.err (!%p3632_p9)
}
 0x160   : > { %s3636_s8 = scalar_lea.vmem %s4371_s20, 4096  ;;  %s3841_s10 = smov [#allocation9]  }
 0x161   : > { %p3637_p10 = scmp.ne.s32.totalorder %s4371_s20, %s3636_s8  ;;  %s3641_s1 = sshll.u32 %s3841_s10, 4  ;;  %s3642_s1 = int_to_ptr.vmem [resolvable:$false] %s3641_s1 }
 0x162   : > { %s3643_s23 = scalar_lea.vmem %s3642_s1, 8192  ;;  %p3644_p4 = scmp.lt.s32.totalorder %s4371_s20, %s3642_s1 }
 0x163   : > { %p3639_p8 = pnand %p3637_p10, %p3593_p0  ;;  %p3645_p6 = scmp.lt.s32.totalorder %s3643_s23, %s3636_s8 }
 0x165   : > { %p3640_p13 = pneg %p3639_p8  ;;  %p3646_p2 = por %p3645_p6, %p3644_p4 }
 0x167   : > { %p3647_p7 = pnand %p3646_p2, %p3640_p13 }
 0x169   : > { %3650 = shalt.err (!%p3647_p7)
}
 0x16a   : > { %s3842_s24 = smov 128   ;;  %s3843_s22 = smov 8  }
 0x16b   : > { %3149 = dma.hbm_to_vmem [thread:$0]  (!%p4327_p5), %s4368_s16, 4096, %s4371_s20, %s4375_s12, %s3842_s24, %s3842_s24, %s3843_s22  }
 0x16c   : > { %s4859_s5 = sld [smem:[#allocation38_spill]] }
 0x172   : > { %p4860_p0 = scmp.ne.s32.totalorder %s4859_s5, 0 }
 0x173   : > { %s4861_s9 = sld [smem:[#allocation34_spill]] (!%p4860_p0) }
 0x174   : > { %484 = sbr.rel (%p4860_p0) target bundleno = 1669 (0x685), region = 60 }
 0x179   : > { %s486_s13 = sand.u32 (!%p4860_p0), 1, %s4861_s9  }
 0x17a   : > { %s2610_s28 = sshll.u32 (!%p4860_p0), %s486_s13, 7  ;;  %s487_s29 = scalar_lea.sflag (!%p4860_p0), [#allocation4], %s486_s13 }
 0x17b   : > { %s4404_s19 = scalar_lea.vmem [#allocation3], %s2610_s28 }
 0x17c   : > { %3736 = dma.done.wait (%p4244_p1), %s487_s29, 2048  }
 0x17d   : > { %3738 = vsyncadd (%p4244_p1), %s487_s29, 4294965248  ;;  %s495_s3 = sand.u32 1, %s3975_s27   ;;  %s497_s12 = sand.u32 1, %s3789_s17  }
 0x17e   : > { %s2611_s16 = sshll.u32 %s497_s12, 7  ;;  %s496_s20 = scalar_lea.sflag [#allocation7], %s495_s3 }
 0x17f   : > { %s4412_s0 = scalar_lea.vmem [#allocation6], %s2611_s16  ;;  %p4862_p5 = scmp.ne.s32.totalorder %s4823_s30, 0 }
 0x181   : > { %3740 = dma.done.wait (%p4862_p5), %s496_s20, 2048  }
 0x182   : > { %3742 = vsyncadd (%p4862_p5), %s496_s20, 4294965248  ;;  %s4863_s8 = sld [smem:[#allocation31_spill]]  ;;  %p4864_p1 = scmp.ne.s32.totalorder %s4849_s6, 0 }
 0x188   : > { %s4419_s10 = sand.u32 1, %s4863_s8  }
 0x189   : > { %s2612_s15 = sshll.u32 %s4419_s10, 7 }
 0x18a   : > { %s4422_s1 = scalar_lea.vmem [#allocation8], %s2612_s15 }
 0x18b   : > { %3744 = dma.done.wait (%p4864_p1), %s496_s20, 2048  }
 0x18c   : > { %3746 = vsyncadd (%p4864_p1), %s496_s20, 4294965248  ;;  %s2613_s23 = sshll.u32 %s4419_s10, 8  ;;  %s514_s24 = scalar_lea.sflag [#allocation10], %s495_s3 }
 0x18d   : > { %s4429_s22 = scalar_lea.vmem [#allocation9], %s2613_s23 }
 0x18e   : > { %3748 = dma.done.wait (%p4864_p1), %s514_s24, 4096  }
 0x18f   : > { %3750 = vsyncadd (%p4864_p1), %s514_s24, 4294963200  ;;  %p4865_p12 = scmp.eq.s32.totalorder %s3975_s27, 0 }
 0x191   : > { %3752 = dma.done.wait (%p4865_p12), [#allocation10], 2048   ;;  %p4866_p11 = pmov %p4865_p12 }
 0x193   : > { %3754 = vsyncadd (%p4866_p11), [#allocation10], 4294965248  ;;  %p4867_p3 = pmov %p4866_p11 }
 0x195   : > { %3756 = dma.done.wait (%p4867_p3), [#allocation13], 1040   ;;  %p4868_p9 = pmov %p4867_p3 }
 0x196   : > { %p4869_p10 = pmov %p4867_p3 }
 0x197   : > { %3758 = vsyncadd (%p4868_p9), [#allocation13], 4294966256 }
 0x198   : > { %3760 = dma.done.wait (%p4869_p10), [#allocation16], 1040   ;;  %p4870_p8 = pmov %p4867_p3 }
 0x199   : > { %p4871_p13 = pmov %p4867_p3 }
 0x19a   : > { %3762 = vsyncadd (%p4870_p8), [#allocation16], 4294966256 }
 0x19b   : > { %3764 = dma.done.wait (%p4871_p13), [#allocation19], 16   ;;  %p4872_p4 = pmov %p4867_p3 }
 0x19c   : > { %s4451_s6 = scalar_lea.vmem [#allocation20], %s2613_s23  ;;  %s4873_s30 = sld [smem:[#allocation35_spill]] }
 0x19d   : > { %3766 = vsyncadd (%p4872_p4), [#allocation19], 4294967280 }
 0x1a2   : > { %p2621_p6 = scmp.ne.s32.totalorder %s4873_s30, 0 }
 0x1a3   : > { %v3844_v0 = vmov (!%p2621_p6), 0.0  }
 0x1a4   : > { %603 = sbr.rel (%p2621_p6) target bundleno = 436 (0x1b4), region = 104  ;;  %604 = vst [vmem:[#allocation2] sm:$0xff] (!%p2621_p6), %v3844_v0  ;;  %605 = vst [vmem:[#allocation2 + $0x8] sm:$0xff] (!%p2621_p6), %v3844_v0 }
 0x1a5   : > { %606 = vst [vmem:[#allocation2 + $0x10] sm:$0xff] (!%p2621_p6), %v3844_v0  ;;  %607 = vst [vmem:[#allocation2 + $0x18] sm:$0xff] (!%p2621_p6), %v3844_v0 }
 0x1a6   : > { %608 = vst [vmem:[#allocation2 + $0x20] sm:$0xff] (!%p2621_p6), %v3844_v0  ;;  %609 = vst [vmem:[#allocation2 + $0x28] sm:$0xff] (!%p2621_p6), %v3844_v0 }
 0x1a7   : > { %610 = vst [vmem:[#allocation2 + $0x30] sm:$0xff] (!%p2621_p6), %v3844_v0  ;;  %611 = vst [vmem:[#allocation2 + $0x38] sm:$0xff] (!%p2621_p6), %v3844_v0 }
 0x1a8   : > { %612 = vst [vmem:[#allocation2 + $0x40] sm:$0xff] (!%p2621_p6), %v3844_v0  ;;  %613 = vst [vmem:[#allocation2 + $0x48] sm:$0xff] (!%p2621_p6), %v3844_v0 }
 0x1a9   : > { %614 = vst [vmem:[#allocation2 + $0x50] sm:$0xff] (!%p2621_p6), %v3844_v0  ;;  %615 = vst [vmem:[#allocation2 + $0x58] sm:$0xff] (!%p2621_p6), %v3844_v0 }
 0x1aa   : > { %616 = vst [vmem:[#allocation2 + $0x60] sm:$0xff] (!%p2621_p6), %v3844_v0  ;;  %617 = vst [vmem:[#allocation2 + $0x68] sm:$0xff] (!%p2621_p6), %v3844_v0 }
 0x1ab   : > { %618 = vst [vmem:[#allocation2 + $0x70] sm:$0xff] %v3844_v0  ;;  %619 = vst [vmem:[#allocation2 + $0x78] sm:$0xff] %v3844_v0 }
 0x1ac   : > { %620 = vst [vmem:[#allocation2 + $0x80] sm:$0xff] %v3844_v0  ;;  %621 = vst [vmem:[#allocation2 + $0x88] sm:$0xff] %v3844_v0 }
 0x1ad   : > { %622 = vst [vmem:[#allocation2 + $0x90] sm:$0xff] %v3844_v0  ;;  %623 = vst [vmem:[#allocation2 + $0x98] sm:$0xff] %v3844_v0 }
 0x1ae   : > { %624 = vst [vmem:[#allocation2 + $0xa0] sm:$0xff] %v3844_v0  ;;  %625 = vst [vmem:[#allocation2 + $0xa8] sm:$0xff] %v3844_v0 }
 0x1af   : > { %626 = vst [vmem:[#allocation2 + $0xb0] sm:$0xff] %v3844_v0  ;;  %627 = vst [vmem:[#allocation2 + $0xb8] sm:$0xff] %v3844_v0 }
 0x1b0   : > { %628 = vst [vmem:[#allocation2 + $0xc0] sm:$0xff] %v3844_v0  ;;  %629 = vst [vmem:[#allocation2 + $0xc8] sm:$0xff] %v3844_v0 }
 0x1b1   : > { %630 = vst [vmem:[#allocation2 + $0xd0] sm:$0xff] %v3844_v0  ;;  %631 = vst [vmem:[#allocation2 + $0xd8] sm:$0xff] %v3844_v0 }
 0x1b2   : > { %632 = vst [vmem:[#allocation2 + $0xe0] sm:$0xff] %v3844_v0  ;;  %633 = vst [vmem:[#allocation2 + $0xe8] sm:$0xff] %v3844_v0 }
 0x1b3   : > { %634 = vst [vmem:[#allocation2 + $0xf0] sm:$0xff] %v3844_v0  ;;  %635 = vst [vmem:[#allocation2 + $0xf8] sm:$0xff] %v3844_v0 }
 0x1b4 PF: > { %v3297_v1 = vld [vmem:[%s4412_s0 + $0x40] sm:$0xff]   ;;  %v3299_v3 = vld [vmem:[%s4412_s0 + $0x48] sm:$0xff]   ;;  %v3301_v5 = vld [vmem:[%s4412_s0 + $0x50] sm:$0xff]   ;;  %s4874_s27 = sld [smem:[#allocation35_spill]] }
 0x1b5   : > { %v3298_v2 = vld [vmem:[%s4412_s0] sm:$0xff]   ;;  %2700 = vmatprep.subr.bf16.mxu0 %v3297_v1  ;;  %3068 = vmatprep.subr.bf16.mxu1 %v3297_v1  ;;  %v3300_v4 = vld [vmem:[%s4412_s0 + $0x8] sm:$0xff]   ;;  %v3302_v6 = vld [vmem:[%s4412_s0 + $0x10] sm:$0xff]  }
 0x1b6   : > { %2701 = vmatpush3.bf16.msra.mxu0 %v3298_v2  ;;  %3076 = vmatpush3.bf16.msra.mxu1 %v3298_v2  ;;  %v3303_v7 = vld [vmem:[%s4412_s0 + $0x58] sm:$0xff]   ;;  %v3305_v9 = vld [vmem:[%s4412_s0 + $0x60] sm:$0xff]   ;;  %v3307_v11 = vld [vmem:[%s4412_s0 + $0x68] sm:$0xff]  }
 0x1b7   : > { %2702 = vmatprep.subr.bf16.mxu0 %v3299_v3  ;;  %3069 = vmatprep.subr.bf16.mxu1 %v3299_v3  ;;  %v3304_v8 = vld [vmem:[%s4412_s0 + $0x18] sm:$0xff]   ;;  %v3306_v10 = vld [vmem:[%s4412_s0 + $0x20] sm:$0xff]   ;;  %v669_v12 = vld [vmem:[%s4404_s19 + $0x8] sm:$0xff] }
 0x1b8   : > { %v677_v13 = vld [vmem:[%s4404_s19 + $0x48] sm:$0xff]  ;;  %v685_v14 = vunpack.c.l.s8.bf16 %v669_v12  ;;  %v3309_v17 = vld [vmem:[%s4412_s0 + $0x70] sm:$0xff]   ;;  %v3311_v19 = vld [vmem:[%s4412_s0 + $0x78] sm:$0xff]   ;;  %v687_v25 = vunpack.c.h.s8.bf16 %v669_v12 }
 0x1b9   : > { %v701_v15 = vunpack.c.l.s8.bf16 %v677_v13  ;;  %v3308_v16 = vld [vmem:[%s4412_s0 + $0x28] sm:$0xff]   ;;  %v3310_v18 = vld [vmem:[%s4412_s0 + $0x30] sm:$0xff]   ;;  %v3312_v20 = vld [vmem:[%s4412_s0 + $0x38] sm:$0xff]   ;;  %v703_v26 = vunpack.c.h.s8.bf16 %v677_v13 }
 0x1ba   : > { %2703 = vmatpush3.bf16.msra.mxu0 %v3300_v4  ;;  %3077 = vmatpush3.bf16.msra.mxu1 %v3300_v4  ;;  %v668_v21 = vld [vmem:[%s4404_s19] sm:$0xff]  ;;  %v671_v27 = vld [vmem:[%s4404_s19 + $0x18] sm:$0xff]  ;;  %v670_v33 = vld [vmem:[%s4404_s19 + $0x10] sm:$0xff]  ;;  %p2638_p2 = scmp.ne.s32.totalorder %s4874_s27, 1 }
 0x1bb   : > { %2704 = vmatprep.subr.bf16.mxu0 %v3301_v5  ;;  %3070 = vmatprep.subr.bf16.mxu1 %v3301_v5  ;;  %v676_v22 = vld [vmem:[%s4404_s19 + $0x40] sm:$0xff]  ;;  %v684_v23 = vunpack.c.l.s8.bf16 %v668_v21  ;;  %v679_v28 = vld [vmem:[%s4404_s19 + $0x58] sm:$0xff]  ;;  %v686_v29 = vunpack.c.h.s8.bf16 %v668_v21  ;;  %v689_v31 = vunpack.c.l.s8.bf16 %v671_v27  ;;  %v678_v34 = vld [vmem:[%s4404_s19 + $0x50] sm:$0xff]  ;;  %v688_v35 = vunpack.c.l.s8.bf16 %v670_v33 }
 0x1bc   : > { %876 = vmatprep.mubr.bf16.mxu0 %v685_v14  ;;  %940 = vmatprep.mubr.bf16.mxu1 %v701_v15  ;;  %v700_v24 = vunpack.c.l.s8.bf16 %v676_v22  ;;  %v702_v30 = vunpack.c.h.s8.bf16 %v676_v22  ;;  %v705_v32 = vunpack.c.l.s8.bf16 %v679_v28  ;;  %v704_v36 = vunpack.c.l.s8.bf16 %v678_v34  ;;  %v673_v39 = vld [vmem:[%s4404_s19 + $0x28] sm:$0xff]  ;;  %v672_v45 = vld [vmem:[%s4404_s19 + $0x20] sm:$0xff]  ;;  %v675_v51 = vld [vmem:[%s4404_s19 + $0x38] sm:$0xff] }
 0x1bd   : > { %v691_v37 = vunpack.c.h.s8.bf16 %v671_v27  ;;  %v707_v38 = vunpack.c.h.s8.bf16 %v679_v28  ;;  %v681_v40 = vld [vmem:[%s4404_s19 + $0x68] sm:$0xff]  ;;  %v690_v41 = vunpack.c.h.s8.bf16 %v670_v33  ;;  %v706_v42 = vunpack.c.h.s8.bf16 %v678_v34  ;;  %v680_v46 = vld [vmem:[%s4404_s19 + $0x60] sm:$0xff]  ;;  %v683_v52 = vld [vmem:[%s4404_s19 + $0x78] sm:$0xff] }
 0x1be   : > { %2705 = vmatpush3.bf16.msra.mxu0 %v3302_v6  ;;  %3078 = vmatpush3.bf16.msra.mxu1 %v3302_v6  ;;  %v693_v43 = vunpack.c.l.s8.bf16 %v673_v39  ;;  %v709_v44 = vunpack.c.l.s8.bf16 %v681_v40  ;;  %v692_v47 = vunpack.c.l.s8.bf16 %v672_v45  ;;  %v708_v48 = vunpack.c.l.s8.bf16 %v680_v46  ;;  %v674_v57 = vld [vmem:[%s4404_s19 + $0x30] sm:$0xff]  ;;  %v636_v3 = vld [vmem:[#allocation2] sm:$0xff]  ;;  %v653_v13 = vld [vmem:[#allocation2 + $0x88] sm:$0xff] }
 0x1bf   : > { %2706 = vmatprep.subr.bf16.mxu0 %v3303_v7  ;;  %3071 = vmatprep.subr.bf16.mxu1 %v3303_v7  ;;  %v695_v49 = vunpack.c.h.s8.bf16 %v673_v39  ;;  %v711_v50 = vunpack.c.h.s8.bf16 %v681_v40  ;;  %v694_v53 = vunpack.c.h.s8.bf16 %v672_v45  ;;  %v710_v54 = vunpack.c.h.s8.bf16 %v680_v46  ;;  %v682_v58 = vld [vmem:[%s4404_s19 + $0x70] sm:$0xff]  ;;  %v652_v5 = vld [vmem:[#allocation2 + $0x80] sm:$0xff]  ;;  %v655_v33 = vld [vmem:[#allocation2 + $0x98] sm:$0xff] }
 0x1c0   : > { %v697_v55 = vunpack.c.l.s8.bf16 %v675_v51  ;;  %v713_v56 = vunpack.c.l.s8.bf16 %v683_v52  ;;  %v696_v59 = vunpack.c.l.s8.bf16 %v674_v57  ;;  %v712_v60 = vunpack.c.l.s8.bf16 %v682_v58  ;;  %v656_v45 = vld [vmem:[#allocation2 + $0xa0] sm:$0xff] }
 0x1c1   : > { %v699_v61 = vunpack.c.h.s8.bf16 %v675_v51  ;;  %v715_v62 = vunpack.c.h.s8.bf16 %v683_v52  ;;  %v698_v63 = vunpack.c.h.s8.bf16 %v674_v57  ;;  %v714_v0 = vunpack.c.h.s8.bf16 %v682_v58  ;;  %v641_v51 = vld [vmem:[#allocation2 + $0x28] sm:$0xff] }
 0x1c2   : > { %2707 = vmatpush3.bf16.msra.mxu0 %v3304_v8  ;;  %3079 = vmatpush3.bf16.msra.mxu1 %v3304_v8 }
 0x1c3   : > { %2708 = vmatprep.subr.bf16.mxu0 %v3305_v9  ;;  %3072 = vmatprep.subr.bf16.mxu1 %v3305_v9 }
 0x1c6   : > { %2709 = vmatpush3.bf16.msra.mxu0 %v3306_v10  ;;  %3080 = vmatpush3.bf16.msra.mxu1 %v3306_v10 }
 0x1c7   : > { %2710 = vmatprep.subr.bf16.mxu0 %v3307_v11  ;;  %3073 = vmatprep.subr.bf16.mxu1 %v3307_v11  ;;  %v637_v11 = vld [vmem:[#allocation2 + $0x8] sm:$0xff] }
 0x1ca   : > { %2711 = vmatpush3.bf16.msra.mxu0 %v3308_v16  ;;  %3081 = vmatpush3.bf16.msra.mxu1 %v3308_v16 }
 0x1cb   : > { %2712 = vmatprep.subr.bf16.mxu0 %v3309_v17  ;;  %3074 = vmatprep.subr.bf16.mxu1 %v3309_v17 }
 0x1ce   : > { %2713 = vmatpush3.bf16.msra.mxu0 %v3310_v18  ;;  %3082 = vmatpush3.bf16.msra.mxu1 %v3310_v18 }
 0x1cf   : > { %2714 = vmatprep.subr.bf16.mxu0 %v3311_v19  ;;  %3075 = vmatprep.subr.bf16.mxu1 %v3311_v19 }
 0x1d2   : > { %2715 = vmatpush3.bf16.msra.mxu0 %v3312_v20  ;;  %3083 = vmatpush3.bf16.msra.mxu1 %v3312_v20 }
 0x1d5   : > { %877 = vmatmul.mubr.bf16.vlgmr.msra.gmra.mrb[0].mxu0 %v684_v23  ;;  %941 = vmatmul.mubr.bf16.vlgmr.msra.gmra.mrb[0].mxu1 %v700_v24  ;;  %v638_v23 = vld [vmem:[#allocation2 + $0x10] sm:$0xff] }
 0x1d6   : > { %884 = vmatprep.mubr.bf16.mxu0 %v687_v25  ;;  %948 = vmatprep.mubr.bf16.mxu1 %v703_v26  ;;  %v654_v25 = vld [vmem:[#allocation2 + $0x90] sm:$0xff] }
 0x1dd   : > { %885 = vmatmul.mubr.bf16.gmra.mrb[4].mxu0 %v686_v29  ;;  %949 = vmatmul.mubr.bf16.gmra.mrb[4].mxu1 %v702_v30 }
 0x1de   : > { %892 = vmatprep.mubr.bf16.mxu0 %v689_v31  ;;  %956 = vmatprep.mubr.bf16.mxu1 %v705_v32  ;;  %v639_v31 = vld [vmem:[#allocation2 + $0x18] sm:$0xff] }
 0x1e5   : > { %893 = vmatmul.mubr.bf16.gmra.mrb[8].mxu0 %v688_v35  ;;  %957 = vmatmul.mubr.bf16.gmra.mrb[8].mxu1 %v704_v36 }
 0x1e6   : > { %900 = vmatprep.mubr.bf16.mxu0 %v691_v37  ;;  %964 = vmatprep.mubr.bf16.mxu1 %v707_v38 }
 0x1ed   : > { %901 = vmatmul.mubr.bf16.gmra.mrb[12].mxu0 %v690_v41  ;;  %965 = vmatmul.mubr.bf16.gmra.mrb[12].mxu1 %v706_v42 }
 0x1ee   : > { %908 = vmatprep.mubr.bf16.mxu0 %v693_v43  ;;  %972 = vmatprep.mubr.bf16.mxu1 %v709_v44  ;;  %v640_v43 = vld [vmem:[#allocation2 + $0x20] sm:$0xff] }
 0x1f5   : > { %909 = vmatmul.mubr.bf16.gmra.mrb[16].mxu0 %v692_v47  ;;  %973 = vmatmul.mubr.bf16.gmra.mrb[16].mxu1 %v708_v48 }
 0x1f6   : > { %916 = vmatprep.mubr.bf16.mxu0 %v695_v49  ;;  %980 = vmatprep.mubr.bf16.mxu1 %v711_v50 }
 0x1fd   : > { %917 = vmatmul.mubr.bf16.gmra.mrb[20].mxu0 %v694_v53  ;;  %981 = vmatmul.mubr.bf16.gmra.mrb[20].mxu1 %v710_v54  ;;  %v657_v53 = vld [vmem:[#allocation2 + $0xa8] sm:$0xff] }
 0x1fe   : > { %924 = vmatprep.mubr.bf16.mxu0 %v697_v55  ;;  %988 = vmatprep.mubr.bf16.mxu1 %v713_v56 }
 0x205   : > { %925 = vmatmul.mubr.bf16.gmra.mrb[24].mxu0 %v696_v59  ;;  %989 = vmatmul.mubr.bf16.gmra.mrb[24].mxu1 %v712_v60 }
 0x206   : > { %932 = vmatprep.mubr.bf16.mxu0 %v699_v61  ;;  %996 = vmatprep.mubr.bf16.mxu1 %v715_v62 }
 0x20d   : > { %933 = vmatmul.mubr.bf16.gmra.mrb[28].mxu0 %v698_v63  ;;  %997 = vmatmul.mubr.bf16.gmra.mrb[28].mxu1 %v714_v0  ;;  %v642_v63 = vld [vmem:[#allocation2 + $0x30] sm:$0xff] }
 0x2a8   : > { %v2716_v1 = vpop.f32.mrb[0].mxu0  ;;  %v2764_v2 = vpop.f32.mrb[0].mxu1 }
 0x2a9   : > { %v2717_v4 = vpop.f32.mrb[1].mxu0  ;;  %v2765_v6 = vpop.f32.mrb[1].mxu1 }
 0x2aa   : > { %v2718_v7 = vadd.f32 %v2717_v4, %v2716_v1  ;;  %v2766_v8 = vadd.f32 %v2765_v6, %v2764_v2  ;;  %v2719_v9 = vpop.f32.mrb[2].mxu0  ;;  %v2767_v10 = vpop.f32.mrb[2].mxu1  ;;  %v658_v1 = vld [vmem:[#allocation2 + $0xb0] sm:$0xff] }
 0x2ab   : > { %v2720_v12 = vpop.f32.mrb[3].mxu0  ;;  %v2768_v14 = vpop.f32.mrb[3].mxu1 }
 0x2ac   : > { %v1005_v15 = vadd.f32 %v2718_v7, %v636_v3  ;;  %v1021_v16 = vadd.f32 %v2766_v8, %v652_v5  ;;  %v2721_v17 = vadd.f32 %v2720_v12, %v2719_v9  ;;  %v2769_v18 = vadd.f32 %v2768_v14, %v2767_v10  ;;  %v643_v7 = vld [vmem:[#allocation2 + $0x38] sm:$0xff] }
 0x2ad   : > { %v659_v9 = vld [vmem:[#allocation2 + $0xb8] sm:$0xff] }
 0x2ae   : > { %1037 = vst [vmem:[#allocation2] sm:$0xff] %v1005_v15  ;;  %1053 = vst [vmem:[#allocation2 + $0x80] sm:$0xff] %v1021_v16  ;;  %v1006_v19 = vadd.f32 %v2721_v17, %v637_v11  ;;  %v1022_v20 = vadd.f32 %v2769_v18, %v653_v13 }
 0x2b0   : > { %1038 = vst [vmem:[#allocation2 + $0x8] sm:$0xff] %v1006_v19  ;;  %1054 = vst [vmem:[#allocation2 + $0x88] sm:$0xff] %v1022_v20  ;;  %v2722_v21 = vpop.f32.mrb[4].mxu0  ;;  %v2770_v22 = vpop.f32.mrb[4].mxu1  ;;  %v644_v19 = vld [vmem:[#allocation2 + $0x40] sm:$0xff] }
 0x2b1   : > { %v2723_v24 = vpop.f32.mrb[5].mxu0  ;;  %v2771_v26 = vpop.f32.mrb[5].mxu1 }
 0x2b2   : > { %v2724_v27 = vadd.f32 %v2723_v24, %v2722_v21  ;;  %v2772_v28 = vadd.f32 %v2771_v26, %v2770_v22  ;;  %v2725_v29 = vpop.f32.mrb[6].mxu0  ;;  %v2773_v30 = vpop.f32.mrb[6].mxu1  ;;  %v660_v21 = vld [vmem:[#allocation2 + $0xc0] sm:$0xff] }
 0x2b3   : > { %v2726_v32 = vpop.f32.mrb[7].mxu0  ;;  %v2774_v34 = vpop.f32.mrb[7].mxu1 }
 0x2b4   : > { %v1007_v35 = vadd.f32 %v2724_v27, %v638_v23  ;;  %v1023_v36 = vadd.f32 %v2772_v28, %v654_v25  ;;  %v2727_v37 = vadd.f32 %v2726_v32, %v2725_v29  ;;  %v2775_v38 = vadd.f32 %v2774_v34, %v2773_v30  ;;  %v645_v27 = vld [vmem:[#allocation2 + $0x48] sm:$0xff] }
 0x2b5   : > { %v661_v29 = vld [vmem:[#allocation2 + $0xc8] sm:$0xff] }
 0x2b6   : > { %1039 = vst [vmem:[#allocation2 + $0x10] sm:$0xff] %v1007_v35  ;;  %1055 = vst [vmem:[#allocation2 + $0x90] sm:$0xff] %v1023_v36  ;;  %v1008_v39 = vadd.f32 %v2727_v37, %v639_v31  ;;  %v1024_v40 = vadd.f32 %v2775_v38, %v655_v33 }
 0x2b8   : > { %1040 = vst [vmem:[#allocation2 + $0x18] sm:$0xff] %v1008_v39  ;;  %1056 = vst [vmem:[#allocation2 + $0x98] sm:$0xff] %v1024_v40  ;;  %v2728_v41 = vpop.f32.mrb[8].mxu0  ;;  %v2776_v42 = vpop.f32.mrb[8].mxu1  ;;  %v646_v39 = vld [vmem:[#allocation2 + $0x50] sm:$0xff] }
 0x2b9   : > { %v2729_v44 = vpop.f32.mrb[9].mxu0  ;;  %v2777_v46 = vpop.f32.mrb[9].mxu1 }
 0x2ba   : > { %v2730_v47 = vadd.f32 %v2729_v44, %v2728_v41  ;;  %v2778_v48 = vadd.f32 %v2777_v46, %v2776_v42  ;;  %v2731_v49 = vpop.f32.mrb[10].mxu0  ;;  %v2779_v50 = vpop.f32.mrb[10].mxu1  ;;  %v662_v41 = vld [vmem:[#allocation2 + $0xd0] sm:$0xff] }
 0x2bb   : > { %v2732_v52 = vpop.f32.mrb[11].mxu0  ;;  %v2780_v54 = vpop.f32.mrb[11].mxu1 }
 0x2bc   : > { %v1009_v55 = vadd.f32 %v2730_v47, %v640_v43  ;;  %v1025_v56 = vadd.f32 %v2778_v48, %v656_v45  ;;  %v2733_v57 = vadd.f32 %v2732_v52, %v2731_v49  ;;  %v2781_v58 = vadd.f32 %v2780_v54, %v2779_v50  ;;  %v647_v47 = vld [vmem:[#allocation2 + $0x58] sm:$0xff] }
 0x2bd   : > { %v663_v49 = vld [vmem:[#allocation2 + $0xd8] sm:$0xff] }
 0x2be   : > { %1041 = vst [vmem:[#allocation2 + $0x20] sm:$0xff] %v1009_v55  ;;  %1057 = vst [vmem:[#allocation2 + $0xa0] sm:$0xff] %v1025_v56  ;;  %v1010_v59 = vadd.f32 %v2733_v57, %v641_v51  ;;  %v1026_v60 = vadd.f32 %v2781_v58, %v657_v53 }
 0x2c0   : > { %1042 = vst [vmem:[#allocation2 + $0x28] sm:$0xff] %v1010_v59  ;;  %1058 = vst [vmem:[#allocation2 + $0xa8] sm:$0xff] %v1026_v60  ;;  %v2734_v61 = vpop.f32.mrb[12].mxu0  ;;  %v2782_v62 = vpop.f32.mrb[12].mxu1  ;;  %v648_v59 = vld [vmem:[#allocation2 + $0x60] sm:$0xff] }
 0x2c1   : > { %v2735_v0 = vpop.f32.mrb[13].mxu0  ;;  %v2783_v2 = vpop.f32.mrb[13].mxu1 }
 0x2c2   : > { %v2736_v3 = vadd.f32 %v2735_v0, %v2734_v61  ;;  %v2784_v4 = vadd.f32 %v2783_v2, %v2782_v62  ;;  %v2737_v5 = vpop.f32.mrb[14].mxu0  ;;  %v2785_v6 = vpop.f32.mrb[14].mxu1  ;;  %v664_v61 = vld [vmem:[#allocation2 + $0xe0] sm:$0xff] }
 0x2c3   : > { %v2738_v8 = vpop.f32.mrb[15].mxu0  ;;  %v2786_v10 = vpop.f32.mrb[15].mxu1 }
 0x2c4   : > { %v1011_v11 = vadd.f32 %v2736_v3, %v642_v63  ;;  %v1027_v12 = vadd.f32 %v2784_v4, %v658_v1  ;;  %v2739_v13 = vadd.f32 %v2738_v8, %v2737_v5  ;;  %v2787_v14 = vadd.f32 %v2786_v10, %v2785_v6  ;;  %v649_v3 = vld [vmem:[#allocation2 + $0x68] sm:$0xff] }
 0x2c5   : > { %v665_v5 = vld [vmem:[#allocation2 + $0xe8] sm:$0xff] }
 0x2c6   : > { %1043 = vst [vmem:[#allocation2 + $0x30] sm:$0xff] %v1011_v11  ;;  %1059 = vst [vmem:[#allocation2 + $0xb0] sm:$0xff] %v1027_v12  ;;  %v1012_v15 = vadd.f32 %v2739_v13, %v643_v7  ;;  %v1028_v16 = vadd.f32 %v2787_v14, %v659_v9 }
 0x2c8   : > { %1044 = vst [vmem:[#allocation2 + $0x38] sm:$0xff] %v1012_v15  ;;  %1060 = vst [vmem:[#allocation2 + $0xb8] sm:$0xff] %v1028_v16  ;;  %v2740_v17 = vpop.f32.mrb[16].mxu0  ;;  %v2788_v18 = vpop.f32.mrb[16].mxu1  ;;  %v650_v15 = vld [vmem:[#allocation2 + $0x70] sm:$0xff] }
 0x2c9   : > { %v2741_v20 = vpop.f32.mrb[17].mxu0  ;;  %v2789_v22 = vpop.f32.mrb[17].mxu1 }
 0x2ca   : > { %v2742_v23 = vadd.f32 %v2741_v20, %v2740_v17  ;;  %v2790_v24 = vadd.f32 %v2789_v22, %v2788_v18  ;;  %v2743_v25 = vpop.f32.mrb[18].mxu0  ;;  %v2791_v26 = vpop.f32.mrb[18].mxu1  ;;  %v666_v17 = vld [vmem:[#allocation2 + $0xf0] sm:$0xff] }
 0x2cb   : > { %v2744_v28 = vpop.f32.mrb[19].mxu0  ;;  %v2792_v30 = vpop.f32.mrb[19].mxu1 }
 0x2cc   : > { %v1013_v31 = vadd.f32 %v2742_v23, %v644_v19  ;;  %v1029_v32 = vadd.f32 %v2790_v24, %v660_v21  ;;  %v2745_v33 = vadd.f32 %v2744_v28, %v2743_v25  ;;  %v2793_v34 = vadd.f32 %v2792_v30, %v2791_v26  ;;  %v651_v23 = vld [vmem:[#allocation2 + $0x78] sm:$0xff] }
 0x2cd   : > { %v667_v25 = vld [vmem:[#allocation2 + $0xf8] sm:$0xff] }
 0x2ce   : > { %1045 = vst [vmem:[#allocation2 + $0x40] sm:$0xff] %v1013_v31  ;;  %1061 = vst [vmem:[#allocation2 + $0xc0] sm:$0xff] %v1029_v32  ;;  %v1014_v35 = vadd.f32 %v2745_v33, %v645_v27  ;;  %v1030_v36 = vadd.f32 %v2793_v34, %v661_v29  ;;  %v1107_v33 = vld [vmem:[%s4429_s22 + $0x10] sm:$0xff] (!%p2638_p2)  ;;  %v1105_v34 = vld [vmem:[%s4429_s22] sm:$0xff] (!%p2638_p2) }
 0x2d0   : > { %1046 = vst [vmem:[#allocation2 + $0x48] sm:$0xff] %v1014_v35  ;;  %1062 = vst [vmem:[#allocation2 + $0xc8] sm:$0xff] %v1030_v36  ;;  %v2746_v37 = vpop.f32.mrb[20].mxu0  ;;  %v2794_v38 = vpop.f32.mrb[20].mxu1  ;;  %v3845_v35 = vmov (!%p2638_p2), 0   ;;  %v1108_v36 = vld [vmem:[%s4429_s22 + $0x18] sm:$0xff] (!%p2638_p2) }
 0x2d1   : > { %v2747_v40 = vpop.f32.mrb[21].mxu0  ;;  %v2795_v42 = vpop.f32.mrb[21].mxu1  ;;  %3314 = vset.pattern.permute.xlu1 (!%p2638_p2), %v3845_v35  ;;  %3313 = vset.pattern.permute.xlu0 (!%p2638_p2), %v3845_v35 }
 0x2d2   : > { %v2748_v43 = vadd.f32 %v2747_v40, %v2746_v37  ;;  %v2796_v44 = vadd.f32 %v2795_v42, %v2794_v38  ;;  %v2749_v45 = vpop.f32.mrb[22].mxu0  ;;  %v2797_v46 = vpop.f32.mrb[22].mxu1  ;;  %1149 = vperm.xlu1 (!%p2638_p2), %3314, %v1107_v33   ;;  %1139 = vperm.xlu0 (!%p2638_p2), %3313, %v1105_v34   ;;  %v1106_v37 = vld [vmem:[%s4429_s22 + $0x8] sm:$0xff] (!%p2638_p2)  ;;  %v1112_v40 = vld [vmem:[%s4429_s22 + $0x38] sm:$0xff] (!%p2638_p2)  ;;  %v3315_v42 = vld [vmem:[#allocation11 + $0x40] sm:$0xff] (!%p2638_p2)  }
 0x2d3   : > { %v2750_v48 = vpop.f32.mrb[23].mxu0  ;;  %v2798_v50 = vpop.f32.mrb[23].mxu1  ;;  %v1110_v38 = vld [vmem:[%s4429_s22 + $0x28] sm:$0xff] (!%p2638_p2)  ;;  %2812 = vmatprep.subr.bf16.mxu0 (!%p2638_p2), %v3315_v42 }
 0x2d4   : > { %v1015_v51 = vadd.f32 %v2748_v43, %v646_v39  ;;  %v1031_v52 = vadd.f32 %v2796_v44, %v662_v41  ;;  %v2751_v53 = vadd.f32 %v2750_v48, %v2749_v45  ;;  %v2799_v54 = vadd.f32 %v2798_v50, %v2797_v46  ;;  %v1109_v39 = vld [vmem:[%s4429_s22 + $0x20] sm:$0xff] (!%p2638_p2)  ;;  %v1111_v41 = vld [vmem:[%s4429_s22 + $0x30] sm:$0xff] (!%p2638_p2)  ;;  %v1114_v44 = vld [vmem:[%s4429_s22 + $0x48] sm:$0xff] (!%p2638_p2) }
 0x2d5   : > { %v3316_v43 = vld [vmem:[#allocation11] sm:$0xff] (!%p2638_p2)   ;;  %v3317_v45 = vld [vmem:[#allocation11 + $0x48] sm:$0xff] (!%p2638_p2)   ;;  %v3319_v48 = vld [vmem:[#allocation11 + $0x50] sm:$0xff] (!%p2638_p2)  }
 0x2d6   : > { %1047 = vst [vmem:[#allocation2 + $0x50] sm:$0xff] %v1015_v51  ;;  %1063 = vst [vmem:[#allocation2 + $0xd0] sm:$0xff] %v1031_v52  ;;  %v1016_v55 = vadd.f32 %v2751_v53, %v647_v47  ;;  %v1032_v56 = vadd.f32 %v2799_v54, %v663_v49  ;;  %1154 = vperm.xlu1 (!%p2638_p2), %3314, %v1108_v36   ;;  %1144 = vperm.xlu0 (!%p2638_p2), %3313, %v1106_v37   ;;  %v1113_v46 = vld [vmem:[%s4429_s22 + $0x40] sm:$0xff] (!%p2638_p2)  ;;  %v3318_v47 = vld [vmem:[#allocation11 + $0x8] sm:$0xff] (!%p2638_p2)  }
 0x2d7   : > { %2813 = vmatpush3.bf16.msra.mxu0 (!%p2638_p2), %v3316_v43  ;;  %v1116_v49 = vld [vmem:[%s4429_s22 + $0x58] sm:$0xff] (!%p2638_p2)  ;;  %v1115_v50 = vld [vmem:[%s4429_s22 + $0x50] sm:$0xff] (!%p2638_p2)  ;;  %v1118_v53 = vld [vmem:[%s4429_s22 + $0x68] sm:$0xff] (!%p2638_p2) }
 0x2d8   : > { %1048 = vst [vmem:[#allocation2 + $0x58] sm:$0xff] %v1016_v55  ;;  %1064 = vst [vmem:[#allocation2 + $0xd8] sm:$0xff] %v1032_v56  ;;  %v2752_v57 = vpop.f32.mrb[24].mxu0  ;;  %v2800_v58 = vpop.f32.mrb[24].mxu1  ;;  %2814 = vmatprep.subr.bf16.mxu0 (!%p2638_p2), %v3317_v45  ;;  %v3320_v51 = vld [vmem:[#allocation11 + $0x10] sm:$0xff] (!%p2638_p2)   ;;  %v3321_v52 = vld [vmem:[#allocation11 + $0x58] sm:$0xff] (!%p2638_p2)  }
 0x2d9   : > { %v2753_v60 = vpop.f32.mrb[25].mxu0  ;;  %v2801_v62 = vpop.f32.mrb[25].mxu1  ;;  %v1117_v54 = vld [vmem:[%s4429_s22 + $0x60] sm:$0xff] (!%p2638_p2)  ;;  %v3322_v55 = vld [vmem:[#allocation11 + $0x18] sm:$0xff] (!%p2638_p2)   ;;  %v3333_v36 = vld [vmem:[%s4422_s1 + $0x10] sm:$0xff] (!%p2638_p2)  }
 0x2da   : > { %v2754_v63 = vadd.f32 %v2753_v60, %v2752_v57  ;;  %v2802_v0 = vadd.f32 %v2801_v62, %v2800_v58  ;;  %v2755_v1 = vpop.f32.mrb[26].mxu0  ;;  %v2803_v2 = vpop.f32.mrb[26].mxu1  ;;  %1164 = vperm.xlu1 (!%p2638_p2), %3314, %v1110_v38   ;;  %1159 = vperm.xlu0 (!%p2638_p2), %3313, %v1109_v39   ;;  %v3323_v56 = vld [vmem:[#allocation11 + $0x60] sm:$0xff] (!%p2638_p2)   ;;  %v1120_v57 = vld [vmem:[%s4429_s22 + $0x78] sm:$0xff] (!%p2638_p2)  ;;  %v1119_v58 = vld [vmem:[%s4429_s22 + $0x70] sm:$0xff] (!%p2638_p2) }
 0x2db   : > { %v2756_v4 = vpop.f32.mrb[27].mxu0  ;;  %v2804_v6 = vpop.f32.mrb[27].mxu1  ;;  %2815 = vmatpush3.bf16.msra.mxu0 (!%p2638_p2), %v3318_v47  ;;  %v3325_v60 = vld [vmem:[#allocation11 + $0x68] sm:$0xff] (!%p2638_p2)   ;;  %v1080_v47 = vld [vmem:[#allocation2 + $0x38] sm:$0xff] (!%p2638_p2) }
 0x2dc   : > { %v1017_v7 = vadd.f32 %v2754_v63, %v648_v59  ;;  %v1033_v8 = vadd.f32 %v2802_v0, %v664_v61  ;;  %v2757_v9 = vadd.f32 %v2756_v4, %v2755_v1  ;;  %v2805_v10 = vadd.f32 %v2804_v6, %v2803_v2  ;;  %2816 = vmatprep.subr.bf16.mxu0 (!%p2638_p2), %v3319_v48  ;;  %v3324_v59 = vld [vmem:[#allocation11 + $0x20] sm:$0xff] (!%p2638_p2)   ;;  %v1122_v62 = vld [vmem:[%s4429_s22 + $0x88] sm:$0xff] (!%p2638_p2)  ;;  %v3327_v1 = vld [vmem:[#allocation11 + $0x70] sm:$0xff] (!%p2638_p2)  }
 0x2dd   : > { %v3331_v61 = vld [vmem:[%s4422_s1] sm:$0xff] (!%p2638_p2)   ;;  %v3326_v0 = vld [vmem:[#allocation11 + $0x28] sm:$0xff] (!%p2638_p2)   ;;  %v1124_v2 = vld [vmem:[%s4429_s22 + $0x98] sm:$0xff] (!%p2638_p2) }
 0x2de   : > { %1049 = vst [vmem:[#allocation2 + $0x60] sm:$0xff] %v1017_v7  ;;  %1065 = vst [vmem:[#allocation2 + $0xe0] sm:$0xff] %v1033_v8  ;;  %v1018_v11 = vadd.f32 %v2757_v9, %v649_v3  ;;  %v1034_v12 = vadd.f32 %v2805_v10, %v665_v5  ;;  %1174 = vperm.xlu1 (!%p2638_p2), %3314, %v1112_v40   ;;  %1169 = vperm.xlu0 (!%p2638_p2), %3313, %v1111_v41   ;;  %v1121_v63 = vld [vmem:[%s4429_s22 + $0x80] sm:$0xff] (!%p2638_p2)  ;;  %v1123_v3 = vld [vmem:[%s4429_s22 + $0x90] sm:$0xff] (!%p2638_p2) }
 0x2df   : > { %2817 = vmatpush3.bf16.msra.mxu0 (!%p2638_p2), %v3320_v51  ;;  %1640 = vmatprep.mubr.bf16.mxu0 (!%p2638_p2), %v3331_v61  ;;  %v3328_v4 = vld [vmem:[#allocation11 + $0x30] sm:$0xff] (!%p2638_p2)   ;;  %v3329_v5 = vld [vmem:[#allocation11 + $0x78] sm:$0xff] (!%p2638_p2)   ;;  %v1126_v6 = vld [vmem:[%s4429_s22 + $0xa8] sm:$0xff] (!%p2638_p2) }
 0x2e0   : > { %1050 = vst [vmem:[#allocation2 + $0x68] sm:$0xff] %v1018_v11  ;;  %1066 = vst [vmem:[#allocation2 + $0xe8] sm:$0xff] %v1034_v12  ;;  %v2758_v13 = vpop.f32.mrb[28].mxu0  ;;  %v2806_v14 = vpop.f32.mrb[28].mxu1  ;;  %2818 = vmatprep.subr.bf16.mxu0 (!%p2638_p2), %v3321_v52  ;;  %v1125_v7 = vld [vmem:[%s4429_s22 + $0xa0] sm:$0xff] (!%p2638_p2)  ;;  %v3330_v8 = vld [vmem:[#allocation11 + $0x38] sm:$0xff] (!%p2638_p2)  }
 0x2e1   : > { %v2759_v16 = vpop.f32.mrb[29].mxu0  ;;  %v2807_v18 = vpop.f32.mrb[29].mxu1  ;;  %v1128_v9 = vld [vmem:[%s4429_s22 + $0xb8] sm:$0xff] (!%p2638_p2)  ;;  %v1127_v10 = vld [vmem:[%s4429_s22 + $0xb0] sm:$0xff] (!%p2638_p2)  ;;  %v1130_v11 = vld [vmem:[%s4429_s22 + $0xc8] sm:$0xff] (!%p2638_p2) }
 0x2e2   : > { %v2760_v19 = vadd.f32 %v2759_v16, %v2758_v13  ;;  %v2808_v20 = vadd.f32 %v2807_v18, %v2806_v14  ;;  %v2761_v21 = vpop.f32.mrb[30].mxu0  ;;  %v2809_v22 = vpop.f32.mrb[30].mxu1  ;;  %1072 = sbr.rel (%p2638_p2) target bundleno = 1641 (0x669), region = 108  ;;  %1184 = vperm.xlu1 (!%p2638_p2), %3314, %v1114_v44   ;;  %1179 = vperm.xlu0 (!%p2638_p2), %3313, %v1113_v46   ;;  %v1129_v12 = vld [vmem:[%s4429_s22 + $0xc0] sm:$0xff] (!%p2638_p2)  ;;  %v1132_v13 = vld [vmem:[%s4429_s22 + $0xd8] sm:$0xff] (!%p2638_p2)  ;;  %v1131_v14 = vld [vmem:[%s4429_s22 + $0xd0] sm:$0xff] (!%p2638_p2) }
 0x2e3   : > { %v2762_v24 = vpop.f32.mrb[31].mxu0  ;;  %v2810_v26 = vpop.f32.mrb[31].mxu1  ;;  %2819 = vmatpush3.bf16.msra.mxu0 (!%p2638_p2), %v3322_v55  ;;  %v1133_v16 = vld [vmem:[%s4429_s22 + $0xe0] sm:$0xff] (!%p2638_p2)  ;;  %v1135_v18 = vld [vmem:[%s4429_s22 + $0xf0] sm:$0xff] (!%p2638_p2)  ;;  %v1078_v39 = vld [vmem:[#allocation2 + $0x28] sm:$0xff] (!%p2638_p2) }
 0x2e4   : > { %v1019_v27 = vadd.f32 %v2760_v19, %v650_v15  ;;  %v1035_v28 = vadd.f32 %v2808_v20, %v666_v17  ;;  %v2763_v29 = vadd.f32 %v2762_v24, %v2761_v21  ;;  %v2811_v30 = vadd.f32 %v2810_v26, %v2809_v22  ;;  %2820 = vmatprep.subr.bf16.mxu0 (!%p2638_p2), %v3323_v56  ;;  %v1134_v15 = vld [vmem:[%s4429_s22 + $0xe8] sm:$0xff] (!%p2638_p2)  ;;  %v1136_v17 = vld [vmem:[%s4429_s22 + $0xf8] sm:$0xff] (!%p2638_p2)  ;;  %v1073_v22 = vld [vmem:[#allocation2] sm:$0xff] (!%p2638_p2) }
 0x2e5   : > { %v3347_v20 = vld [vmem:[#allocation14] sm:$0xff] (!%p2638_p2)   ;;  %v3348_v21 = vld [vmem:[#allocation14 + $0x8] sm:$0xff] (!%p2638_p2)   ;;  %v3334_v44 = vld [vmem:[%s4422_s1 + $0x18] sm:$0xff] (!%p2638_p2)  }
 0x2e6   : > { %1051 = vst [vmem:[#allocation2 + $0x70] sm:$0xff] %v1019_v27  ;;  %1067 = vst [vmem:[#allocation2 + $0xf0] sm:$0xff] %v1035_v28  ;;  %v1020_v31 = vadd.f32 %v2763_v29, %v651_v23  ;;  %v1036_v32 = vadd.f32 %v2811_v30, %v667_v25  ;;  %1194 = vperm.xlu1 (!%p2638_p2), %3314, %v1116_v49   ;;  %1189 = vperm.xlu0 (!%p2638_p2), %3313, %v1115_v50   ;;  %v1074_v23 = vld [vmem:[#allocation2 + $0x8] sm:$0xff] (!%p2638_p2)  ;;  %v3349_v28 = vld [vmem:[#allocation14 + $0x10] sm:$0xff] (!%p2638_p2)  }
 0x2e7   : > { %2821 = vmatpush3.bf16.msra.mxu0 (!%p2638_p2), %v3324_v59  ;;  %2972 = vmatprep.subr.bf16.mxu1 (!%p2638_p2), %v3347_v20  ;;  %v3332_v29 = vld [vmem:[%s4422_s1 + $0x8] sm:$0xff] (!%p2638_p2)   ;;  %v1077_v41 = vld [vmem:[#allocation2 + $0x20] sm:$0xff] (!%p2638_p2)  ;;  %v1079_v49 = vld [vmem:[#allocation2 + $0x30] sm:$0xff] (!%p2638_p2) }
 0x2e8   : > { %1052 = vst [vmem:[#allocation2 + $0x78] sm:$0xff] %v1020_v31  ;;  %1068 = vst [vmem:[#allocation2 + $0xf8] sm:$0xff] %v1036_v32  ;;  %2822 = vmatprep.subr.bf16.mxu0 (!%p2638_p2), %v3325_v60  ;;  %2973 = vmatpush3.bf16.msra.mxu1 (!%p2638_p2), %v3347_v20  ;;  %v1075_v31 = vld [vmem:[#allocation2 + $0x10] sm:$0xff] (!%p2638_p2)  ;;  %v1076_v32 = vld [vmem:[#allocation2 + $0x18] sm:$0xff] (!%p2638_p2) }
 0x2e9   : > { %2974 = vmatprep.subr.bf16.mxu1 %v3348_v21  ;;  %v3335_v52 = vld [vmem:[%s4422_s1 + $0x20] sm:$0xff]   ;;  %v1082_v55 = vld [vmem:[#allocation2 + $0x48] sm:$0xff] }
 0x2ea   : > { %1204 = vperm.xlu1 %3314, %v1118_v53   ;;  %1199 = vperm.xlu0 %3313, %v1117_v54   ;;  %v3336_v60 = vld [vmem:[%s4422_s1 + $0x28] sm:$0xff]   ;;  %v3339_v20 = vld [vmem:[%s4422_s1 + $0x40] sm:$0xff]  }
 0x2eb   : > { %2823 = vmatpush3.bf16.msra.mxu0 %v3326_v0 }
 0x2ec   : > { %2824 = vmatprep.subr.bf16.mxu0 %v3327_v1  ;;  %2975 = vmatpush3.bf16.msra.mxu1 %v3348_v21  ;;  %v1083_v1 = vld [vmem:[#allocation2 + $0x50] sm:$0xff] }
 0x2ed   : > { %2976 = vmatprep.subr.bf16.mxu1 %v3349_v28 }
 0x2ee   : > { %1214 = vperm.xlu1 %3314, %v1120_v57   ;;  %1209 = vperm.xlu0 %3313, %v1119_v58   ;;  %v1081_v57 = vld [vmem:[#allocation2 + $0x40] sm:$0xff] }
 0x2ef   : > { %2825 = vmatpush3.bf16.msra.mxu0 %v3328_v4  ;;  %v3337_v4 = vld [vmem:[%s4422_s1 + $0x30] sm:$0xff]  }
 0x2f0   : > { %2826 = vmatprep.subr.bf16.mxu0 %v3329_v5  ;;  %2977 = vmatpush3.bf16.msra.mxu1 %v3349_v28  ;;  %v3340_v28 = vld [vmem:[%s4422_s1 + $0x48] sm:$0xff]  }
 0x2f2   : > { %1224 = vperm.xlu1 %3314, %v1122_v62   ;;  %1219 = vperm.xlu0 %3313, %v1121_v63   ;;  %v1084_v63 = vld [vmem:[#allocation2 + $0x58] sm:$0xff] }
 0x2f3   : > { %2827 = vmatpush3.bf16.msra.mxu0 %v3330_v8 }
 0x2f6   : > { %1234 = vperm.xlu1 %3314, %v1124_v2   ;;  %1229 = vperm.xlu0 %3313, %v1123_v3  }
 0x2fa   : > { %1244 = vperm.xlu1 %3314, %v1126_v6   ;;  %1239 = vperm.xlu0 %3313, %v1125_v7   ;;  %v1086_v7 = vld [vmem:[#allocation2 + $0x68] sm:$0xff] }
 0x2fe   : > { %1254 = vperm.xlu1 %3314, %v1128_v9   ;;  %1249 = vperm.xlu0 %3313, %v1127_v10   ;;  %v1085_v9 = vld [vmem:[#allocation2 + $0x60] sm:$0xff] }
 0x302   : > { %1264 = vperm.xlu1 %3314, %v1130_v11   ;;  %1259 = vperm.xlu0 %3313, %v1129_v12   ;;  %v3338_v12 = vld [vmem:[%s4422_s1 + $0x38] sm:$0xff]  }
 0x306   : > { %1274 = vperm.xlu1 %3314, %v1132_v13   ;;  %1269 = vperm.xlu0 %3313, %v1131_v14  }
 0x30a   : > { %1284 = vperm.xlu1 %3314, %v1134_v15   ;;  %1279 = vperm.xlu0 %3313, %v1133_v16   ;;  %v1088_v15 = vld [vmem:[#allocation2 + $0x78] sm:$0xff] }
 0x30e   : > { %1294 = vperm.xlu1 %3314, %v1136_v17   ;;  %1289 = vperm.xlu0 %3313, %v1135_v18   ;;  %v1087_v17 = vld [vmem:[#allocation2 + $0x70] sm:$0xff] }
 0x351   : > { %v1140_v19 = vpop.permute.xlu0 %1139  ;;  %v1150_v24 = vpop.permute.xlu1 %1149 }
 0x352   : > { %v1297_v26 = vmul.f32 %v1140_v19, %v1073_v22  ;;  %v1299_v34 = vmul.f32 %v1150_v24, %v1075_v31  ;;  %v1092_v31 = vld [vmem:[#allocation2 + $0x98] sm:$0xff] }
 0x355   : > { %v1145_v25 = vpop.permute.xlu0 %1144  ;;  %v1155_v33 = vpop.permute.xlu1 %1154 }
 0x356   : > { %v1298_v27 = vmul.f32 %v1145_v25, %v1074_v23  ;;  %v1300_v35 = vmul.f32 %v1155_v33, %v1076_v32  ;;  %v1090_v23 = vld [vmem:[#allocation2 + $0x88] sm:$0xff]  ;;  %v1089_v25 = vld [vmem:[#allocation2 + $0x80] sm:$0xff]  ;;  %v1091_v33 = vld [vmem:[#allocation2 + $0x90] sm:$0xff] }
 0x358   : > { %v1329_v30 = vpack.c.bf16 %v1298_v27, %v1297_v26  ;;  %v1330_v37 = vpack.c.bf16 %v1300_v35, %v1299_v34 }
 0x359   : > { %v1165_v38 = vpop.permute.xlu1 %1164  ;;  %v1160_v40 = vpop.permute.xlu0 %1159 }
 0x35a   : > { %1641 = vmatmul.mubr.bf16.vlgmr.msra.gmra.mrb[0].mxu0 %v1329_v30  ;;  %v1302_v42 = vmul.f32 %v1165_v38, %v1078_v39  ;;  %v1301_v43 = vmul.f32 %v1160_v40, %v1077_v41  ;;  %v1094_v39 = vld [vmem:[#allocation2 + $0xa8] sm:$0xff]  ;;  %v1093_v41 = vld [vmem:[#allocation2 + $0xa0] sm:$0xff] }
 0x35b   : > { %1648 = vmatprep.mubr.bf16.mxu0 %v3332_v29 }
 0x35c   : > { %v1331_v45 = vpack.c.bf16 %v1302_v42, %v1301_v43 }
 0x35d   : > { %v1175_v46 = vpop.permute.xlu1 %1174  ;;  %v1170_v48 = vpop.permute.xlu0 %1169 }
 0x35e   : > { %v1304_v50 = vmul.f32 %v1175_v46, %v1080_v47  ;;  %v1303_v51 = vmul.f32 %v1170_v48, %v1079_v49  ;;  %v1096_v47 = vld [vmem:[#allocation2 + $0xb8] sm:$0xff]  ;;  %v1095_v49 = vld [vmem:[#allocation2 + $0xb0] sm:$0xff] }
 0x360   : > { %v1332_v53 = vpack.c.bf16 %v1304_v50, %v1303_v51  ;;  %v3350_v50 = vld [vmem:[#allocation14 + $0x18] sm:$0xff]  }
 0x361   : > { %v1185_v54 = vpop.permute.xlu1 %1184  ;;  %v1180_v56 = vpop.permute.xlu0 %1179  ;;  %2978 = vmatprep.subr.bf16.mxu1 %v3350_v50 }
 0x362   : > { %1649 = vmatmul.mubr.bf16.gmra.mrb[4].mxu0 %v1330_v37  ;;  %v1306_v58 = vmul.f32 %v1185_v54, %v1082_v55  ;;  %v1305_v59 = vmul.f32 %v1180_v56, %v1081_v57  ;;  %2979 = vmatpush3.bf16.msra.mxu1 %v3350_v50  ;;  %v3351_v54 = vld [vmem:[#allocation14 + $0x20] sm:$0xff]  }
 0x363   : > { %1656 = vmatprep.mubr.bf16.mxu0 %v3333_v36  ;;  %v3341_v36 = vld [vmem:[%s4422_s1 + $0x50] sm:$0xff]   ;;  %v1098_v57 = vld [vmem:[#allocation2 + $0xc8] sm:$0xff]  ;;  %2980 = vmatprep.subr.bf16.mxu1 %v3351_v54 }
 0x364   : > { %v1333_v61 = vpack.c.bf16 %v1306_v58, %v1305_v59  ;;  %v1097_v59 = vld [vmem:[#allocation2 + $0xc0] sm:$0xff] }
 0x365   : > { %v1195_v62 = vpop.permute.xlu1 %1194  ;;  %v1190_v0 = vpop.permute.xlu0 %1189 }
 0x366   : > { %v1308_v2 = vmul.f32 %v1195_v62, %v1084_v63  ;;  %v1307_v3 = vmul.f32 %v1190_v0, %v1083_v1  ;;  %2981 = vmatpush3.bf16.msra.mxu1 %v3351_v54  ;;  %v3344_v63 = vld [vmem:[%s4422_s1 + $0x68] sm:$0xff]   ;;  %v3353_v0 = vld [vmem:[#allocation14 + $0x30] sm:$0xff]  }
 0x367   : > { %v3356_v54 = vld [vmem:[#allocation17 + $0x8] sm:$0xff]  }
 0x368   : > { %v1334_v5 = vpack.c.bf16 %v1308_v2, %v1307_v3  ;;  %v1100_v3 = vld [vmem:[#allocation2 + $0xd8] sm:$0xff] }
 0x369   : > { %v1205_v6 = vpop.permute.xlu1 %1204  ;;  %v1200_v8 = vpop.permute.xlu0 %1199 }
 0x36a   : > { %1657 = vmatmul.mubr.bf16.gmra.mrb[8].mxu0 %v1331_v45  ;;  %v1310_v10 = vmul.f32 %v1205_v6, %v1086_v7  ;;  %v1309_v11 = vmul.f32 %v1200_v8, %v1085_v9  ;;  %v3354_v6 = vld [vmem:[#allocation14 + $0x38] sm:$0xff]   ;;  %v3345_v9 = vld [vmem:[%s4422_s1 + $0x70] sm:$0xff]  }
 0x36b   : > { %1664 = vmatprep.mubr.bf16.mxu0 %v3334_v44  ;;  %v3342_v44 = vld [vmem:[%s4422_s1 + $0x58] sm:$0xff]  }
 0x36c   : > { %v1335_v13 = vpack.c.bf16 %v1310_v10, %v1309_v11 }
 0x36d   : > { %v1215_v14 = vpop.permute.xlu1 %1214  ;;  %v1210_v16 = vpop.permute.xlu0 %1209 }
 0x36e   : > { %v1312_v18 = vmul.f32 %v1215_v14, %v1088_v15  ;;  %v1311_v19 = vmul.f32 %v1210_v16, %v1087_v17  ;;  %v1101_v14 = vld [vmem:[#allocation2 + $0xe0] sm:$0xff]  ;;  %v3346_v17 = vld [vmem:[%s4422_s1 + $0x78] sm:$0xff]  }
 0x370   : > { %v1336_v21 = vpack.c.bf16 %v1312_v18, %v1311_v19 }
 0x371   : > { %v1225_v22 = vpop.permute.xlu1 %1224  ;;  %v1220_v24 = vpop.permute.xlu0 %1219 }
 0x372   : > { %1665 = vmatmul.mubr.bf16.gmra.mrb[12].mxu0 %v1332_v53  ;;  %v1314_v26 = vmul.f32 %v1225_v22, %v1090_v23  ;;  %v1313_v27 = vmul.f32 %v1220_v24, %v1089_v25  ;;  %v3343_v53 = vld [vmem:[%s4422_s1 + $0x60] sm:$0xff]   ;;  %v1103_v22 = vld [vmem:[#allocation2 + $0xf0] sm:$0xff] }
 0x373   : > { %1672 = vmatprep.mubr.bf16.mxu0 %v3335_v52 }
 0x374   : > { %v1337_v29 = vpack.c.bf16 %v1314_v26, %v1313_v27 }
 0x375   : > { %v1235_v30 = vpop.permute.xlu1 %1234  ;;  %v1230_v32 = vpop.permute.xlu0 %1229 }
 0x376   : > { %v1316_v34 = vmul.f32 %v1235_v30, %v1092_v31  ;;  %v1315_v35 = vmul.f32 %v1230_v32, %v1091_v33 }
 0x378   : > { %v1338_v37 = vpack.c.bf16 %v1316_v34, %v1315_v35  ;;  %v3355_v34 = vld [vmem:[#allocation17] sm:$0xff]  }
 0x379   : > { %v1245_v38 = vpop.permute.xlu1 %1244  ;;  %v1240_v40 = vpop.permute.xlu0 %1239 }
 0x37a   : > { %1673 = vmatmul.mubr.bf16.gmra.mrb[16].mxu0 %v1333_v61  ;;  %v1318_v42 = vmul.f32 %v1245_v38, %v1094_v39  ;;  %v1317_v43 = vmul.f32 %v1240_v40, %v1093_v41 }
 0x37b   : > { %1680 = vmatprep.mubr.bf16.mxu0 %v3336_v60  ;;  %v3352_v60 = vld [vmem:[#allocation14 + $0x28] sm:$0xff]  }
 0x37c   : > { %v1339_v45 = vpack.c.bf16 %v1318_v42, %v1317_v43  ;;  %2982 = vmatprep.subr.bf16.mxu1 %v3352_v60 }
 0x37d   : > { %v1255_v46 = vpop.permute.xlu1 %1254  ;;  %v1250_v48 = vpop.permute.xlu0 %1249  ;;  %2983 = vmatpush3.bf16.msra.mxu1 %v3352_v60 }
 0x37e   : > { %v1320_v51 = vmul.f32 %v1255_v46, %v1096_v47  ;;  %v1319_v52 = vmul.f32 %v1250_v48, %v1095_v49  ;;  %2984 = vmatprep.subr.bf16.mxu1 %v3353_v0 }
 0x380   : > { %v1340_v55 = vpack.c.bf16 %v1320_v51, %v1319_v52 }
 0x381   : > { %v1265_v56 = vpop.permute.xlu1 %1264  ;;  %v1260_v58 = vpop.permute.xlu0 %1259  ;;  %2985 = vmatpush3.bf16.msra.mxu1 %v3353_v0 }
 0x382   : > { %1681 = vmatmul.mubr.bf16.gmra.mrb[20].mxu0 %v1334_v5  ;;  %v1322_v61 = vmul.f32 %v1265_v56, %v1098_v57  ;;  %v1321_v62 = vmul.f32 %v1260_v58, %v1097_v59  ;;  %v1099_v5 = vld [vmem:[#allocation2 + $0xd0] sm:$0xff]  ;;  %2986 = vmatprep.subr.bf16.mxu1 %v3354_v6 }
 0x383   : > { %1688 = vmatprep.mubr.bf16.mxu0 %v3337_v4  ;;  %v3357_v59 = vld [vmem:[#allocation17 + $0x10] sm:$0xff]  }
 0x384   : > { %v1341_v1 = vpack.c.bf16 %v1322_v61, %v1321_v62 }
 0x385   : > { %v1275_v2 = vpop.permute.xlu1 %1274  ;;  %v1270_v4 = vpop.permute.xlu0 %1269  ;;  %2987 = vmatpush3.bf16.msra.mxu1 %v3354_v6 }
 0x386   : > { %v1324_v7 = vmul.f32 %v1275_v2, %v1100_v3  ;;  %v1323_v8 = vmul.f32 %v1270_v4, %v1099_v5  ;;  %3020 = vmatprep.subr.bf16.mxu1 %v3355_v34  ;;  %v3358_v3 = vld [vmem:[#allocation17 + $0x18] sm:$0xff]  }
 0x388   : > { %v1342_v10 = vpack.c.bf16 %v1324_v7, %v1323_v8  ;;  %v3359_v8 = vld [vmem:[#allocation17 + $0x20] sm:$0xff]  }
 0x389   : > { %v1285_v11 = vpop.permute.xlu1 %1284 }
 0x38a   : > { %1689 = vmatmul.mubr.bf16.gmra.mrb[24].mxu0 %v1335_v13  ;;  %v1280_v13 = vpop.permute.xlu0 %1279 }
 0x38b   : > { %1696 = vmatprep.mubr.bf16.mxu0 %v3338_v12  ;;  %v1102_v12 = vld [vmem:[#allocation2 + $0xe8] sm:$0xff]  ;;  %v1325_v16 = vmul.f32 %v1280_v13, %v1101_v14 }
 0x38c   : > { %v1326_v15 = vmul.f32 %v1285_v11, %v1102_v12 }
 0x38d   : > { %v1295_v19 = vpop.permute.xlu1 %1294 }
 0x38e   : > { %v1343_v18 = vpack.c.bf16 %v1326_v15, %v1325_v16  ;;  %v3360_v16 = vld [vmem:[#allocation17 + $0x28] sm:$0xff]  }
 0x392   : > { %1697 = vmatmul.mubr.bf16.gmra.mrb[28].mxu0 %v1336_v21  ;;  %v1290_v21 = vpop.permute.xlu0 %1289 }
 0x393   : > { %1704 = vmatprep.mubr.bf16.mxu0 %v3339_v20  ;;  %v1104_v20 = vld [vmem:[#allocation2 + $0xf8] sm:$0xff]  ;;  %v1327_v24 = vmul.f32 %v1290_v21, %v1103_v22 }
 0x394   : > { %v1328_v23 = vmul.f32 %v1295_v19, %v1104_v20 }
 0x396   : > { %v1344_v25 = vpack.c.bf16 %v1328_v23, %v1327_v24 }
 0x39a   : > { %1705 = vmatmul.mubr.bf16.gmra.mrb[32].mxu0 %v1337_v29 }
 0x39b   : > { %1712 = vmatprep.mubr.bf16.mxu0 %v3340_v28  ;;  %v4535_v28 = vld [vmem:[#allocation12] ss:$0 sm:$0xff] }
 0x3a2   : > { %1713 = vmatmul.mubr.bf16.gmra.mrb[36].mxu0 %v1338_v37 }
 0x3a3   : > { %1720 = vmatprep.mubr.bf16.mxu0 %v3341_v36 }
 0x3aa   : > { %1721 = vmatmul.mubr.bf16.gmra.mrb[40].mxu0 %v1339_v45 }
 0x3ab   : > { %1728 = vmatprep.mubr.bf16.mxu0 %v3342_v44 }
 0x3b2   : > { %1729 = vmatmul.mubr.bf16.gmra.mrb[44].mxu0 %v1340_v55 }
 0x3b3   : > { %1736 = vmatprep.mubr.bf16.mxu0 %v3343_v53 }
 0x3ba   : > { %1737 = vmatmul.mubr.bf16.gmra.mrb[48].mxu0 %v1341_v1 }
 0x3bb   : > { %1744 = vmatprep.mubr.bf16.mxu0 %v3344_v63 }
 0x3c2   : > { %1745 = vmatmul.mubr.bf16.gmra.mrb[52].mxu0 %v1342_v10 }
 0x3c3   : > { %1752 = vmatprep.mubr.bf16.mxu0 %v3345_v9 }
 0x3ca   : > { %1753 = vmatmul.mubr.bf16.gmra.mrb[56].mxu0 %v1343_v18 }
 0x3cb   : > { %1760 = vmatprep.mubr.bf16.mxu0 %v3346_v17 }
 0x3d2   : > { %1761 = vmatmul.mubr.bf16.gmra.mrb[60].mxu0 %v1344_v25 }
 0x42d   : > { %v2828_v26 = vpop.f32.mrb[0].mxu0 }
 0x42e   : > { %v2829_v27 = vpop.f32.mrb[1].mxu0 }
 0x42f   : > { %v2830_v29 = vadd.f32 %v2829_v27, %v2828_v26  ;;  %v2831_v30 = vpop.f32.mrb[2].mxu0 }
 0x430   : > { %v2832_v31 = vpop.f32.mrb[3].mxu0 }
 0x431   : > { %v2833_v32 = vadd.f32 %v2832_v31, %v2831_v30  ;;  %v1643_v33 = vadd.f32 %v2830_v29, %v4535_v28 }
 0x433   : > { %v1646_v35 = vadd.f32 %v2833_v32, %v4535_v28  ;;  %v1769_v37 = vmax.f32 %v1643_v33, 0.0 }
 0x435   : > { %v2834_v36 = vpop.f32.mrb[4].mxu0  ;;  %v1770_v38 = vmax.f32 %v1646_v35, 0.0 }
 0x436   : > { %v2835_v39 = vpop.f32.mrb[5].mxu0 }
 0x437   : > { %v2836_v40 = vadd.f32 %v2835_v39, %v2834_v36  ;;  %v2837_v41 = vpop.f32.mrb[6].mxu0  ;;  %v1801_v42 = vpack.c.bf16 %v1770_v38, %v1769_v37 }
 0x438   : > { %v2838_v43 = vpop.f32.mrb[7].mxu0 }
 0x439   : > { %v1651_v44 = vadd.f32 %v2836_v40, %v4535_v28  ;;  %v2839_v45 = vadd.f32 %v2838_v43, %v2837_v41  ;;  %2988 = vmatprep.mubr.bf16.mxu1 %v1801_v42 }
 0x43b   : > { %v1654_v46 = vadd.f32 %v2839_v45, %v4535_v28  ;;  %v1771_v47 = vmax.f32 %v1651_v44, 0.0 }
 0x43d   : > { %v1772_v48 = vmax.f32 %v1654_v46, 0.0  ;;  %v2840_v49 = vpop.f32.mrb[8].mxu0 }
 0x43e   : > { %v2841_v50 = vpop.f32.mrb[9].mxu0 }
 0x43f   : > { %v2842_v51 = vadd.f32 %v2841_v50, %v2840_v49  ;;  %v2843_v52 = vpop.f32.mrb[10].mxu0  ;;  %v1802_v53 = vpack.c.bf16 %v1772_v48, %v1771_v47 }
 0x440   : > { %v2844_v55 = vpop.f32.mrb[11].mxu0 }
 0x441   : > { %v1659_v56 = vadd.f32 %v2842_v51, %v4535_v28  ;;  %v2845_v57 = vadd.f32 %v2844_v55, %v2843_v52  ;;  %2989 = vmatmul.mubr.bf16.vlgmr.msra.gmra.mrb[0].mxu1 %v1802_v53 }
 0x442   : > { %3021 = vmatpush3.bf16.msra.mxu1 %v3355_v34 }
 0x443   : > { %v1662_v58 = vadd.f32 %v2845_v57, %v4535_v28  ;;  %3022 = vmatprep.subr.bf16.mxu1 %v3356_v54  ;;  %v1773_v60 = vmax.f32 %v1659_v56, 0.0 }
 0x445   : > { %v1774_v61 = vmax.f32 %v1662_v58, 0.0  ;;  %v2846_v62 = vpop.f32.mrb[12].mxu0 }
 0x446   : > { %v2847_v63 = vpop.f32.mrb[13].mxu0  ;;  %3023 = vmatpush3.bf16.msra.mxu1 %v3356_v54 }
 0x447   : > { %v2848_v0 = vadd.f32 %v2847_v63, %v2846_v62  ;;  %v2849_v1 = vpop.f32.mrb[14].mxu0  ;;  %v1803_v2 = vpack.c.bf16 %v1774_v61, %v1773_v60  ;;  %3024 = vmatprep.subr.bf16.mxu1 %v3357_v59 }
 0x448   : > { %v2850_v4 = vpop.f32.mrb[15].mxu0 }
 0x449   : > { %v1667_v5 = vadd.f32 %v2848_v0, %v4535_v28  ;;  %v2851_v6 = vadd.f32 %v2850_v4, %v2849_v1  ;;  %2992 = vmatprep.mubr.bf16.mxu1 %v1803_v2 }
 0x44a   : > { %3025 = vmatpush3.bf16.msra.mxu1 %v3357_v59 }
 0x44b   : > { %v1670_v7 = vadd.f32 %v2851_v6, %v4535_v28  ;;  %3026 = vmatprep.subr.bf16.mxu1 %v3358_v3  ;;  %v1775_v9 = vmax.f32 %v1667_v5, 0.0 }
 0x44d   : > { %v1776_v10 = vmax.f32 %v1670_v7, 0.0  ;;  %v2852_v11 = vpop.f32.mrb[16].mxu0 }
 0x44e   : > { %v2853_v12 = vpop.f32.mrb[17].mxu0  ;;  %3027 = vmatpush3.bf16.msra.mxu1 %v3358_v3 }
 0x44f   : > { %v2854_v13 = vadd.f32 %v2853_v12, %v2852_v11  ;;  %v2855_v14 = vpop.f32.mrb[18].mxu0  ;;  %v1804_v15 = vpack.c.bf16 %v1776_v10, %v1775_v9  ;;  %3028 = vmatprep.subr.bf16.mxu1 %v3359_v8 }
 0x450   : > { %v2856_v17 = vpop.f32.mrb[19].mxu0 }
 0x451   : > { %v1675_v18 = vadd.f32 %v2854_v13, %v4535_v28  ;;  %v2857_v19 = vadd.f32 %v2856_v17, %v2855_v14  ;;  %2993 = vmatmul.mubr.bf16.gmra.mrb[4].mxu1 %v1804_v15 }
 0x452   : > { %3029 = vmatpush3.bf16.msra.mxu1 %v3359_v8 }
 0x453   : > { %v1678_v20 = vadd.f32 %v2857_v19, %v4535_v28  ;;  %3030 = vmatprep.subr.bf16.mxu1 %v3360_v16  ;;  %v1777_v21 = vmax.f32 %v1675_v18, 0.0 }
 0x455   : > { %v1778_v22 = vmax.f32 %v1678_v20, 0.0  ;;  %v2858_v23 = vpop.f32.mrb[20].mxu0 }
 0x456   : > { %v2859_v24 = vpop.f32.mrb[21].mxu0  ;;  %3031 = vmatpush3.bf16.msra.mxu1 %v3360_v16 }
 0x457   : > { %v2860_v25 = vadd.f32 %v2859_v24, %v2858_v23  ;;  %v2861_v26 = vpop.f32.mrb[22].mxu0  ;;  %v1805_v27 = vpack.c.bf16 %v1778_v22, %v1777_v21 }
 0x458   : > { %v2862_v29 = vpop.f32.mrb[23].mxu0 }
 0x459   : > { %v1683_v30 = vadd.f32 %v2860_v25, %v4535_v28  ;;  %v2863_v31 = vadd.f32 %v2862_v29, %v2861_v26  ;;  %2996 = vmatprep.mubr.bf16.mxu1 %v1805_v27 }
 0x45b   : > { %v1686_v32 = vadd.f32 %v2863_v31, %v4535_v28  ;;  %v1779_v33 = vmax.f32 %v1683_v30, 0.0 }
 0x45d   : > { %v1780_v34 = vmax.f32 %v1686_v32, 0.0  ;;  %v2864_v35 = vpop.f32.mrb[24].mxu0 }
 0x45e   : > { %v2865_v36 = vpop.f32.mrb[25].mxu0 }
 0x45f   : > { %v2866_v37 = vadd.f32 %v2865_v36, %v2864_v35  ;;  %v2867_v38 = vpop.f32.mrb[26].mxu0  ;;  %v1806_v39 = vpack.c.bf16 %v1780_v34, %v1779_v33 }
 0x460   : > { %v2868_v40 = vpop.f32.mrb[27].mxu0 }
 0x461   : > { %v1691_v41 = vadd.f32 %v2866_v37, %v4535_v28  ;;  %v2869_v42 = vadd.f32 %v2868_v40, %v2867_v38  ;;  %2997 = vmatmul.mubr.bf16.gmra.mrb[8].mxu1 %v1806_v39 }
 0x463   : > { %v1694_v43 = vadd.f32 %v2869_v42, %v4535_v28  ;;  %v1781_v44 = vmax.f32 %v1691_v41, 0.0 }
 0x465   : > { %v1782_v45 = vmax.f32 %v1694_v43, 0.0  ;;  %v2870_v46 = vpop.f32.mrb[28].mxu0 }
 0x466   : > { %v2871_v47 = vpop.f32.mrb[29].mxu0 }
 0x467   : > { %v2872_v48 = vadd.f32 %v2871_v47, %v2870_v46  ;;  %v2873_v49 = vpop.f32.mrb[30].mxu0  ;;  %v1807_v50 = vpack.c.bf16 %v1782_v45, %v1781_v44 }
 0x468   : > { %v2874_v51 = vpop.f32.mrb[31].mxu0 }
 0x469   : > { %v1699_v52 = vadd.f32 %v2872_v48, %v4535_v28  ;;  %v2875_v53 = vadd.f32 %v2874_v51, %v2873_v49  ;;  %3000 = vmatprep.mubr.bf16.mxu1 %v1807_v50  ;;  %v3361_v50 = vld [vmem:[#allocation17 + $0x30] sm:$0xff]  }
 0x46a   : > { %3032 = vmatprep.subr.bf16.mxu1 %v3361_v50 }
 0x46b   : > { %v1702_v54 = vadd.f32 %v2875_v53, %v4535_v28  ;;  %v1783_v55 = vmax.f32 %v1699_v52, 0.0  ;;  %3033 = vmatpush3.bf16.msra.mxu1 %v3361_v50 }
 0x46d   : > { %v1784_v56 = vmax.f32 %v1702_v54, 0.0  ;;  %v2876_v57 = vpop.f32.mrb[32].mxu0 }
 0x46e   : > { %v2877_v58 = vpop.f32.mrb[33].mxu0 }
 0x46f   : > { %v2878_v59 = vadd.f32 %v2877_v58, %v2876_v57  ;;  %v2879_v60 = vpop.f32.mrb[34].mxu0  ;;  %v1808_v61 = vpack.c.bf16 %v1784_v56, %v1783_v55  ;;  %v3362_v58 = vld [vmem:[#allocation17 + $0x38] sm:$0xff]  }
 0x470   : > { %v2880_v62 = vpop.f32.mrb[35].mxu0  ;;  %3034 = vmatprep.subr.bf16.mxu1 %v3362_v58 }
 0x471   : > { %v1707_v63 = vadd.f32 %v2878_v59, %v4535_v28  ;;  %v2881_v0 = vadd.f32 %v2880_v62, %v2879_v60  ;;  %3001 = vmatmul.mubr.bf16.gmra.mrb[12].mxu1 %v1808_v61 }
 0x472   : > { %3035 = vmatpush3.bf16.msra.mxu1 %v3362_v58 }
 0x473   : > { %v1710_v1 = vadd.f32 %v2881_v0, %v4535_v28  ;;  %v1785_v2 = vmax.f32 %v1707_v63, 0.0 }
 0x475   : > { %v1786_v3 = vmax.f32 %v1710_v1, 0.0  ;;  %v2882_v4 = vpop.f32.mrb[36].mxu0 }
 0x476   : > { %v2883_v5 = vpop.f32.mrb[37].mxu0 }
 0x477   : > { %v2884_v6 = vadd.f32 %v2883_v5, %v2882_v4  ;;  %v2885_v7 = vpop.f32.mrb[38].mxu0  ;;  %v1809_v8 = vpack.c.bf16 %v1786_v3, %v1785_v2 }
 0x478   : > { %v2886_v9 = vpop.f32.mrb[39].mxu0 }
 0x479   : > { %v1715_v10 = vadd.f32 %v2884_v6, %v4535_v28  ;;  %v2887_v11 = vadd.f32 %v2886_v9, %v2885_v7  ;;  %3004 = vmatprep.mubr.bf16.mxu1 %v1809_v8 }
 0x47b   : > { %v1718_v12 = vadd.f32 %v2887_v11, %v4535_v28  ;;  %v1787_v13 = vmax.f32 %v1715_v10, 0.0 }
 0x47d   : > { %v1788_v14 = vmax.f32 %v1718_v12, 0.0  ;;  %v2888_v15 = vpop.f32.mrb[40].mxu0 }
 0x47e   : > { %v2889_v16 = vpop.f32.mrb[41].mxu0 }
 0x47f   : > { %v2890_v17 = vadd.f32 %v2889_v16, %v2888_v15  ;;  %v2891_v18 = vpop.f32.mrb[42].mxu0  ;;  %v1810_v19 = vpack.c.bf16 %v1788_v14, %v1787_v13 }
 0x480   : > { %v2892_v20 = vpop.f32.mrb[43].mxu0 }
 0x481   : > { %v1723_v21 = vadd.f32 %v2890_v17, %v4535_v28  ;;  %v2893_v22 = vadd.f32 %v2892_v20, %v2891_v18  ;;  %3005 = vmatmul.mubr.bf16.gmra.mrb[16].mxu1 %v1810_v19 }
 0x483   : > { %v1726_v23 = vadd.f32 %v2893_v22, %v4535_v28  ;;  %v1789_v24 = vmax.f32 %v1723_v21, 0.0  ;;  %v4569_v21 = vld [vmem:[#allocation15] ss:$0 sm:$0xff] }
 0x485   : > { %v1790_v25 = vmax.f32 %v1726_v23, 0.0  ;;  %v2894_v26 = vpop.f32.mrb[44].mxu0 }
 0x486   : > { %v2895_v27 = vpop.f32.mrb[45].mxu0 }
 0x487   : > { %v2896_v29 = vadd.f32 %v2895_v27, %v2894_v26  ;;  %v2897_v30 = vpop.f32.mrb[46].mxu0  ;;  %v1811_v31 = vpack.c.bf16 %v1790_v25, %v1789_v24 }
 0x488   : > { %v2898_v32 = vpop.f32.mrb[47].mxu0 }
 0x489   : > { %v1731_v33 = vadd.f32 %v2896_v29, %v4535_v28  ;;  %v2899_v34 = vadd.f32 %v2898_v32, %v2897_v30  ;;  %3008 = vmatprep.mubr.bf16.mxu1 %v1811_v31 }
 0x48b   : > { %v1734_v35 = vadd.f32 %v2899_v34, %v4535_v28  ;;  %v1791_v36 = vmax.f32 %v1731_v33, 0.0 }
 0x48d   : > { %v1792_v37 = vmax.f32 %v1734_v35, 0.0  ;;  %v2900_v38 = vpop.f32.mrb[48].mxu0 }
 0x48e   : > { %v2901_v39 = vpop.f32.mrb[49].mxu0 }
 0x48f   : > { %v2902_v40 = vadd.f32 %v2901_v39, %v2900_v38  ;;  %v2903_v41 = vpop.f32.mrb[50].mxu0  ;;  %v1812_v42 = vpack.c.bf16 %v1792_v37, %v1791_v36 }
 0x490   : > { %v2904_v43 = vpop.f32.mrb[51].mxu0 }
 0x491   : > { %v1739_v44 = vadd.f32 %v2902_v40, %v4535_v28  ;;  %v2905_v45 = vadd.f32 %v2904_v43, %v2903_v41  ;;  %3009 = vmatmul.mubr.bf16.gmra.mrb[20].mxu1 %v1812_v42 }
 0x493   : > { %v1742_v46 = vadd.f32 %v2905_v45, %v4535_v28  ;;  %v1793_v47 = vmax.f32 %v1739_v44, 0.0 }
 0x495   : > { %v1794_v48 = vmax.f32 %v1742_v46, 0.0  ;;  %v2906_v49 = vpop.f32.mrb[52].mxu0 }
 0x496   : > { %v2907_v51 = vpop.f32.mrb[53].mxu0 }
 0x497   : > { %v2908_v52 = vadd.f32 %v2907_v51, %v2906_v49  ;;  %v2909_v53 = vpop.f32.mrb[54].mxu0  ;;  %v1813_v54 = vpack.c.bf16 %v1794_v48, %v1793_v47 }
 0x498   : > { %v2910_v55 = vpop.f32.mrb[55].mxu0 }
 0x499   : > { %v1747_v56 = vadd.f32 %v2908_v52, %v4535_v28  ;;  %v2911_v57 = vadd.f32 %v2910_v55, %v2909_v53  ;;  %3012 = vmatprep.mubr.bf16.mxu1 %v1813_v54 }
 0x49b   : > { %v1750_v59 = vadd.f32 %v2911_v57, %v4535_v28  ;;  %v1795_v60 = vmax.f32 %v1747_v56, 0.0 }
 0x49d   : > { %v1796_v61 = vmax.f32 %v1750_v59, 0.0  ;;  %v2912_v62 = vpop.f32.mrb[56].mxu0 }
 0x49e   : > { %v2913_v63 = vpop.f32.mrb[57].mxu0 }
 0x49f   : > { %v2914_v0 = vadd.f32 %v2913_v63, %v2912_v62  ;;  %v2915_v1 = vpop.f32.mrb[58].mxu0  ;;  %v1814_v2 = vpack.c.bf16 %v1796_v61, %v1795_v60 }
 0x4a0   : > { %v2916_v3 = vpop.f32.mrb[59].mxu0 }
 0x4a1   : > { %v1755_v4 = vadd.f32 %v2914_v0, %v4535_v28  ;;  %v2917_v5 = vadd.f32 %v2916_v3, %v2915_v1  ;;  %3013 = vmatmul.mubr.bf16.gmra.mrb[24].mxu1 %v1814_v2 }
 0x4a3   : > { %v1758_v6 = vadd.f32 %v2917_v5, %v4535_v28  ;;  %v1797_v7 = vmax.f32 %v1755_v4, 0.0 }
 0x4a5   : > { %v1798_v8 = vmax.f32 %v1758_v6, 0.0  ;;  %v2918_v9 = vpop.f32.mrb[60].mxu0 }
 0x4a6   : > { %v2919_v10 = vpop.f32.mrb[61].mxu0 }
 0x4a7   : > { %v2920_v11 = vadd.f32 %v2919_v10, %v2918_v9  ;;  %v2921_v12 = vpop.f32.mrb[62].mxu0  ;;  %v1815_v13 = vpack.c.bf16 %v1798_v8, %v1797_v7 }
 0x4a8   : > { %v2922_v14 = vpop.f32.mrb[63].mxu0 }
 0x4a9   : > { %v1763_v15 = vadd.f32 %v2920_v11, %v4535_v28  ;;  %v2923_v16 = vadd.f32 %v2922_v14, %v2921_v12  ;;  %3016 = vmatprep.mubr.bf16.mxu1 %v1815_v13 }
 0x4ab   : > { %v1766_v17 = vadd.f32 %v2923_v16, %v4535_v28  ;;  %v1799_v18 = vmax.f32 %v1763_v15, 0.0 }
 0x4ad   : > { %v1800_v19 = vmax.f32 %v1766_v17, 0.0 }
 0x4af   : > { %v1816_v20 = vpack.c.bf16 %v1800_v19, %v1799_v18 }
 0x4b1   : > { %3017 = vmatmul.mubr.bf16.gmra.mrb[28].mxu1 %v1816_v20 }
 0x514   : > { %v2990_v22 = vpop.f32.mrb[0].mxu1 }
 0x515   : > { %v1931_v23 = vadd.f32 %v2990_v22, %v4569_v21  ;;  %v1922_v24 = vpop.f32.mrb[1].mxu1 }
 0x516   : > { %v1923_v25 = vadd.f32 %v4569_v21, %v1922_v24  ;;  %v2991_v26 = vpop.f32.mrb[2].mxu1 }
 0x517   : > { %v1934_v27 = vadd.f32 %v2991_v26, %v4569_v21  ;;  %v1925_v29 = vpop.f32.mrb[3].mxu1  ;;  %v2051_v31 = vmax.f32 %v1931_v23, 0.0 }
 0x518   : > { %v1926_v30 = vadd.f32 %v4569_v21, %v1925_v29  ;;  %v2049_v32 = vmax.f32 %v1923_v25, 0.0 }
 0x519   : > { %v2052_v28 = vmax.f32 %v1934_v27, 0.0 }
 0x51a   : > { %v2050_v33 = vmax.f32 %v1926_v30, 0.0 }
 0x51b   : > { %v2082_v34 = vpack.c.bf16 %v2052_v28, %v2051_v31 }
 0x51c   : > { %v2081_v35 = vpack.c.bf16 %v2050_v33, %v2049_v32 }
 0x51e   : > { %3036 = vmatprep.mubr.bf16.mxu1 %v2081_v35 }
 0x51f   : > { %3037 = vmatmul.mubr.bf16.vlgmr.msra.gmra.mrb[32].mxu1 %v2082_v34 }
 0x524   : > { %v2994_v36 = vpop.f32.mrb[4].mxu1 }
 0x525   : > { %v1947_v37 = vadd.f32 %v2994_v36, %v4569_v21  ;;  %v1938_v38 = vpop.f32.mrb[5].mxu1 }
 0x526   : > { %v1939_v39 = vadd.f32 %v4569_v21, %v1938_v38  ;;  %v2995_v40 = vpop.f32.mrb[6].mxu1 }
 0x527   : > { %v1950_v41 = vadd.f32 %v2995_v40, %v4569_v21  ;;  %v1941_v42 = vpop.f32.mrb[7].mxu1  ;;  %v2055_v44 = vmax.f32 %v1947_v37, 0.0 }
 0x528   : > { %v1942_v43 = vadd.f32 %v4569_v21, %v1941_v42  ;;  %v2053_v46 = vmax.f32 %v1939_v39, 0.0 }
 0x529   : > { %v2056_v45 = vmax.f32 %v1950_v41, 0.0 }
 0x52a   : > { %v2054_v47 = vmax.f32 %v1942_v43, 0.0 }
 0x52b   : > { %v2084_v48 = vpack.c.bf16 %v2056_v45, %v2055_v44 }
 0x52c   : > { %v2083_v49 = vpack.c.bf16 %v2054_v47, %v2053_v46 }
 0x52e   : > { %3040 = vmatprep.mubr.bf16.mxu1 %v2083_v49 }
 0x52f   : > { %3041 = vmatmul.mubr.bf16.gmra.mrb[36].mxu1 %v2084_v48 }
 0x534   : > { %v2998_v50 = vpop.f32.mrb[8].mxu1 }
 0x535   : > { %v1963_v51 = vadd.f32 %v2998_v50, %v4569_v21  ;;  %v1954_v52 = vpop.f32.mrb[9].mxu1 }
 0x536   : > { %v1955_v53 = vadd.f32 %v4569_v21, %v1954_v52  ;;  %v2999_v54 = vpop.f32.mrb[10].mxu1 }
 0x537   : > { %v1966_v55 = vadd.f32 %v2999_v54, %v4569_v21  ;;  %v1957_v56 = vpop.f32.mrb[11].mxu1  ;;  %v2059_v58 = vmax.f32 %v1963_v51, 0.0 }
 0x538   : > { %v1958_v57 = vadd.f32 %v4569_v21, %v1957_v56  ;;  %v2057_v60 = vmax.f32 %v1955_v53, 0.0 }
 0x539   : > { %v2060_v59 = vmax.f32 %v1966_v55, 0.0 }
 0x53a   : > { %v2058_v61 = vmax.f32 %v1958_v57, 0.0 }
 0x53b   : > { %v2086_v62 = vpack.c.bf16 %v2060_v59, %v2059_v58 }
 0x53c   : > { %v2085_v63 = vpack.c.bf16 %v2058_v61, %v2057_v60 }
 0x53e   : > { %3044 = vmatprep.mubr.bf16.mxu1 %v2085_v63 }
 0x53f   : > { %3045 = vmatmul.mubr.bf16.gmra.mrb[40].mxu1 %v2086_v62 }
 0x544   : > { %v3002_v0 = vpop.f32.mrb[12].mxu1 }
 0x545   : > { %v1979_v1 = vadd.f32 %v3002_v0, %v4569_v21  ;;  %v1970_v2 = vpop.f32.mrb[13].mxu1 }
 0x546   : > { %v1971_v3 = vadd.f32 %v4569_v21, %v1970_v2  ;;  %v3003_v4 = vpop.f32.mrb[14].mxu1 }
 0x547   : > { %v1982_v5 = vadd.f32 %v3003_v4, %v4569_v21  ;;  %v1973_v6 = vpop.f32.mrb[15].mxu1  ;;  %v2063_v8 = vmax.f32 %v1979_v1, 0.0 }
 0x548   : > { %v1974_v7 = vadd.f32 %v4569_v21, %v1973_v6  ;;  %v2061_v10 = vmax.f32 %v1971_v3, 0.0 }
 0x549   : > { %v2064_v9 = vmax.f32 %v1982_v5, 0.0 }
 0x54a   : > { %v2062_v11 = vmax.f32 %v1974_v7, 0.0  ;;  %v4603_v7 = vld [vmem:[#allocation18] ss:$0 sm:$0xff] }
 0x54b   : > { %v2088_v12 = vpack.c.bf16 %v2064_v9, %v2063_v8 }
 0x54c   : > { %v2087_v13 = vpack.c.bf16 %v2062_v11, %v2061_v10 }
 0x54e   : > { %3048 = vmatprep.mubr.bf16.mxu1 %v2087_v13 }
 0x54f   : > { %3049 = vmatmul.mubr.bf16.gmra.mrb[44].mxu1 %v2088_v12 }
 0x554   : > { %v3006_v14 = vpop.f32.mrb[16].mxu1 }
 0x555   : > { %v1995_v15 = vadd.f32 %v3006_v14, %v4569_v21  ;;  %v1986_v16 = vpop.f32.mrb[17].mxu1 }
 0x556   : > { %v1987_v17 = vadd.f32 %v4569_v21, %v1986_v16  ;;  %v3007_v18 = vpop.f32.mrb[18].mxu1 }
 0x557   : > { %v1998_v19 = vadd.f32 %v3007_v18, %v4569_v21  ;;  %v1989_v20 = vpop.f32.mrb[19].mxu1  ;;  %v2067_v23 = vmax.f32 %v1995_v15, 0.0 }
 0x558   : > { %v1990_v22 = vadd.f32 %v4569_v21, %v1989_v20  ;;  %v2065_v25 = vmax.f32 %v1987_v17, 0.0 }
 0x559   : > { %v2068_v24 = vmax.f32 %v1998_v19, 0.0 }
 0x55a   : > { %v2066_v26 = vmax.f32 %v1990_v22, 0.0 }
 0x55b   : > { %v2090_v27 = vpack.c.bf16 %v2068_v24, %v2067_v23 }
 0x55c   : > { %v2089_v29 = vpack.c.bf16 %v2066_v26, %v2065_v25 }
 0x55e   : > { %3052 = vmatprep.mubr.bf16.mxu1 %v2089_v29 }
 0x55f   : > { %3053 = vmatmul.mubr.bf16.gmra.mrb[48].mxu1 %v2090_v27 }
 0x564   : > { %v3010_v30 = vpop.f32.mrb[20].mxu1 }
 0x565   : > { %v2011_v31 = vadd.f32 %v3010_v30, %v4569_v21  ;;  %v2002_v28 = vpop.f32.mrb[21].mxu1 }
 0x566   : > { %v2003_v32 = vadd.f32 %v4569_v21, %v2002_v28  ;;  %v3011_v33 = vpop.f32.mrb[22].mxu1 }
 0x567   : > { %v2014_v34 = vadd.f32 %v3011_v33, %v4569_v21  ;;  %v2005_v35 = vpop.f32.mrb[23].mxu1  ;;  %v2071_v37 = vmax.f32 %v2011_v31, 0.0 }
 0x568   : > { %v2006_v36 = vadd.f32 %v4569_v21, %v2005_v35  ;;  %v2069_v39 = vmax.f32 %v2003_v32, 0.0 }
 0x569   : > { %v2072_v38 = vmax.f32 %v2014_v34, 0.0 }
 0x56a   : > { %v2070_v40 = vmax.f32 %v2006_v36, 0.0 }
 0x56b   : > { %v2092_v41 = vpack.c.bf16 %v2072_v38, %v2071_v37 }
 0x56c   : > { %v2091_v42 = vpack.c.bf16 %v2070_v40, %v2069_v39 }
 0x56e   : > { %3056 = vmatprep.mubr.bf16.mxu1 %v2091_v42 }
 0x56f   : > { %3057 = vmatmul.mubr.bf16.gmra.mrb[52].mxu1 %v2092_v41 }
 0x574   : > { %v3014_v43 = vpop.f32.mrb[24].mxu1 }
 0x575   : > { %v2027_v44 = vadd.f32 %v3014_v43, %v4569_v21  ;;  %v2018_v45 = vpop.f32.mrb[25].mxu1 }
 0x576   : > { %v2019_v46 = vadd.f32 %v4569_v21, %v2018_v45  ;;  %v3015_v47 = vpop.f32.mrb[26].mxu1 }
 0x577   : > { %v2030_v48 = vadd.f32 %v3015_v47, %v4569_v21  ;;  %v2021_v49 = vpop.f32.mrb[27].mxu1  ;;  %v2075_v51 = vmax.f32 %v2027_v44, 0.0 }
 0x578   : > { %v2022_v50 = vadd.f32 %v4569_v21, %v2021_v49  ;;  %v2073_v53 = vmax.f32 %v2019_v46, 0.0 }
 0x579   : > { %v2076_v52 = vmax.f32 %v2030_v48, 0.0 }
 0x57a   : > { %v2074_v54 = vmax.f32 %v2022_v50, 0.0 }
 0x57b   : > { %v2094_v55 = vpack.c.bf16 %v2076_v52, %v2075_v51 }
 0x57c   : > { %v2093_v56 = vpack.c.bf16 %v2074_v54, %v2073_v53 }
 0x57e   : > { %3060 = vmatprep.mubr.bf16.mxu1 %v2093_v56 }
 0x57f   : > { %3061 = vmatmul.mubr.bf16.gmra.mrb[56].mxu1 %v2094_v55 }
 0x584   : > { %v3018_v57 = vpop.f32.mrb[28].mxu1 }
 0x585   : > { %v2043_v58 = vadd.f32 %v3018_v57, %v4569_v21  ;;  %v2034_v59 = vpop.f32.mrb[29].mxu1 }
 0x586   : > { %v2035_v60 = vadd.f32 %v4569_v21, %v2034_v59  ;;  %v3019_v61 = vpop.f32.mrb[30].mxu1 }
 0x587   : > { %v2046_v62 = vadd.f32 %v3019_v61, %v4569_v21  ;;  %v2037_v63 = vpop.f32.mrb[31].mxu1  ;;  %v2079_v1 = vmax.f32 %v2043_v58, 0.0 }
 0x588   : > { %v2038_v0 = vadd.f32 %v4569_v21, %v2037_v63  ;;  %v2077_v3 = vmax.f32 %v2035_v60, 0.0 }
 0x589   : > { %v2080_v2 = vmax.f32 %v2046_v62, 0.0 }
 0x58a   : > { %v2078_v4 = vmax.f32 %v2038_v0, 0.0 }
 0x58b   : > { %v2096_v5 = vpack.c.bf16 %v2080_v2, %v2079_v1 }
 0x58c   : > { %v2095_v6 = vpack.c.bf16 %v2078_v4, %v2077_v3 }
 0x58e   : > { %3064 = vmatprep.mubr.bf16.mxu1 %v2095_v6 }
 0x58f   : > { %3065 = vmatmul.mubr.bf16.gmra.mrb[60].mxu1 %v2096_v5 }
 0x5f2   : > { %v3038_v8 = vpop.f32.mrb[32].mxu1 }
 0x5f3   : > { %v2211_v9 = vadd.f32 %v3038_v8, %v4603_v7  ;;  %v2202_v10 = vpop.f32.mrb[33].mxu1 }
 0x5f4   : > { %v2203_v21 = vadd.f32 %v4603_v7, %v2202_v10  ;;  %v3039_v11 = vpop.f32.mrb[34].mxu1 }
 0x5f5   : > { %2331 = vst [vmem:[%s4451_s6 + $0x10] sm:$0xff] %v2211_v9  ;;  %v2214_v12 = vadd.f32 %v3039_v11, %v4603_v7  ;;  %v2205_v13 = vpop.f32.mrb[35].mxu1 }
 0x5f6   : > { %2329 = vst [vmem:[%s4451_s6] sm:$0xff] %v2203_v21  ;;  %v2206_v14 = vadd.f32 %v4603_v7, %v2205_v13 }
 0x5f7   : > { %2332 = vst [vmem:[%s4451_s6 + $0x18] sm:$0xff] %v2214_v12 }
 0x5f8   : > { %2330 = vst [vmem:[%s4451_s6 + $0x8] sm:$0xff] %v2206_v14 }
 0x602   : > { %v3042_v15 = vpop.f32.mrb[36].mxu1 }
 0x603   : > { %v2227_v16 = vadd.f32 %v3042_v15, %v4603_v7  ;;  %v2218_v17 = vpop.f32.mrb[37].mxu1 }
 0x604   : > { %v2219_v18 = vadd.f32 %v4603_v7, %v2218_v17  ;;  %v3043_v19 = vpop.f32.mrb[38].mxu1 }
 0x605   : > { %2335 = vst [vmem:[%s4451_s6 + $0x30] sm:$0xff] %v2227_v16  ;;  %v2230_v20 = vadd.f32 %v3043_v19, %v4603_v7  ;;  %v2221_v22 = vpop.f32.mrb[39].mxu1 }
 0x606   : > { %2333 = vst [vmem:[%s4451_s6 + $0x20] sm:$0xff] %v2219_v18  ;;  %v2222_v23 = vadd.f32 %v4603_v7, %v2221_v22 }
 0x607   : > { %2336 = vst [vmem:[%s4451_s6 + $0x38] sm:$0xff] %v2230_v20 }
 0x608   : > { %2334 = vst [vmem:[%s4451_s6 + $0x28] sm:$0xff] %v2222_v23 }
 0x612   : > { %v3046_v24 = vpop.f32.mrb[40].mxu1 }
 0x613   : > { %v2243_v25 = vadd.f32 %v3046_v24, %v4603_v7  ;;  %v2234_v26 = vpop.f32.mrb[41].mxu1 }
 0x614   : > { %v2235_v27 = vadd.f32 %v4603_v7, %v2234_v26  ;;  %v3047_v29 = vpop.f32.mrb[42].mxu1 }
 0x615   : > { %2339 = vst [vmem:[%s4451_s6 + $0x50] sm:$0xff] %v2243_v25  ;;  %v2246_v30 = vadd.f32 %v3047_v29, %v4603_v7  ;;  %v2237_v31 = vpop.f32.mrb[43].mxu1 }
 0x616   : > { %2337 = vst [vmem:[%s4451_s6 + $0x40] sm:$0xff] %v2235_v27  ;;  %v2238_v28 = vadd.f32 %v4603_v7, %v2237_v31 }
 0x617   : > { %2340 = vst [vmem:[%s4451_s6 + $0x58] sm:$0xff] %v2246_v30 }
 0x618   : > { %2338 = vst [vmem:[%s4451_s6 + $0x48] sm:$0xff] %v2238_v28 }
 0x622   : > { %v3050_v32 = vpop.f32.mrb[44].mxu1 }
 0x623   : > { %v2259_v33 = vadd.f32 %v3050_v32, %v4603_v7  ;;  %v2250_v34 = vpop.f32.mrb[45].mxu1 }
 0x624   : > { %v2251_v35 = vadd.f32 %v4603_v7, %v2250_v34  ;;  %v3051_v36 = vpop.f32.mrb[46].mxu1 }
 0x625   : > { %2343 = vst [vmem:[%s4451_s6 + $0x70] sm:$0xff] %v2259_v33  ;;  %v2262_v37 = vadd.f32 %v3051_v36, %v4603_v7  ;;  %v2253_v38 = vpop.f32.mrb[47].mxu1 }
 0x626   : > { %2341 = vst [vmem:[%s4451_s6 + $0x60] sm:$0xff] %v2251_v35  ;;  %v2254_v39 = vadd.f32 %v4603_v7, %v2253_v38 }
 0x627   : > { %2344 = vst [vmem:[%s4451_s6 + $0x78] sm:$0xff] %v2262_v37 }
 0x628   : > { %2342 = vst [vmem:[%s4451_s6 + $0x68] sm:$0xff] %v2254_v39 }
 0x632   : > { %v3054_v40 = vpop.f32.mrb[48].mxu1 }
 0x633   : > { %v2275_v41 = vadd.f32 %v3054_v40, %v4603_v7  ;;  %v2266_v42 = vpop.f32.mrb[49].mxu1 }
 0x634   : > { %v2267_v43 = vadd.f32 %v4603_v7, %v2266_v42  ;;  %v3055_v44 = vpop.f32.mrb[50].mxu1 }
 0x635   : > { %2347 = vst [vmem:[%s4451_s6 + $0x90] sm:$0xff] %v2275_v41  ;;  %v2278_v45 = vadd.f32 %v3055_v44, %v4603_v7  ;;  %v2269_v46 = vpop.f32.mrb[51].mxu1 }
 0x636   : > { %2345 = vst [vmem:[%s4451_s6 + $0x80] sm:$0xff] %v2267_v43  ;;  %v2270_v47 = vadd.f32 %v4603_v7, %v2269_v46 }
 0x637   : > { %2348 = vst [vmem:[%s4451_s6 + $0x98] sm:$0xff] %v2278_v45 }
 0x638   : > { %2346 = vst [vmem:[%s4451_s6 + $0x88] sm:$0xff] %v2270_v47 }
 0x642   : > { %v3058_v48 = vpop.f32.mrb[52].mxu1 }
 0x643   : > { %v2291_v49 = vadd.f32 %v3058_v48, %v4603_v7  ;;  %v2282_v50 = vpop.f32.mrb[53].mxu1 }
 0x644   : > { %v2283_v51 = vadd.f32 %v4603_v7, %v2282_v50  ;;  %v3059_v52 = vpop.f32.mrb[54].mxu1 }
 0x645   : > { %2351 = vst [vmem:[%s4451_s6 + $0xb0] sm:$0xff] %v2291_v49  ;;  %v2294_v53 = vadd.f32 %v3059_v52, %v4603_v7  ;;  %v2285_v54 = vpop.f32.mrb[55].mxu1 }
 0x646   : > { %2349 = vst [vmem:[%s4451_s6 + $0xa0] sm:$0xff] %v2283_v51  ;;  %v2286_v55 = vadd.f32 %v4603_v7, %v2285_v54 }
 0x647   : > { %2352 = vst [vmem:[%s4451_s6 + $0xb8] sm:$0xff] %v2294_v53 }
 0x648   : > { %2350 = vst [vmem:[%s4451_s6 + $0xa8] sm:$0xff] %v2286_v55 }
 0x652   : > { %v3062_v56 = vpop.f32.mrb[56].mxu1 }
 0x653   : > { %v2307_v57 = vadd.f32 %v3062_v56, %v4603_v7  ;;  %v2298_v58 = vpop.f32.mrb[57].mxu1 }
 0x654   : > { %v2299_v59 = vadd.f32 %v4603_v7, %v2298_v58  ;;  %v3063_v60 = vpop.f32.mrb[58].mxu1 }
 0x655   : > { %2355 = vst [vmem:[%s4451_s6 + $0xd0] sm:$0xff] %v2307_v57  ;;  %v2310_v61 = vadd.f32 %v3063_v60, %v4603_v7  ;;  %v2301_v62 = vpop.f32.mrb[59].mxu1 }
 0x656   : > { %2353 = vst [vmem:[%s4451_s6 + $0xc0] sm:$0xff] %v2299_v59  ;;  %v2302_v63 = vadd.f32 %v4603_v7, %v2301_v62 }
 0x657   : > { %2356 = vst [vmem:[%s4451_s6 + $0xd8] sm:$0xff] %v2310_v61 }
 0x658   : > { %2354 = vst [vmem:[%s4451_s6 + $0xc8] sm:$0xff] %v2302_v63 }
 0x662   : > { %v3066_v0 = vpop.f32.mrb[60].mxu1 }
 0x663   : > { %v2323_v1 = vadd.f32 %v3066_v0, %v4603_v7  ;;  %v2314_v2 = vpop.f32.mrb[61].mxu1 }
 0x664   : > { %v2315_v3 = vadd.f32 %v4603_v7, %v2314_v2  ;;  %v3067_v4 = vpop.f32.mrb[62].mxu1 }
 0x665   : > { %2359 = vst [vmem:[%s4451_s6 + $0xf0] sm:$0xff] %v2323_v1  ;;  %v2326_v5 = vadd.f32 %v3067_v4, %v4603_v7  ;;  %v2317_v6 = vpop.f32.mrb[63].mxu1 }
 0x666   : > { %2357 = vst [vmem:[%s4451_s6 + $0xe0] sm:$0xff] %v2315_v3  ;;  %v2318_v8 = vadd.f32 %v4603_v7, %v2317_v6 }
 0x667   : > { %2360 = vst [vmem:[%s4451_s6 + $0xf8] sm:$0xff] %v2326_v5 }
 0x668   : > { %2358 = vst [vmem:[%s4451_s6 + $0xe8] sm:$0xff] %v2318_v8 }
 0x669 PF: > { %s4875_s5 = sld [smem:[#allocation36_spill]]  ;;  %s4876_s29 = sld [smem:[#allocation52_spill]] }
 0x66a   : > { %s2375_s3 = sshll.u32 %s4451_s6, 4  ;;  %s2362_s12 = scalar_lea.sflag [#allocation5], %s4419_s10  ;;  %s4676_s3 = int_to_ptr.vmem [resolvable:$true] %s2375_s3 }
 0x66b   : > { %s3651_s16 = scalar_lea.vmem %s4676_s3, 4096  ;;  %p4877_p0 = scmp.ne.s32.totalorder %s4850_s14, 0 }
 0x66c   : > { %p3652_p7 = scmp.ne.s32.totalorder %s4676_s3, %s3651_s16  ;;  %s3846_s20 = smov [#allocation20]  }
 0x66d   : > { %s3655_s0 = sshll.u32 %s3846_s20, 4  ;;  %s3656_s0 = int_to_ptr.vmem [resolvable:$false] %s3655_s0 }
 0x66e   : > { %p3653_p5 = pnand %p3652_p7, %p4877_p0  ;;  %s3657_s8 = scalar_lea.vmem %s3656_s0, 8192 }
 0x66f   : > { %s2699_s9 = sshll.u32 %s4875_s5, 12  ;;  %p3658_p12 = scmp.lt.s32.totalorder %s4676_s3, %s3656_s0 }
 0x670   : > { %s4673_s19 = scalar_lea.hbm %s4876_s29, %s2699_s9  ;;  %p3654_p1 = pneg %p3653_p5 }
 0x671   : > { %p3659_p11 = scmp.lt.s32.totalorder %s3657_s8, %s3651_s16 }
 0x673   : > { %p3660_p3 = por %p3659_p11, %p3658_p12 }
 0x675   : > { %p3661_p9 = pnand %p3660_p3, %p3654_p1 }
 0x677   : > { %3664 = shalt.err (!%p3661_p9)
}
 0x678   : > { %s3665_s15 = scalar_lea.hbm %s4673_s19, 4096  ;;  %s3669_s24 = scalar_lea.hbm %s4876_s29, 8192 }
 0x679   : > { %p3666_p10 = scmp.ne.s32.totalorder %s4673_s19, %s3665_s15  ;;  %p3670_p4 = scmp.lt.u32.totalorder %s4673_s19, %s4876_s29 }
 0x67a   : > { %p3671_p6 = scmp.lt.u32.totalorder %s3669_s24, %s3665_s15  ;;  %p3673_p7 = scmp.lt.u32.totalorder %s3665_s15, %s4673_s19 }
 0x67b   : > { %p3667_p8 = pnand %p3666_p10, %p4877_p0 }
 0x67c   : > { %p3672_p2 = por %p3671_p6, %p3670_p4 }
 0x67d   : > { %p3668_p13 = pneg %p3667_p8 }
 0x67e   : > { %p3674_p5 = por %p3673_p7, %p3672_p2 }
 0x680   : > { %p3675_p1 = pnand %p3674_p5, %p3668_p13 }
 0x682   : > { %3678 = shalt.err (!%p3675_p1)
}
 0x683   : > { %s3847_s30 = smov 128   ;;  %s3848_s27 = smov 8  }
 0x684   : > { %3116 = dma.vmem_to_hbm [thread:$0]  (%p4877_p0), %s4676_s3, 4096, %s4673_s19, %s2362_s12, %s3847_s30, %s3847_s30, %s3848_s27  }
 0x685 PF: > { %s4878_s5 = sld [smem:[#allocation30_spill]]  ;;  %p3167_p12 = scmp.ge.s32.totalorder %s3825_s26, 2 }
 0x686   : > { %p4879_p11 = scmp.ne.s32.totalorder %s4851_s4, 0 }
 0x688   : > { %p3151_p3 = pnand %p3167_p12, %p4879_p11 }
 0x68b   : > { %s2390_s9 = sand.u32 1, %s4878_s5  }
 0x68c   : > { %s2391_s13 = scalar_lea.sflag [#allocation5], %s2390_s9 }
 0x68d   : > { %3768 = dma.done.wait (!%p3151_p3), %s2391_s13, 4096  }
 0x68e   : > { %3770 = vsyncadd (!%p3151_p3), %s2391_s13, 4294963200  ;;  %s35_s26 = sadd.s32 1, %s3825_s26   ;;  %s4881_s13 = sld [smem:[#allocation31_spill]] }
 0x68f   : > { %p4707_p9 = scmp.ge.s32.totalorder %s35_s26, 6   ;;  %s4882_s14 = sld [smem:[#allocation32_spill]] }
 0x690   : > { %s4883_s10 = sld [smem:[#allocation41_spill]]  ;;  %s4884_s19 = sld [smem:[#allocation34_spill]] }
 0x691   : > { %s4885_s22 = sld [smem:[#allocation37_spill]]  ;;  %s4886_s24 = sld [smem:[#allocation39_spill]] }
 0x692   : > { %s4887_s4 = sld [smem:[#allocation40_spill]]  ;;  %s4888_s15 = smov %s4295_s7 }
 0x693   : > { %s4889_s16 = smov %s3789_s17  ;;  %s4890_s17 = smov %s3793_s18 }
 0x694   : > { %s4892_s20 = smov %s3805_s21  ;;  %s4893_s21 = smov %s4232_s11 }
 0x695   : > { %s4894_s23 = smov %s3821_s25  ;;  %34 = sbr.rel (!%p4707_p9) target bundleno = 29 (0x1d), region = 174 }
 0x696   : > { %s4891_s18 = smov %s4883_s10 }
 0x698   : > { %s4895_s25 = smov %s4887_s4 }
 0x69c   :  { %2396 = vsyncpa [#allocation4], 1 }
 0x69d   :  { %2398 = vsyncpa [#allocation4 + $0x1], 1 }
 0x69e   :  { %2399 = vsyncpa [#allocation7], 1 }
 0x69f   :  { %2401 = vsyncpa [#allocation7 + $0x1], 1 }
 0x6a0   :  { %2402 = vsyncpa [#allocation10], 1 }
 0x6a1   :  { %2404 = vsyncpa [#allocation10 + $0x1], 1 }
 0x6a2   :  { %2405 = vsyncpa [#allocation13], 1 }
 0x6a3   :  { %2406 = vsyncpa [#allocation16], 1 }
 0x6a4   :  { %2407 = vsyncpa [#allocation19], 1 }
 0x6a5   :  { %2408 = vsyncpa [#allocation5], 1 }
 0x6a6   :  { %2410 = vsyncpa [#allocation5 + $0x1], 1 }

// kernel: tpu_custom_call.1
= control target key start
LH: loop header
LB: loop body
LE: loop exit
PB: predicated region body
PF: predicated region fallthrough
CT: control target
= control target key end

     0   :  { %s4754_s0 = inlined_call_operand.hbm [shape: s8[512,512], index: 0, kind: input, shape index: {}]   ;;  %s4755_s1 = inlined_call_operand.hbm [shape: bf16[512,128], index: 1, kind: input, shape index: {}]   ;;  %s4756_s2 = inlined_call_operand.hbm [shape: bf16[512,128], index: 2, kind: input, shape index: {}]   ;;  %s4757_s3 = inlined_call_operand.hbm [shape: f32[512,1], index: 3, kind: input, shape index: {}]   ;;  %s4758_s4 = inlined_call_operand.hbm [shape: bf16[256,128], index: 4, kind: input, shape index: {}]   ;;  %s4759_s5 = inlined_call_operand.hbm [shape: f32[1,128], index: 5, kind: input, shape index: {}]   ;;  %s4760_s6 = inlined_call_operand.hbm [shape: bf16[128,128], index: 6, kind: input, shape index: {}]   ;;  %s4761_s7 = inlined_call_operand.hbm [shape: f32[1,128], index: 7, kind: input, shape index: {}]   ;;  %s4762_s8 = inlined_call_operand.hbm [shape: bf16[128,128], index: 8, kind: input, shape index: {}]   ;;  %s4763_s9 = inlined_call_operand.hbm [shape: f32[1,128], index: 9, kind: input, shape index: {}]   ;;  %s4764_s10 = inlined_call_operand.hbm [shape: f32[512,128], index: 10, kind: output, shape index: {}]  }
   0x1   :  { %4792 = sst [smem:[#allocation42_spill]] %s4754_s0 }
   0x2   :  { %4793 = sst [smem:[#allocation43_spill]] %s4755_s1 }
   0x3   :  { %4794 = sst [smem:[#allocation44_spill]] %s4756_s2 }
   0x4   :  { %4795 = sst [smem:[#allocation45_spill]] %s4757_s3 }
   0x5   :  { %4796 = sst [smem:[#allocation46_spill]] %s4758_s4 }
   0x6   :  { %4797 = sst [smem:[#allocation47_spill]] %s4759_s5 }
   0x7   :  { %4798 = sst [smem:[#allocation48_spill]] %s4760_s6 }
   0x8   :  { %4799 = sst [smem:[#allocation49_spill]] %s4761_s7 }
   0x9   :  { %4800 = sst [smem:[#allocation50_spill]] %s4762_s8 }
   0xa   :  { %4801 = sst [smem:[#allocation51_spill]] %s4763_s9 }
   0xb   :  { %4802 = sst [smem:[#allocation52_spill]] %s4764_s10 }
   0xc   :  { %15 = vsyncpa [#allocation4], 0 }
   0xd   :  { %17 = vsyncpa [#allocation4 + $0x1], 0 }
   0xe   :  { %18 = vsyncpa [#allocation7], 0 }
   0xf   :  { %20 = vsyncpa [#allocation7 + $0x1], 0 }
  0x10   :  { %21 = vsyncpa [#allocation10], 0 }
  0x11   :  { %23 = vsyncpa [#allocation10 + $0x1], 0 }
  0x12   :  { %24 = vsyncpa [#allocation13], 0 }
  0x13   :  { %25 = vsyncpa [#allocation16], 0 }
  0x14   :  { %26 = vsyncpa [#allocation19], 0 }
  0x15   :  { %27 = vsyncpa [#allocation5], 0 }
  0x16   :  { %29 = vsyncpa [#allocation5 + $0x1], 0  ;;  %s3904_s13 = smov 0   ;;  %s3906_s14 = smov 0  }
  0x17   :  { %s3908_s15 = smov 0   ;;  %s3910_s16 = smov 0  }
  0x18   :  { %s3912_s17 = smov 0   ;;  %s3914_s18 = smov 0  }
  0x19   :  { %s3916_s19 = smov 0   ;;  %s3918_s20 = smov 0  }
  0x1a   :  { %s3920_s21 = smov 0   ;;  %s3922_s22 = smov 0  }
  0x1b   :  { %s3924_s23 = smov 0   ;;  %s3926_s24 = smov 0  }
  0x1c   :  { %s3928_s25 = smov 0   ;;  %s3930_s26 = smov 0  }
  0x1d LB: > { %4803 = sst [smem:[#allocation30_spill]] %s3773_s13  ;;  %s3975_s27 = sadd.s32 4294967295, %s3825_s26   ;;  %s3825_s26 = sphi %s3930_s26, %s35_s26   ;;  %s3821_s25 = sphi %s3928_s25, %s4895_s25   ;;  %s3817_s24 = sphi %s3926_s24, %s4886_s24   ;;  %s3813_s23 = sphi %s3924_s23, %s4894_s23   ;;  %s3809_s22 = sphi %s3922_s22, %s4885_s22   ;;  %s3805_s21 = sphi %s3920_s21, %s4893_s21   ;;  %s3801_s20 = sphi %s3918_s20, %s4892_s20   ;;  %s3797_s19 = sphi %s3916_s19, %s4884_s19   ;;  %s3793_s18 = sphi %s3914_s18, %s4891_s18   ;;  %s3789_s17 = sphi %s3912_s17, %s4890_s17   ;;  %s3785_s16 = sphi %s3910_s16, %s4889_s16   ;;  %s3781_s15 = sphi %s3908_s15, %s4888_s15   ;;  %s3777_s14 = sphi %s3906_s14, %s4882_s14   ;;  %s3773_s13 = sphi %s3904_s13, %s4881_s13  }
  0x1e   : > { %4804 = sst [smem:[#allocation31_spill]] %s3777_s14  ;;  %p2587_p0 = scmp.ge.s32.totalorder %s3825_s26, 1 }
  0x1f   : > { %4805 = sst [smem:[#allocation32_spill]] %s3781_s15  ;;  %p4773_p1 = scmp.eq.s32.totalorder %s3975_s27, 0 }
  0x20   : > { %4806 = sst [smem:[#allocation33_spill]] %s3797_s19  ;;  %p310_p2 = scmp.lt.s32.totalorder %s3825_s26, 5 }
  0x21   : > { %4807 = sst [smem:[#allocation34_spill]] %s3801_s20  ;;  %s3827_s29 = smov [#allocation11]  }
  0x22   : > { %4808 = sst [smem:[#allocation35_spill]] %s3809_s22  ;;  %p3980_p3 = pnand %p2587_p0, %p310_p2 }
  0x23   : > { %4809 = sst [smem:[#allocation36_spill]] %s3813_s23  ;;  %s322_s30 = sshll.u32 %s3827_s29, 4  ;;  %s3984_s30 = int_to_ptr.vmem [resolvable:$true] %s322_s30 }
  0x24   : > { %4810 = sst [smem:[#allocation37_spill]] %s3817_s24  ;;  %p3118_p4 = pneg %p3980_p3 }
  0x25   : > { %s4811_s28 = scalar_select %p3980_p3, 1, 0 }
  0x26   : > { %p3990_p5 = pnand %p3118_p4, %p4773_p1  ;;  %s3828_s12 = smov [#allocation12]  }
  0x27   : > { %4812 = sst [smem:[#allocation38_spill]] %s4811_s28  ;;  %s336_s10 = sshll.u32 %s3828_s12, 4  ;;  %s3994_s10 = int_to_ptr.vmem [resolvable:$true] %s336_s10 }
  0x28   : > { %s4813_s11 = scalar_select %p3990_p5, 1, 0 }
  0x29   : > { %s3829_s23 = smov [#allocation15]   ;;  %s4814_s4 = sld [smem:[#allocation46_spill]] }
  0x2a   : > { %s3996_s22 = sshll.u32 %s3829_s23, 4  ;;  %p4006_p7 = pneg %p3990_p5  ;;  %s361_s22 = int_to_ptr.vmem [resolvable:$true] %s3996_s22 }
  0x2f   : > { %s3363_s29 = scalar_lea.hbm %s4814_s4, 2048 }
  0x30   : > { %p3364_p6 = scmp.ne.s32.totalorder %s4814_s4, %s3363_s29  ;;  %p3370_p10 = scmp.lt.u32.totalorder %s3363_s29, %s4814_s4 }
  0x32   : > { %p3366_p8 = pnand %p4006_p7, %p3364_p6 }
  0x34   : > { %p3367_p9 = pneg %p3366_p8 }
  0x36   : > { %p3372_p11 = pnand %p3370_p10, %p3367_p9 }
  0x38   : > { %3375 = shalt.err (!%p3372_p11)
}
  0x39   : > { %s3376_s2 = scalar_lea.vmem %s3984_s30, 2048  ;;  %p3384_p2 = scmp.lt.s32.totalorder %s3984_s30, %s3984_s30 }
  0x3a   : > { %p3377_p12 = scmp.ne.s32.totalorder %s3984_s30, %s3376_s2  ;;  %p3385_p4 = scmp.lt.s32.totalorder %s3376_s2, %s3376_s2 }
  0x3c   : > { %p3379_p13 = pnand %p3377_p12, %p4006_p7  ;;  %p3386_p6 = por %p3385_p4, %p3384_p2 }
  0x3e   : > { %p3380_p0 = pneg %p3379_p13 }
  0x40   : > { %p3387_p8 = pnand %p3386_p6, %p3380_p0 }
  0x42   : > { %3390 = shalt.err (!%p3387_p8)
}
  0x43   : > { %s4775_s3 = smov 64   ;;  %s4777_s13 = smov 4  }
  0x44   : > { %3121 = dma.hbm_to_vmem [thread:$0]  (!%p3990_p5), %s4814_s4, 2048, %s3984_s30, [#allocation10], %s4775_s3, %s4775_s3, %s4777_s13  }
  0x45   : > { %s4816_s5 = sld [smem:[#allocation47_spill]] }
  0x4b   : > { %s3391_s2 = scalar_lea.hbm %s4816_s5, 16 }
  0x4c   : > { %p3392_p9 = scmp.ne.s32.totalorder %s4816_s5, %s3391_s2  ;;  %p3398_p12 = scmp.lt.u32.totalorder %s3391_s2, %s4816_s5 }
  0x4e   : > { %p3394_p10 = pnand %p3392_p9, %p4006_p7 }
  0x50   : > { %p3395_p11 = pneg %p3394_p10 }
  0x52   : > { %p3400_p13 = pnand %p3398_p12, %p3395_p11 }
  0x54   : > { %3403 = shalt.err (!%p3400_p13)
}
  0x55   : > { %s3404_s30 = scalar_lea.vmem %s3994_s10, 16  ;;  %s3411_s0 = scalar_lea.vmem %s3994_s10, 32 }
  0x56   : > { %p3405_p0 = scmp.ne.s32.totalorder %s3994_s10, %s3404_s30  ;;  %p3412_p6 = scmp.lt.s32.totalorder %s3994_s10, %s3994_s10 }
  0x57   : > { %p3413_p8 = scmp.lt.s32.totalorder %s3411_s0, %s3404_s30 }
  0x58   : > { %p3407_p2 = pnand %p3405_p0, %p4006_p7 }
  0x59   : > { %p3414_p9 = por %p3413_p8, %p3412_p6 }
  0x5a   : > { %p3408_p4 = pneg %p3407_p2 }
  0x5c   : > { %p3415_p10 = pnand %p3414_p9, %p3408_p4 }
  0x5e   : > { %3418 = shalt.err (!%p3415_p10)
}
  0x5f   : > { %3124 = dma.hbm_to_vmem [thread:$0]  (!%p3990_p5), %s4816_s5, 16, %s3994_s10, [#allocation13]  }
  0x60   : > { %s4817_s7 = sld [smem:[#allocation49_spill]] }
  0x66   : > { %s3419_s29 = scalar_lea.hbm %s4817_s7, 16 }
  0x67   : > { %p3420_p11 = scmp.ne.s32.totalorder %s4817_s7, %s3419_s29  ;;  %p3426_p0 = scmp.lt.u32.totalorder %s3419_s29, %s4817_s7 }
  0x69   : > { %p3422_p12 = pnand %p3420_p11, %p4006_p7 }
  0x6b   : > { %p3423_p13 = pneg %p3422_p12 }
  0x6d   : > { %p3428_p2 = pnand %p3426_p0, %p3423_p13 }
  0x6f   : > { %3431 = shalt.err (!%p3428_p2)
}
  0x70   : > { %s3432_s0 = scalar_lea.vmem %s361_s22, 16  ;;  %s3439_s10 = scalar_lea.vmem %s361_s22, 32 }
  0x71   : > { %p3433_p4 = scmp.ne.s32.totalorder %s361_s22, %s3432_s0  ;;  %p3440_p9 = scmp.lt.s32.totalorder %s361_s22, %s361_s22 }
  0x72   : > { %p3441_p10 = scmp.lt.s32.totalorder %s3439_s10, %s3432_s0 }
  0x73   : > { %p3435_p6 = pnand %p3433_p4, %p4006_p7 }
  0x74   : > { %p3442_p1 = por %p3441_p10, %p3440_p9 }
  0x75   : > { %p3436_p8 = pneg %p3435_p6 }
  0x77   : > { %p3443_p3 = pnand %p3442_p1, %p3436_p8 }
  0x79   : > { %3446 = shalt.err (!%p3443_p3)
}
  0x7a   : > { %3130 = dma.hbm_to_vmem [thread:$0]  (!%p3990_p5), %s4817_s7, 16, %s361_s22, [#allocation16]  }
  0x7b   : > { %s44_s20 = sadd.s32 1, %s3817_s24  ;;  %s47_s28 = sadd.s32 1, %s3821_s25 }
  0x7c   : > { %p45_p1 = scmp.ge.s32.totalorder %s44_s20, 2  ;;  %p4781_p3 = scmp.eq.s32.totalorder %s3825_s26, 0 }
  0x7d   : > { %s82_s29 = sadd.s32 1, %s3793_s18  ;;  %p89_p11 = scmp.ne.s32.totalorder %s3793_s18, %s3789_s17 }
  0x7e   : > { %s4897_s20 = smov (%p45_p1, %s44_s20), 0  ;;  %s4899_s28 = smov (!%p45_p1, %s47_s28), %s3821_s25 }
  0x7f   : > { %4818 = sst [smem:[#allocation39_spill]] %s4897_s20  ;;  %s52_s12 = ssub.s32 %s3817_s24, %s4897_s20 }
  0x80   : > { %p49_p12 = scmp.ge.s32.totalorder %s4899_s28, 2  ;;  %p80_p13 = scmp.eq.s32.totalorder %s52_s12, 0 }
  0x81   : > { %p4086_p0 = por %p89_p11, %p4781_p3  ;;  %p95_p2 = scmp.ne.s32.totalorder %s3789_s17, %s3785_s16 }
  0x82   : > { %s4901_s28 = smov (%p49_p12, %s4899_s28), 0  ;;  %p4822_p4 = scmp.eq.s32.totalorder %s3975_s27, 0 }
  0x83   : > { %4820 = sst [smem:[#allocation40_spill]] %s4901_s28  ;;  %s4099_s2 = ssub.s32 %s3821_s25, %s4901_s28 }
  0x84   : > { %s4095_s23 = scalar_select %p80_p13, %s3793_s18, %s82_s29  }
  0x85   : > { %p4103_p6 = por %p95_p2, %p4822_p4  ;;  %s53_s0 = sor.u32 %s52_s12, %s4099_s2 }
  0x86   : > { %4821 = sst [smem:[#allocation41_spill]] %s4095_s23  ;;  %p4109_p9 = scmp.eq.s32.totalorder %s53_s0, 0 }
  0x87   : > { %s4823_s30 = scalar_select %p4103_p6, 1, 0 }
  0x88   : > { %s4824_s16 = scalar_select %p4109_p9, 1, 0 }
  0x89   : > { %p4780_p10 = scmp.lt.s32.totalorder %s3825_s26, 4  ;;  %s4785_s10 = sand.u32 1, %s3825_s26  }
  0x8a   : > { %s421_s15 = sand.u32 1, %s3793_s18   ;;  %s2696_s29 = sshll.u32 %s3817_s24, 11 }
  0x8b   : > { %s2600_s19 = sshll.u32 %s421_s15, 7  ;;  %s4825_s1 = sld [smem:[#allocation43_spill]] }
  0x8c   : > { %s423_s5 = scalar_lea.vmem [#allocation6], %s2600_s19  ;;  %p4128_p1 = pnand %p4780_p10, %p4086_p0 }
  0x8d   : > { %s430_s12 = sshll.u32 %s423_s5, 4  ;;  %s3832_s15 = smov [#allocation14]   ;;  %s4122_s12 = int_to_ptr.vmem [resolvable:$true] %s430_s12 }
  0x8e   : > { %s4132_s3 = sshll.u32 %s3832_s15, 4  ;;  %s4136_s13 = scalar_lea.sflag [#allocation7], %s4785_s10  ;;  %s347_s3 = int_to_ptr.vmem [resolvable:$true] %s4132_s3 }
  0x8f   : > { %p3449_p12 = pneg %p4128_p1 }
  0x91   : > { %s4120_s4 = scalar_lea.hbm %s4825_s1, %s2696_s29  ;;  %s3452_s19 = scalar_lea.hbm %s4825_s1, 4096 }
  0x92   : > { %s3447_s29 = scalar_lea.hbm %s4120_s4, 2048  ;;  %p3453_p0 = scmp.lt.u32.totalorder %s4120_s4, %s4825_s1 }
  0x93   : > { %p3448_p11 = scmp.ne.s32.totalorder %s4120_s4, %s3447_s29  ;;  %p3454_p4 = scmp.lt.u32.totalorder %s3452_s19, %s3447_s29 }
  0x94   : > { %p3456_p10 = scmp.lt.u32.totalorder %s3447_s29, %s4120_s4 }
  0x95   : > { %p3450_p13 = pnand %p3449_p12, %p3448_p11  ;;  %p3455_p8 = por %p3454_p4, %p3453_p0 }
  0x97   : > { %p3451_p2 = pneg %p3450_p13  ;;  %p3457_p3 = por %p3456_p10, %p3455_p8 }
  0x99   : > { %p3458_p6 = pnand %p3457_p3, %p3451_p2 }
  0x9b   : > { %3461 = shalt.err (!%p3458_p6)
}
  0x9c   : > { %s3462_s15 = scalar_lea.vmem %s4122_s12, 2048  ;;  %s3833_s5 = smov [#allocation6]  }
  0x9d   : > { %p3463_p11 = scmp.ne.s32.totalorder %s4122_s12, %s3462_s15  ;;  %s3467_s22 = sshll.u32 %s3833_s5, 4  ;;  %s3468_s22 = int_to_ptr.vmem [resolvable:$false] %s3467_s22 }
  0x9e   : > { %s3469_s7 = scalar_lea.vmem %s3468_s22, 4096  ;;  %p3470_p5 = scmp.lt.s32.totalorder %s4122_s12, %s3468_s22 }
  0x9f   : > { %p3465_p13 = pnand %p3463_p11, %p3449_p12  ;;  %p3471_p0 = scmp.lt.s32.totalorder %s3469_s7, %s3462_s15 }
  0xa1   : > { %p3466_p9 = pneg %p3465_p13  ;;  %p3472_p4 = por %p3471_p0, %p3470_p5 }
  0xa3   : > { %p3473_p8 = pnand %p3472_p4, %p3466_p9 }
  0xa5   : > { %3476 = shalt.err (!%p3473_p8)
}
  0xa6   : > { %s4827_s28 = smov 4   ;;  %s4828_s29 = smov 64  }
  0xa7   : > { %3143 = dma.hbm_to_vmem [thread:$0]  (!%p4128_p1), %s4120_s4, 2048, %s4122_s12, %s4136_s13, %s4828_s29, %s4828_s29, %s4827_s28  }
  0xa8   : > { %s4829_s6 = sld [smem:[#allocation48_spill]] }
  0xae   : > { %s3477_s22 = scalar_lea.hbm %s4829_s6, 1024 }
  0xaf   : > { %p3478_p5 = scmp.ne.s32.totalorder %s4829_s6, %s3477_s22  ;;  %p3484_p9 = scmp.lt.u32.totalorder %s3477_s22, %s4829_s6 }
  0xb1   : > { %p3480_p3 = pnand %p3478_p5, %p4006_p7 }
  0xb3   : > { %p3481_p6 = pneg %p3480_p3 }
  0xb5   : > { %p3486_p10 = pnand %p3484_p9, %p3481_p6 }
  0xb7   : > { %3489 = shalt.err (!%p3486_p10)
}
  0xb8   : > { %s3490_s1 = scalar_lea.vmem %s347_s3, 1024  ;;  %p3498_p11 = scmp.lt.s32.totalorder %s347_s3, %s347_s3 }
  0xb9   : > { %p3491_p1 = scmp.ne.s32.totalorder %s347_s3, %s3490_s1  ;;  %p3499_p13 = scmp.lt.s32.totalorder %s3490_s1, %s3490_s1 }
  0xbb   : > { %p3493_p12 = pnand %p3491_p1, %p4006_p7  ;;  %p3500_p0 = por %p3499_p13, %p3498_p11 }
  0xbd   : > { %p3494_p2 = pneg %p3493_p12 }
  0xbf   : > { %p3501_p4 = pnand %p3500_p0, %p3494_p2 }
  0xc1   : > { %3504 = shalt.err (!%p3501_p4)
}
  0xc2   : > { %p4830_p8 = scmp.ne.s32.totalorder %s4813_s11, 0  ;;  %s3834_s12 = smov [#allocation17]  }
  0xc3   : > { %s370_s19 = sshll.u32 %s3834_s12, 4  ;;  %s3835_s5 = smov [#allocation18]   ;;  %s371_s19 = int_to_ptr.vmem [resolvable:$true] %s370_s19 }
  0xc4   : > { %3127 = dma.hbm_to_vmem [thread:$0]  (!%p4830_p8), %s4829_s6, 1024, %s347_s3, [#allocation13], %s4828_s29, %s4828_s29, %s4827_s28  }
  0xc5   : > { %s384_s22 = sshll.u32 %s3835_s5, 4  ;;  %s4831_s8 = sld [smem:[#allocation50_spill]]  ;;  %s385_s22 = int_to_ptr.vmem [resolvable:$true] %s384_s22 }
  0xcb   : > { %s3505_s7 = scalar_lea.hbm %s4831_s8, 1024 }
  0xcc   : > { %p3506_p5 = scmp.ne.s32.totalorder %s4831_s8, %s3505_s7  ;;  %p3512_p9 = scmp.lt.u32.totalorder %s3505_s7, %s4831_s8 }
  0xce   : > { %p3508_p3 = pnand %p3506_p5, %p4006_p7 }
  0xd0   : > { %p3509_p6 = pneg %p3508_p3 }
  0xd2   : > { %p3514_p10 = pnand %p3512_p9, %p3509_p6 }
  0xd4   : > { %3517 = shalt.err (!%p3514_p10)
}
  0xd5   : > { %s3518_s3 = scalar_lea.vmem %s371_s19, 1024  ;;  %p3526_p11 = scmp.lt.s32.totalorder %s371_s19, %s371_s19 }
  0xd6   : > { %p3519_p1 = scmp.ne.s32.totalorder %s371_s19, %s3518_s3  ;;  %p3527_p13 = scmp.lt.s32.totalorder %s3518_s3, %s3518_s3 }
  0xd8   : > { %p3521_p12 = pnand %p3519_p1, %p4006_p7  ;;  %p3528_p0 = por %p3527_p13, %p3526_p11 }
  0xda   : > { %p3522_p2 = pneg %p3521_p12 }
  0xdc   : > { %p3529_p4 = pnand %p3528_p0, %p3522_p2 }
  0xde   : > { %3532 = shalt.err (!%p3529_p4)
}
  0xdf   : > { %3133 = dma.hbm_to_vmem [thread:$0]  (!%p4830_p8), %s4831_s8, 1024, %s371_s19, [#allocation16], %s4828_s29, %s4828_s29, %s4827_s28  }
  0xe0   : > { %s4832_s9 = sld [smem:[#allocation51_spill]] }
  0xe6   : > { %s3533_s5 = scalar_lea.hbm %s4832_s9, 16 }
  0xe7   : > { %p3534_p5 = scmp.ne.s32.totalorder %s4832_s9, %s3533_s5  ;;  %p3540_p9 = scmp.lt.u32.totalorder %s3533_s5, %s4832_s9 }
  0xe9   : > { %p3536_p3 = pnand %p3534_p5, %p4006_p7 }
  0xeb   : > { %p3537_p6 = pneg %p3536_p3 }
  0xed   : > { %p3542_p10 = pnand %p3540_p9, %p3537_p6 }
  0xef   : > { %3545 = shalt.err (!%p3542_p10)
}
  0xf0   : > { %s3546_s4 = scalar_lea.vmem %s385_s22, 16  ;;  %s3553_s19 = scalar_lea.vmem %s385_s22, 32 }
  0xf1   : > { %p3547_p1 = scmp.ne.s32.totalorder %s385_s22, %s3546_s4  ;;  %p3554_p11 = scmp.lt.s32.totalorder %s385_s22, %s385_s22 }
  0xf2   : > { %p3555_p13 = scmp.lt.s32.totalorder %s3553_s19, %s3546_s4 }
  0xf3   : > { %p3549_p12 = pnand %p3547_p1, %p4006_p7 }
  0xf4   : > { %p3556_p0 = por %p3555_p13, %p3554_p11 }
  0xf5   : > { %p3550_p2 = pneg %p3549_p12 }
  0xf7   : > { %p3557_p4 = pnand %p3556_p0, %p3550_p2 }
  0xf9   : > { %3560 = shalt.err (!%p3557_p4)
}
  0xfa   : > { %s4833_s23 = sld [smem:[#allocation34_spill]]  ;;  %s4834_s10 = sld [smem:[#allocation33_spill]] }
  0xfb   : > { %3136 = dma.hbm_to_vmem [thread:$0]  (!%p4830_p8), %s4832_s9, 16, %s385_s22, [#allocation19]  }
  0xfc   : > { %s56_s14 = sadd.s32 1, %s3805_s21  ;;  %p4835_p7 = scmp.ne.s32.totalorder %s4824_s16, 0 }
  0xfd   : > { %s395_s12 = sand.u32 1, %s3805_s21   ;;  %s2597_s5 = sshll.u32 %s3817_s24, 1 }
  0xfe   : > { %s4232_s11 = scalar_select %p4835_p7, %s3805_s21, %s56_s14  }
  0xff   : > { %p4836_p6 = scmp.eq.s32.totalorder %s3825_s26, 0  ;;  %p4837_p10 = scmp.eq.s32.totalorder %s3975_s27, 0 }
 0x100   : > { %p63_p5 = scmp.ne.s32.totalorder %s3805_s21, %s4833_s23  ;;  %p69_p3 = scmp.ne.s32.totalorder %s4833_s23, %s4834_s10 }
 0x101   : > { %s2595_s1 = sshll.u32 %s395_s12, 7  ;;  %s2695_s7 = sshll.u32 %s3821_s25, 5 }
 0x102   : > { %p65_p9 = por %p4836_p6, %p63_p5  ;;  %p4244_p1 = por %p4837_p10, %p69_p3 }
 0x103   : > { %s406_s0 = sadd.s32 %s2695_s7, %s2597_s5  ;;  %s399_s22 = scalar_lea.vmem [#allocation3], %s2595_s1 }
 0x104   : > { %s409_s4 = sshll.u32 %s399_s22, 4  ;;  %s2599_s16 = sshll.u32 %s406_s0, 7  ;;  %s4249_s4 = int_to_ptr.vmem [resolvable:$true] %s409_s4 }
 0x105   : > { %s4839_s20 = sld [smem:[#allocation42_spill]]  ;;  %p4841_p8 = scmp.lt.s32.totalorder %s3825_s26, 4 }
 0x106   : > { %s4262_s5 = scalar_lea.sflag [#allocation4], %s395_s12 }
 0x107   : > { %p4258_p12 = pnand %p4841_p8, %p65_p9 }
 0x109   : > { %p3563_p11 = pneg %p4258_p12 }
 0x10b   : > { %s4840_s10 = smov %s4839_s20  ;;  %s4254_s23 = scalar_lea.hbm %s4839_s20, %s2599_s16 }
 0x10c   : > { %s3561_s1 = scalar_lea.hbm %s4254_s23, 2048  ;;  %s3566_s22 = scalar_lea.hbm %s4840_s10, 8192 }
 0x10d   : > { %p3562_p2 = scmp.ne.s32.totalorder %s4254_s23, %s3561_s1  ;;  %p3567_p4 = scmp.lt.u32.totalorder %s4254_s23, %s4840_s10 }
 0x10e   : > { %p3568_p7 = scmp.lt.u32.totalorder %s3566_s22, %s3561_s1  ;;  %p3570_p3 = scmp.lt.u32.totalorder %s3561_s1, %s4254_s23 }
 0x10f   : > { %p3564_p13 = pnand %p3563_p11, %p3562_p2 }
 0x110   : > { %p3569_p5 = por %p3568_p7, %p3567_p4 }
 0x111   : > { %p3565_p0 = pneg %p3564_p13 }
 0x112   : > { %p3571_p6 = por %p3570_p3, %p3569_p5 }
 0x114   : > { %p3572_p9 = pnand %p3571_p6, %p3565_p0 }
 0x116   : > { %3575 = shalt.err (!%p3572_p9)
}
 0x117   : > { %s3576_s12 = scalar_lea.vmem %s4249_s4, 2048  ;;  %s3836_s3 = smov [#allocation3]  }
 0x118   : > { %p3577_p10 = scmp.ne.s32.totalorder %s4249_s4, %s3576_s12  ;;  %s3581_s20 = sshll.u32 %s3836_s3, 4  ;;  %s3582_s20 = int_to_ptr.vmem [resolvable:$false] %s3581_s20 }
 0x119   : > { %s3583_s7 = scalar_lea.vmem %s3582_s20, 4096  ;;  %p3584_p13 = scmp.lt.s32.totalorder %s4249_s4, %s3582_s20 }
 0x11a   : > { %p3579_p8 = pnand %p3577_p10, %p3563_p11  ;;  %p3585_p4 = scmp.lt.s32.totalorder %s3583_s7, %s3576_s12 }
 0x11c   : > { %p3580_p2 = pneg %p3579_p8  ;;  %p3586_p7 = por %p3585_p4, %p3584_p13 }
 0x11e   : > { %p3587_p5 = pnand %p3586_p7, %p3580_p2 }
 0x120   : > { %3590 = shalt.err (!%p3587_p5)
}
 0x121   : > { %s3837_s1 = smov 512   ;;  %s4843_s0 = sld [smem:[#allocation32_spill]] }
 0x122   : > { %s4844_s22 = sld [smem:[#allocation31_spill]]  ;;  %s4845_s16 = sld [smem:[#allocation30_spill]] }
 0x123   : > { %s3838_s19 = smov 256   ;;  %s3839_s12 = smov 16  }
 0x124   : > { %3140 = dma.hbm_to_vmem [thread:$0]  (!%p4258_p12), %s4254_s23, 2048, %s4249_s4, %s4262_s5, %s3837_s1, %s3838_s19, %s3839_s12  }
 0x125   : > { %s2586_s3 = sadd.s32 4294967294, %s3825_s26   ;;  %p4846_p11 = scmp.eq.s32.totalorder %s4099_s2, 0 }
 0x126   : > { %p297_p6 = scmp.eq.s32.totalorder %s3975_s27, 3  ;;  %p303_p9 = scmp.eq.s32.totalorder %s2586_s3, 3 }
 0x127   : > { %s108_s20 = sadd.s32 1, %s4843_s0  ;;  %p4847_p10 = scmp.eq.s32.totalorder %s3825_s26, 0 }
 0x128   : > { %s4295_s7 = scalar_select %p4846_p11, %s4843_s0, %s108_s20  }
 0x129   : > { %p115_p0 = scmp.ne.s32.totalorder %s4843_s0, %s4844_s22  ;;  %p121_p3 = scmp.ne.s32.totalorder %s4844_s22, %s4845_s16 }
 0x12a   : > { %p4848_p2 = scmp.eq.s32.totalorder %s3975_s27, 0  ;;  %s442_s2 = sand.u32 1, %s4843_s0  }
 0x12b   : > { %p117_p8 = por %p115_p0, %p4847_p10  ;;  %p4310_p4 = por %p297_p6, %p115_p0 }
 0x12c   : > { %p4306_p13 = por %p121_p3, %p4848_p2  ;;  %p4314_p12 = por %p303_p9, %p121_p3 }
 0x12d   : > { %s4850_s14 = scalar_select %p4310_p4, 1, 0 }
 0x12e   : > { %s4849_s6 = scalar_select %p4306_p13, 1, 0 }
 0x12f   : > { %s4851_s4 = scalar_select %p4314_p12, 1, 0 }
 0x130   : > { %s2697_s23 = sshll.u32 %s3821_s25, 11  ;;  %s2603_s5 = sshll.u32 %s442_s2, 7 }
 0x131   : > { %s4852_s16 = sld [smem:[#allocation44_spill]]  ;;  %p4854_p7 = scmp.lt.s32.totalorder %s3825_s26, 4 }
 0x132   : > { %s444_s20 = scalar_lea.vmem [#allocation8], %s2603_s5  ;;  %s4331_s8 = sshll.u32 %s442_s2, 8 }
 0x133   : > { %p4327_p5 = pnand %p4854_p7, %p117_p8  ;;  %s451_s0 = sshll.u32 %s444_s20, 4  ;;  %s4333_s0 = int_to_ptr.vmem [resolvable:$true] %s451_s0 }
 0x135   : > { %p3593_p0 = pneg %p4327_p5 }
 0x137   : > { %s4853_s12 = smov %s4852_s16  ;;  %s4323_s19 = scalar_lea.hbm %s4852_s16, %s2697_s23 }
 0x138   : > { %s3591_s1 = scalar_lea.hbm %s4323_s19, 2048  ;;  %s3596_s16 = scalar_lea.hbm %s4853_s12, 4096 }
 0x139   : > { %p3592_p11 = scmp.ne.s32.totalorder %s4323_s19, %s3591_s1  ;;  %p3597_p9 = scmp.lt.u32.totalorder %s4323_s19, %s4853_s12 }
 0x13a   : > { %p3598_p10 = scmp.lt.u32.totalorder %s3596_s16, %s3591_s1  ;;  %p3600_p2 = scmp.lt.u32.totalorder %s3591_s1, %s4323_s19 }
 0x13b   : > { %p3594_p3 = pnand %p3593_p0, %p3592_p11 }
 0x13c   : > { %p3599_p8 = por %p3598_p10, %p3597_p9 }
 0x13d   : > { %p3595_p6 = pneg %p3594_p3 }
 0x13e   : > { %p3601_p7 = por %p3600_p2, %p3599_p8 }
 0x140   : > { %p3602_p12 = pnand %p3601_p7, %p3595_p6 }
 0x142   : > { %3605 = shalt.err (!%p3602_p12)
}
 0x143   : > { %s3606_s2 = scalar_lea.vmem %s4333_s0, 2048  ;;  %s3840_s5 = smov [#allocation8]  }
 0x144   : > { %p3607_p11 = scmp.ne.s32.totalorder %s4333_s0, %s3606_s2  ;;  %s3611_s20 = sshll.u32 %s3840_s5, 4  ;;  %s3612_s20 = int_to_ptr.vmem [resolvable:$false] %s3611_s20 }
 0x145   : > { %s3613_s9 = scalar_lea.vmem %s3612_s20, 4096  ;;  %p3614_p13 = scmp.lt.s32.totalorder %s4333_s0, %s3612_s20 }
 0x146   : > { %p3609_p3 = pnand %p3607_p11, %p3593_p0  ;;  %p3615_p9 = scmp.lt.s32.totalorder %s3613_s9, %s3606_s2 }
 0x148   : > { %p3610_p4 = pneg %p3609_p3  ;;  %p3616_p10 = por %p3615_p9, %p3614_p13 }
 0x14a   : > { %p3617_p8 = pnand %p3616_p10, %p3610_p4 }
 0x14c   : > { %3620 = shalt.err (!%p3617_p8)
}
 0x14d   : > { %3146 = dma.hbm_to_vmem [thread:$0]  (!%p4327_p5), %s4323_s19, 2048, %s4333_s0, %s4136_s13, %s4828_s29, %s4828_s29, %s4827_s28  }
 0x14e   : > { %s2698_s10 = sshll.u32 %s3821_s25, 12  ;;  %s4856_s22 = sld [smem:[#allocation45_spill]] }
 0x14f   : > { %s465_s5 = scalar_lea.vmem [#allocation9], %s4331_s8  ;;  %s4858_s9 = sand.u32 1, %s3825_s26  }
 0x150   : > { %s472_s20 = sshll.u32 %s465_s5, 4  ;;  %s4375_s12 = scalar_lea.sflag [#allocation10], %s4858_s9  ;;  %s4371_s20 = int_to_ptr.vmem [resolvable:$true] %s472_s20 }
 0x154   : > { %s4857_s2 = smov %s4856_s22  ;;  %s4368_s16 = scalar_lea.hbm %s4856_s22, %s2698_s10 }
 0x155   : > { %s3621_s24 = scalar_lea.hbm %s4368_s16, 4096  ;;  %s3626_s29 = scalar_lea.hbm %s4857_s2, 8192 }
 0x156   : > { %p3622_p13 = scmp.ne.s32.totalorder %s4368_s16, %s3621_s24  ;;  %p3627_p6 = scmp.lt.u32.totalorder %s4368_s16, %s4857_s2 }
 0x157   : > { %p3628_p2 = scmp.lt.u32.totalorder %s3626_s29, %s3621_s24  ;;  %p3630_p11 = scmp.lt.u32.totalorder %s3621_s24, %s4368_s16 }
 0x158   : > { %p3624_p4 = pnand %p3622_p13, %p3593_p0 }
 0x159   : > { %p3629_p7 = por %p3628_p2, %p3627_p6 }
 0x15a   : > { %p3625_p12 = pneg %p3624_p4 }
 0x15b   : > { %p3631_p3 = por %p3630_p11, %p3629_p7 }
 0x15d   : > { %p3632_p9 = pnand %p3631_p3, %p3625_p12 }
 0x15f   : > { %3635 = shalt.err (!%p3632_p9)
}
 0x160   : > { %s3636_s8 = scalar_lea.vmem %s4371_s20, 4096  ;;  %s3841_s10 = smov [#allocation9]  }
 0x161   : > { %p3637_p10 = scmp.ne.s32.totalorder %s4371_s20, %s3636_s8  ;;  %s3641_s1 = sshll.u32 %s3841_s10, 4  ;;  %s3642_s1 = int_to_ptr.vmem [resolvable:$false] %s3641_s1 }
 0x162   : > { %s3643_s23 = scalar_lea.vmem %s3642_s1, 8192  ;;  %p3644_p4 = scmp.lt.s32.totalorder %s4371_s20, %s3642_s1 }
 0x163   : > { %p3639_p8 = pnand %p3637_p10, %p3593_p0  ;;  %p3645_p6 = scmp.lt.s32.totalorder %s3643_s23, %s3636_s8 }
 0x165   : > { %p3640_p13 = pneg %p3639_p8  ;;  %p3646_p2 = por %p3645_p6, %p3644_p4 }
 0x167   : > { %p3647_p7 = pnand %p3646_p2, %p3640_p13 }
 0x169   : > { %3650 = shalt.err (!%p3647_p7)
}
 0x16a   : > { %s3842_s24 = smov 128   ;;  %s3843_s22 = smov 8  }
 0x16b   : > { %3149 = dma.hbm_to_vmem [thread:$0]  (!%p4327_p5), %s4368_s16, 4096, %s4371_s20, %s4375_s12, %s3842_s24, %s3842_s24, %s3843_s22  }
 0x16c   : > { %s4859_s5 = sld [smem:[#allocation38_spill]] }
 0x172   : > { %p4860_p0 = scmp.ne.s32.totalorder %s4859_s5, 0 }
 0x173   : > { %s4861_s9 = sld [smem:[#allocation34_spill]] (!%p4860_p0) }
 0x174   : > { %484 = sbr.rel (%p4860_p0) target bundleno = 1669 (0x685), region = 60 }
 0x179   : > { %s486_s13 = sand.u32 (!%p4860_p0), 1, %s4861_s9  }
 0x17a   : > { %s2610_s28 = sshll.u32 (!%p4860_p0), %s486_s13, 7  ;;  %s487_s29 = scalar_lea.sflag (!%p4860_p0), [#allocation4], %s486_s13 }
 0x17b   : > { %s4404_s19 = scalar_lea.vmem [#allocation3], %s2610_s28 }
 0x17c   : > { %3736 = dma.done.wait (%p4244_p1), %s487_s29, 2048  }
 0x17d   : > { %3738 = vsyncadd (%p4244_p1), %s487_s29, 4294965248  ;;  %s495_s3 = sand.u32 1, %s3975_s27   ;;  %s497_s12 = sand.u32 1, %s3789_s17  }
 0x17e   : > { %s2611_s16 = sshll.u32 %s497_s12, 7  ;;  %s496_s20 = scalar_lea.sflag [#allocation7], %s495_s3 }
 0x17f   : > { %s4412_s0 = scalar_lea.vmem [#allocation6], %s2611_s16  ;;  %p4862_p5 = scmp.ne.s32.totalorder %s4823_s30, 0 }
 0x181   : > { %3740 = dma.done.wait (%p4862_p5), %s496_s20, 2048  }
 0x182   : > { %3742 = vsyncadd (%p4862_p5), %s496_s20, 4294965248  ;;  %s4863_s8 = sld [smem:[#allocation31_spill]]  ;;  %p4864_p1 = scmp.ne.s32.totalorder %s4849_s6, 0 }
 0x188   : > { %s4419_s10 = sand.u32 1, %s4863_s8  }
 0x189   : > { %s2612_s15 = sshll.u32 %s4419_s10, 7 }
 0x18a   : > { %s4422_s1 = scalar_lea.vmem [#allocation8], %s2612_s15 }
 0x18b   : > { %3744 = dma.done.wait (%p4864_p1), %s496_s20, 2048  }
 0x18c   : > { %3746 = vsyncadd (%p4864_p1), %s496_s20, 4294965248  ;;  %s2613_s23 = sshll.u32 %s4419_s10, 8  ;;  %s514_s24 = scalar_lea.sflag [#allocation10], %s495_s3 }
 0x18d   : > { %s4429_s22 = scalar_lea.vmem [#allocation9], %s2613_s23 }
 0x18e   : > { %3748 = dma.done.wait (%p4864_p1), %s514_s24, 4096  }
 0x18f   : > { %3750 = vsyncadd (%p4864_p1), %s514_s24, 4294963200  ;;  %p4865_p12 = scmp.eq.s32.totalorder %s3975_s27, 0 }
 0x191   : > { %3752 = dma.done.wait (%p4865_p12), [#allocation10], 2048   ;;  %p4866_p11 = pmov %p4865_p12 }
 0x193   : > { %3754 = vsyncadd (%p4866_p11), [#allocation10], 4294965248  ;;  %p4867_p3 = pmov %p4866_p11 }
 0x195   : > { %3756 = dma.done.wait (%p4867_p3), [#allocation13], 1040   ;;  %p4868_p9 = pmov %p4867_p3 }
 0x196   : > { %p4869_p10 = pmov %p4867_p3 }
 0x197   : > { %3758 = vsyncadd (%p4868_p9), [#allocation13], 4294966256 }
 0x198   : > { %3760 = dma.done.wait (%p4869_p10), [#allocation16], 1040   ;;  %p4870_p8 = pmov %p4867_p3 }
 0x199   : > { %p4871_p13 = pmov %p4867_p3 }
 0x19a   : > { %3762 = vsyncadd (%p4870_p8), [#allocation16], 4294966256 }
 0x19b   : > { %3764 = dma.done.wait (%p4871_p13), [#allocation19], 16   ;;  %p4872_p4 = pmov %p4867_p3 }
 0x19c   : > { %s4451_s6 = scalar_lea.vmem [#allocation20], %s2613_s23  ;;  %s4873_s30 = sld [smem:[#allocation35_spill]] }
 0x19d   : > { %3766 = vsyncadd (%p4872_p4), [#allocation19], 4294967280 }
 0x1a2   : > { %p2621_p6 = scmp.ne.s32.totalorder %s4873_s30, 0 }
 0x1a3   : > { %v3844_v0 = vmov (!%p2621_p6), 0.0  }
 0x1a4   : > { %603 = sbr.rel (%p2621_p6) target bundleno = 436 (0x1b4), region = 104  ;;  %604 = vst [vmem:[#allocation2] sm:$0xff] (!%p2621_p6), %v3844_v0  ;;  %605 = vst [vmem:[#allocation2 + $0x8] sm:$0xff] (!%p2621_p6), %v3844_v0 }
 0x1a5   : > { %606 = vst [vmem:[#allocation2 + $0x10] sm:$0xff] (!%p2621_p6), %v3844_v0  ;;  %607 = vst [vmem:[#allocation2 + $0x18] sm:$0xff] (!%p2621_p6), %v3844_v0 }
 0x1a6   : > { %608 = vst [vmem:[#allocation2 + $0x20] sm:$0xff] (!%p2621_p6), %v3844_v0  ;;  %609 = vst [vmem:[#allocation2 + $0x28] sm:$0xff] (!%p2621_p6), %v3844_v0 }
 0x1a7   : > { %610 = vst [vmem:[#allocation2 + $0x30] sm:$0xff] (!%p2621_p6), %v3844_v0  ;;  %611 = vst [vmem:[#allocation2 + $0x38] sm:$0xff] (!%p2621_p6), %v3844_v0 }
 0x1a8   : > { %612 = vst [vmem:[#allocation2 + $0x40] sm:$0xff] (!%p2621_p6), %v3844_v0  ;;  %613 = vst [vmem:[#allocation2 + $0x48] sm:$0xff] (!%p2621_p6), %v3844_v0 }
 0x1a9   : > { %614 = vst [vmem:[#allocation2 + $0x50] sm:$0xff] (!%p2621_p6), %v3844_v0  ;;  %615 = vst [vmem:[#allocation2 + $0x58] sm:$0xff] (!%p2621_p6), %v3844_v0 }
 0x1aa   : > { %616 = vst [vmem:[#allocation2 + $0x60] sm:$0xff] (!%p2621_p6), %v3844_v0  ;;  %617 = vst [vmem:[#allocation2 + $0x68] sm:$0xff] (!%p2621_p6), %v3844_v0 }
 0x1ab   : > { %618 = vst [vmem:[#allocation2 + $0x70] sm:$0xff] %v3844_v0  ;;  %619 = vst [vmem:[#allocation2 + $0x78] sm:$0xff] %v3844_v0 }
 0x1ac   : > { %620 = vst [vmem:[#allocation2 + $0x80] sm:$0xff] %v3844_v0  ;;  %621 = vst [vmem:[#allocation2 + $0x88] sm:$0xff] %v3844_v0 }
 0x1ad   : > { %622 = vst [vmem:[#allocation2 + $0x90] sm:$0xff] %v3844_v0  ;;  %623 = vst [vmem:[#allocation2 + $0x98] sm:$0xff] %v3844_v0 }
 0x1ae   : > { %624 = vst [vmem:[#allocation2 + $0xa0] sm:$0xff] %v3844_v0  ;;  %625 = vst [vmem:[#allocation2 + $0xa8] sm:$0xff] %v3844_v0 }
 0x1af   : > { %626 = vst [vmem:[#allocation2 + $0xb0] sm:$0xff] %v3844_v0  ;;  %627 = vst [vmem:[#allocation2 + $0xb8] sm:$0xff] %v3844_v0 }
 0x1b0   : > { %628 = vst [vmem:[#allocation2 + $0xc0] sm:$0xff] %v3844_v0  ;;  %629 = vst [vmem:[#allocation2 + $0xc8] sm:$0xff] %v3844_v0 }
 0x1b1   : > { %630 = vst [vmem:[#allocation2 + $0xd0] sm:$0xff] %v3844_v0  ;;  %631 = vst [vmem:[#allocation2 + $0xd8] sm:$0xff] %v3844_v0 }
 0x1b2   : > { %632 = vst [vmem:[#allocation2 + $0xe0] sm:$0xff] %v3844_v0  ;;  %633 = vst [vmem:[#allocation2 + $0xe8] sm:$0xff] %v3844_v0 }
 0x1b3   : > { %634 = vst [vmem:[#allocation2 + $0xf0] sm:$0xff] %v3844_v0  ;;  %635 = vst [vmem:[#allocation2 + $0xf8] sm:$0xff] %v3844_v0 }
 0x1b4 PF: > { %v3297_v1 = vld [vmem:[%s4412_s0 + $0x40] sm:$0xff]   ;;  %v3299_v3 = vld [vmem:[%s4412_s0 + $0x48] sm:$0xff]   ;;  %v3301_v5 = vld [vmem:[%s4412_s0 + $0x50] sm:$0xff]   ;;  %s4874_s27 = sld [smem:[#allocation35_spill]] }
 0x1b5   : > { %v3298_v2 = vld [vmem:[%s4412_s0] sm:$0xff]   ;;  %2700 = vmatprep.subr.bf16.mxu0 %v3297_v1  ;;  %3068 = vmatprep.subr.bf16.mxu1 %v3297_v1  ;;  %v3300_v4 = vld [vmem:[%s4412_s0 + $0x8] sm:$0xff]   ;;  %v3302_v6 = vld [vmem:[%s4412_s0 + $0x10] sm:$0xff]  }
 0x1b6   : > { %2701 = vmatpush3.bf16.msra.mxu0 %v3298_v2  ;;  %3076 = vmatpush3.bf16.msra.mxu1 %v3298_v2  ;;  %v3303_v7 = vld [vmem:[%s4412_s0 + $0x58] sm:$0xff]   ;;  %v3305_v9 = vld [vmem:[%s4412_s0 + $0x60] sm:$0xff]   ;;  %v3307_v11 = vld [vmem:[%s4412_s0 + $0x68] sm:$0xff]  }
 0x1b7   : > { %2702 = vmatprep.subr.bf16.mxu0 %v3299_v3  ;;  %3069 = vmatprep.subr.bf16.mxu1 %v3299_v3  ;;  %v3304_v8 = vld [vmem:[%s4412_s0 + $0x18] sm:$0xff]   ;;  %v3306_v10 = vld [vmem:[%s4412_s0 + $0x20] sm:$0xff]   ;;  %v669_v12 = vld [vmem:[%s4404_s19 + $0x8] sm:$0xff] }
 0x1b8   : > { %v677_v13 = vld [vmem:[%s4404_s19 + $0x48] sm:$0xff]  ;;  %v685_v14 = vunpack.c.l.s8.bf16 %v669_v12  ;;  %v3309_v17 = vld [vmem:[%s4412_s0 + $0x70] sm:$0xff]   ;;  %v3311_v19 = vld [vmem:[%s4412_s0 + $0x78] sm:$0xff]   ;;  %v687_v25 = vunpack.c.h.s8.bf16 %v669_v12 }
 0x1b9   : > { %v701_v15 = vunpack.c.l.s8.bf16 %v677_v13  ;;  %v3308_v16 = vld [vmem:[%s4412_s0 + $0x28] sm:$0xff]   ;;  %v3310_v18 = vld [vmem:[%s4412_s0 + $0x30] sm:$0xff]   ;;  %v3312_v20 = vld [vmem:[%s4412_s0 + $0x38] sm:$0xff]   ;;  %v703_v26 = vunpack.c.h.s8.bf16 %v677_v13 }
 0x1ba   : > { %2703 = vmatpush3.bf16.msra.mxu0 %v3300_v4  ;;  %3077 = vmatpush3.bf16.msra.mxu1 %v3300_v4  ;;  %v668_v21 = vld [vmem:[%s4404_s19] sm:$0xff]  ;;  %v671_v27 = vld [vmem:[%s4404_s19 + $0x18] sm:$0xff]  ;;  %v670_v33 = vld [vmem:[%s4404_s19 + $0x10] sm:$0xff]  ;;  %p2638_p2 = scmp.ne.s32.totalorder %s4874_s27, 1 }
 0x1bb   : > { %2704 = vmatprep.subr.bf16.mxu0 %v3301_v5  ;;  %3070 = vmatprep.subr.bf16.mxu1 %v3301_v5  ;;  %v676_v22 = vld [vmem:[%s4404_s19 + $0x40] sm:$0xff]  ;;  %v684_v23 = vunpack.c.l.s8.bf16 %v668_v21  ;;  %v679_v28 = vld [vmem:[%s4404_s19 + $0x58] sm:$0xff]  ;;  %v686_v29 = vunpack.c.h.s8.bf16 %v668_v21  ;;  %v689_v31 = vunpack.c.l.s8.bf16 %v671_v27  ;;  %v678_v34 = vld [vmem:[%s4404_s19 + $0x50] sm:$0xff]  ;;  %v688_v35 = vunpack.c.l.s8.bf16 %v670_v33 }
 0x1bc   : > { %876 = vmatprep.mubr.bf16.mxu0 %v685_v14  ;;  %940 = vmatprep.mubr.bf16.mxu1 %v701_v15  ;;  %v700_v24 = vunpack.c.l.s8.bf16 %v676_v22  ;;  %v702_v30 = vunpack.c.h.s8.bf16 %v676_v22  ;;  %v705_v32 = vunpack.c.l.s8.bf16 %v679_v28  ;;  %v704_v36 = vunpack.c.l.s8.bf16 %v678_v34  ;;  %v673_v39 = vld [vmem:[%s4404_s19 + $0x28] sm:$0xff]  ;;  %v672_v45 = vld [vmem:[%s4404_s19 + $0x20] sm:$0xff]  ;;  %v675_v51 = vld [vmem:[%s4404_s19 + $0x38] sm:$0xff] }
 0x1bd   : > { %v691_v37 = vunpack.c.h.s8.bf16 %v671_v27  ;;  %v707_v38 = vunpack.c.h.s8.bf16 %v679_v28  ;;  %v681_v40 = vld [vmem:[%s4404_s19 + $0x68] sm:$0xff]  ;;  %v690_v41 = vunpack.c.h.s8.bf16 %v670_v33  ;;  %v706_v42 = vunpack.c.h.s8.bf16 %v678_v34  ;;  %v680_v46 = vld [vmem:[%s4404_s19 + $0x60] sm:$0xff]  ;;  %v683_v52 = vld [vmem:[%s4404_s19 + $0x78] sm:$0xff] }
 0x1be   : > { %2705 = vmatpush3.bf16.msra.mxu0 %v3302_v6  ;;  %3078 = vmatpush3.bf16.msra.mxu1 %v3302_v6  ;;  %v693_v43 = vunpack.c.l.s8.bf16 %v673_v39  ;;  %v709_v44 = vunpack.c.l.s8.bf16 %v681_v40  ;;  %v692_v47 = vunpack.c.l.s8.bf16 %v672_v45  ;;  %v708_v48 = vunpack.c.l.s8.bf16 %v680_v46  ;;  %v674_v57 = vld [vmem:[%s4404_s19 + $0x30] sm:$0xff]  ;;  %v636_v3 = vld [vmem:[#allocation2] sm:$0xff]  ;;  %v653_v13 = vld [vmem:[#allocation2 + $0x88] sm:$0xff] }
 0x1bf   : > { %2706 = vmatprep.subr.bf16.mxu0 %v3303_v7  ;;  %3071 = vmatprep.subr.bf16.mxu1 %v3303_v7  ;;  %v695_v49 = vunpack.c.h.s8.bf16 %v673_v39  ;;  %v711_v50 = vunpack.c.h.s8.bf16 %v681_v40  ;;  %v694_v53 = vunpack.c.h.s8.bf16 %v672_v45  ;;  %v710_v54 = vunpack.c.h.s8.bf16 %v680_v46  ;;  %v682_v58 = vld [vmem:[%s4404_s19 + $0x70] sm:$0xff]  ;;  %v652_v5 = vld [vmem:[#allocation2 + $0x80] sm:$0xff]  ;;  %v655_v33 = vld [vmem:[#allocation2 + $0x98] sm:$0xff] }
 0x1c0   : > { %v697_v55 = vunpack.c.l.s8.bf16 %v675_v51  ;;  %v713_v56 = vunpack.c.l.s8.bf16 %v683_v52  ;;  %v696_v59 = vunpack.c.l.s8.bf16 %v674_v57  ;;  %v712_v60 = vunpack.c.l.s8.bf16 %v682_v58  ;;  %v656_v45 = vld [vmem:[#allocation2 + $0xa0] sm:$0xff] }
 0x1c1   : > { %v699_v61 = vunpack.c.h.s8.bf16 %v675_v51  ;;  %v715_v62 = vunpack.c.h.s8.bf16 %v683_v52  ;;  %v698_v63 = vunpack.c.h.s8.bf16 %v674_v57  ;;  %v714_v0 = vunpack.c.h.s8.bf16 %v682_v58  ;;  %v641_v51 = vld [vmem:[#allocation2 + $0x28] sm:$0xff] }
 0x1c2   : > { %2707 = vmatpush3.bf16.msra.mxu0 %v3304_v8  ;;  %3079 = vmatpush3.bf16.msra.mxu1 %v3304_v8 }
 0x1c3   : > { %2708 = vmatprep.subr.bf16.mxu0 %v3305_v9  ;;  %3072 = vmatprep.subr.bf16.mxu1 %v3305_v9 }
 0x1c6   : > { %2709 = vmatpush3.bf16.msra.mxu0 %v3306_v10  ;;  %3080 = vmatpush3.bf16.msra.mxu1 %v3306_v10 }
 0x1c7   : > { %2710 = vmatprep.subr.bf16.mxu0 %v3307_v11  ;;  %3073 = vmatprep.subr.bf16.mxu1 %v3307_v11  ;;  %v637_v11 = vld [vmem:[#allocation2 + $0x8] sm:$0xff] }
 0x1ca   : > { %2711 = vmatpush3.bf16.msra.mxu0 %v3308_v16  ;;  %3081 = vmatpush3.bf16.msra.mxu1 %v3308_v16 }
 0x1cb   : > { %2712 = vmatprep.subr.bf16.mxu0 %v3309_v17  ;;  %3074 = vmatprep.subr.bf16.mxu1 %v3309_v17 }
 0x1ce   : > { %2713 = vmatpush3.bf16.msra.mxu0 %v3310_v18  ;;  %3082 = vmatpush3.bf16.msra.mxu1 %v3310_v18 }
 0x1cf   : > { %2714 = vmatprep.subr.bf16.mxu0 %v3311_v19  ;;  %3075 = vmatprep.subr.bf16.mxu1 %v3311_v19 }
 0x1d2   : > { %2715 = vmatpush3.bf16.msra.mxu0 %v3312_v20  ;;  %3083 = vmatpush3.bf16.msra.mxu1 %v3312_v20 }
 0x1d5   : > { %877 = vmatmul.mubr.bf16.vlgmr.msra.gmra.mrb[0].mxu0 %v684_v23  ;;  %941 = vmatmul.mubr.bf16.vlgmr.msra.gmra.mrb[0].mxu1 %v700_v24  ;;  %v638_v23 = vld [vmem:[#allocation2 + $0x10] sm:$0xff] }
 0x1d6   : > { %884 = vmatprep.mubr.bf16.mxu0 %v687_v25  ;;  %948 = vmatprep.mubr.bf16.mxu1 %v703_v26  ;;  %v654_v25 = vld [vmem:[#allocation2 + $0x90] sm:$0xff] }
 0x1dd   : > { %885 = vmatmul.mubr.bf16.gmra.mrb[4].mxu0 %v686_v29  ;;  %949 = vmatmul.mubr.bf16.gmra.mrb[4].mxu1 %v702_v30 }
 0x1de   : > { %892 = vmatprep.mubr.bf16.mxu0 %v689_v31  ;;  %956 = vmatprep.mubr.bf16.mxu1 %v705_v32  ;;  %v639_v31 = vld [vmem:[#allocation2 + $0x18] sm:$0xff] }
 0x1e5   : > { %893 = vmatmul.mubr.bf16.gmra.mrb[8].mxu0 %v688_v35  ;;  %957 = vmatmul.mubr.bf16.gmra.mrb[8].mxu1 %v704_v36 }
 0x1e6   : > { %900 = vmatprep.mubr.bf16.mxu0 %v691_v37  ;;  %964 = vmatprep.mubr.bf16.mxu1 %v707_v38 }
 0x1ed   : > { %901 = vmatmul.mubr.bf16.gmra.mrb[12].mxu0 %v690_v41  ;;  %965 = vmatmul.mubr.bf16.gmra.mrb[12].mxu1 %v706_v42 }
 0x1ee   : > { %908 = vmatprep.mubr.bf16.mxu0 %v693_v43  ;;  %972 = vmatprep.mubr.bf16.mxu1 %v709_v44  ;;  %v640_v43 = vld [vmem:[#allocation2 + $0x20] sm:$0xff] }
 0x1f5   : > { %909 = vmatmul.mubr.bf16.gmra.mrb[16].mxu0 %v692_v47  ;;  %973 = vmatmul.mubr.bf16.gmra.mrb[16].mxu1 %v708_v48 }
 0x1f6   : > { %916 = vmatprep.mubr.bf16.mxu0 %v695_v49  ;;  %980 = vmatprep.mubr.bf16.mxu1 %v711_v50 }
 0x1fd   : > { %917 = vmatmul.mubr.bf16.gmra.mrb[20].mxu0 %v694_v53  ;;  %981 = vmatmul.mubr.bf16.gmra.mrb[20].mxu1 %v710_v54  ;;  %v657_v53 = vld [vmem:[#allocation2 + $0xa8] sm:$0xff] }
 0x1fe   : > { %924 = vmatprep.mubr.bf16.mxu0 %v697_v55  ;;  %988 = vmatprep.mubr.bf16.mxu1 %v713_v56 }
 0x205   : > { %925 = vmatmul.mubr.bf16.gmra.mrb[24].mxu0 %v696_v59  ;;  %989 = vmatmul.mubr.bf16.gmra.mrb[24].mxu1 %v712_v60 }
 0x206   : > { %932 = vmatprep.mubr.bf16.mxu0 %v699_v61  ;;  %996 = vmatprep.mubr.bf16.mxu1 %v715_v62 }
 0x20d   : > { %933 = vmatmul.mubr.bf16.gmra.mrb[28].mxu0 %v698_v63  ;;  %997 = vmatmul.mubr.bf16.gmra.mrb[28].mxu1 %v714_v0  ;;  %v642_v63 = vld [vmem:[#allocation2 + $0x30] sm:$0xff] }
 0x2a8   : > { %v2716_v1 = vpop.f32.mrb[0].mxu0  ;;  %v2764_v2 = vpop.f32.mrb[0].mxu1 }
 0x2a9   : > { %v2717_v4 = vpop.f32.mrb[1].mxu0  ;;  %v2765_v6 = vpop.f32.mrb[1].mxu1 }
 0x2aa   : > { %v2718_v7 = vadd.f32 %v2717_v4, %v2716_v1  ;;  %v2766_v8 = vadd.f32 %v2765_v6, %v2764_v2  ;;  %v2719_v9 = vpop.f32.mrb[2].mxu0  ;;  %v2767_v10 = vpop.f32.mrb[2].mxu1  ;;  %v658_v1 = vld [vmem:[#allocation2 + $0xb0] sm:$0xff] }
 0x2ab   : > { %v2720_v12 = vpop.f32.mrb[3].mxu0  ;;  %v2768_v14 = vpop.f32.mrb[3].mxu1 }
 0x2ac   : > { %v1005_v15 = vadd.f32 %v2718_v7, %v636_v3  ;;  %v1021_v16 = vadd.f32 %v2766_v8, %v652_v5  ;;  %v2721_v17 = vadd.f32 %v2720_v12, %v2719_v9  ;;  %v2769_v18 = vadd.f32 %v2768_v14, %v2767_v10  ;;  %v643_v7 = vld [vmem:[#allocation2 + $0x38] sm:$0xff] }
 0x2ad   : > { %v659_v9 = vld [vmem:[#allocation2 + $0xb8] sm:$0xff] }
 0x2ae   : > { %1037 = vst [vmem:[#allocation2] sm:$0xff] %v1005_v15  ;;  %1053 = vst [vmem:[#allocation2 + $0x80] sm:$0xff] %v1021_v16  ;;  %v1006_v19 = vadd.f32 %v2721_v17, %v637_v11  ;;  %v1022_v20 = vadd.f32 %v2769_v18, %v653_v13 }
 0x2b0   : > { %1038 = vst [vmem:[#allocation2 + $0x8] sm:$0xff] %v1006_v19  ;;  %1054 = vst [vmem:[#allocation2 + $0x88] sm:$0xff] %v1022_v20  ;;  %v2722_v21 = vpop.f32.mrb[4].mxu0  ;;  %v2770_v22 = vpop.f32.mrb[4].mxu1  ;;  %v644_v19 = vld [vmem:[#allocation2 + $0x40] sm:$0xff] }
 0x2b1   : > { %v2723_v24 = vpop.f32.mrb[5].mxu0  ;;  %v2771_v26 = vpop.f32.mrb[5].mxu1 }
 0x2b2   : > { %v2724_v27 = vadd.f32 %v2723_v24, %v2722_v21  ;;  %v2772_v28 = vadd.f32 %v2771_v26, %v2770_v22  ;;  %v2725_v29 = vpop.f32.mrb[6].mxu0  ;;  %v2773_v30 = vpop.f32.mrb[6].mxu1  ;;  %v660_v21 = vld [vmem:[#allocation2 + $0xc0] sm:$0xff] }
 0x2b3   : > { %v2726_v32 = vpop.f32.mrb[7].mxu0  ;;  %v2774_v34 = vpop.f32.mrb[7].mxu1 }
 0x2b4   : > { %v1007_v35 = vadd.f32 %v2724_v27, %v638_v23  ;;  %v1023_v36 = vadd.f32 %v2772_v28, %v654_v25  ;;  %v2727_v37 = vadd.f32 %v2726_v32, %v2725_v29  ;;  %v2775_v38 = vadd.f32 %v2774_v34, %v2773_v30  ;;  %v645_v27 = vld [vmem:[#allocation2 + $0x48] sm:$0xff] }
 0x2b5   : > { %v661_v29 = vld [vmem:[#allocation2 + $0xc8] sm:$0xff] }
 0x2b6   : > { %1039 = vst [vmem:[#allocation2 + $0x10] sm:$0xff] %v1007_v35  ;;  %1055 = vst [vmem:[#allocation2 + $0x90] sm:$0xff] %v1023_v36  ;;  %v1008_v39 = vadd.f32 %v2727_v37, %v639_v31  ;;  %v1024_v40 = vadd.f32 %v2775_v38, %v655_v33 }
 0x2b8   : > { %1040 = vst [vmem:[#allocation2 + $0x18] sm:$0xff] %v1008_v39  ;;  %1056 = vst [vmem:[#allocation2 + $0x98] sm:$0xff] %v1024_v40  ;;  %v2728_v41 = vpop.f32.mrb[8].mxu0  ;;  %v2776_v42 = vpop.f32.mrb[8].mxu1  ;;  %v646_v39 = vld [vmem:[#allocation2 + $0x50] sm:$0xff] }
 0x2b9   : > { %v2729_v44 = vpop.f32.mrb[9].mxu0  ;;  %v2777_v46 = vpop.f32.mrb[9].mxu1 }
 0x2ba   : > { %v2730_v47 = vadd.f32 %v2729_v44, %v2728_v41  ;;  %v2778_v48 = vadd.f32 %v2777_v46, %v2776_v42  ;;  %v2731_v49 = vpop.f32.mrb[10].mxu0  ;;  %v2779_v50 = vpop.f32.mrb[10].mxu1  ;;  %v662_v41 = vld [vmem:[#allocation2 + $0xd0] sm:$0xff] }
 0x2bb   : > { %v2732_v52 = vpop.f32.mrb[11].mxu0  ;;  %v2780_v54 = vpop.f32.mrb[11].mxu1 }
 0x2bc   : > { %v1009_v55 = vadd.f32 %v2730_v47, %v640_v43  ;;  %v1025_v56 = vadd.f32 %v2778_v48, %v656_v45  ;;  %v2733_v57 = vadd.f32 %v2732_v52, %v2731_v49  ;;  %v2781_v58 = vadd.f32 %v2780_v54, %v2779_v50  ;;  %v647_v47 = vld [vmem:[#allocation2 + $0x58] sm:$0xff] }
 0x2bd   : > { %v663_v49 = vld [vmem:[#allocation2 + $0xd8] sm:$0xff] }
 0x2be   : > { %1041 = vst [vmem:[#allocation2 + $0x20] sm:$0xff] %v1009_v55  ;;  %1057 = vst [vmem:[#allocation2 + $0xa0] sm:$0xff] %v1025_v56  ;;  %v1010_v59 = vadd.f32 %v2733_v57, %v641_v51  ;;  %v1026_v60 = vadd.f32 %v2781_v58, %v657_v53 }
 0x2c0   : > { %1042 = vst [vmem:[#allocation2 + $0x28] sm:$0xff] %v1010_v59  ;;  %1058 = vst [vmem:[#allocation2 + $0xa8] sm:$0xff] %v1026_v60  ;;  %v2734_v61 = vpop.f32.mrb[12].mxu0  ;;  %v2782_v62 = vpop.f32.mrb[12].mxu1  ;;  %v648_v59 = vld [vmem:[#allocation2 + $0x60] sm:$0xff] }
 0x2c1   : > { %v2735_v0 = vpop.f32.mrb[13].mxu0  ;;  %v2783_v2 = vpop.f32.mrb[13].mxu1 }
 0x2c2   : > { %v2736_v3 = vadd.f32 %v2735_v0, %v2734_v61  ;;  %v2784_v4 = vadd.f32 %v2783_v2, %v2782_v62  ;;  %v2737_v5 = vpop.f32.mrb[14].mxu0  ;;  %v2785_v6 = vpop.f32.mrb[14].mxu1  ;;  %v664_v61 = vld [vmem:[#allocation2 + $0xe0] sm:$0xff] }
 0x2c3   : > { %v2738_v8 = vpop.f32.mrb[15].mxu0  ;;  %v2786_v10 = vpop.f32.mrb[15].mxu1 }
 0x2c4   : > { %v1011_v11 = vadd.f32 %v2736_v3, %v642_v63  ;;  %v1027_v12 = vadd.f32 %v2784_v4, %v658_v1  ;;  %v2739_v13 = vadd.f32 %v2738_v8, %v2737_v5  ;;  %v2787_v14 = vadd.f32 %v2786_v10, %v2785_v6  ;;  %v649_v3 = vld [vmem:[#allocation2 + $0x68] sm:$0xff] }
 0x2c5   : > { %v665_v5 = vld [vmem:[#allocation2 + $0xe8] sm:$0xff] }
 0x2c6   : > { %1043 = vst [vmem:[#allocation2 + $0x30] sm:$0xff] %v1011_v11  ;;  %1059 = vst [vmem:[#allocation2 + $0xb0] sm:$0xff] %v1027_v12  ;;  %v1012_v15 = vadd.f32 %v2739_v13, %v643_v7  ;;  %v1028_v16 = vadd.f32 %v2787_v14, %v659_v9 }
 0x2c8   : > { %1044 = vst [vmem:[#allocation2 + $0x38] sm:$0xff] %v1012_v15  ;;  %1060 = vst [vmem:[#allocation2 + $0xb8] sm:$0xff] %v1028_v16  ;;  %v2740_v17 = vpop.f32.mrb[16].mxu0  ;;  %v2788_v18 = vpop.f32.mrb[16].mxu1  ;;  %v650_v15 = vld [vmem:[#allocation2 + $0x70] sm:$0xff] }
 0x2c9   : > { %v2741_v20 = vpop.f32.mrb[17].mxu0  ;;  %v2789_v22 = vpop.f32.mrb[17].mxu1 }
 0x2ca   : > { %v2742_v23 = vadd.f32 %v2741_v20, %v2740_v17  ;;  %v2790_v24 = vadd.f32 %v2789_v22, %v2788_v18  ;;  %v2743_v25 = vpop.f32.mrb[18].mxu0  ;;  %v2791_v26 = vpop.f32.mrb[18].mxu1  ;;  %v666_v17 = vld [vmem:[#allocation2 + $0xf0] sm:$0xff] }
 0x2cb   : > { %v2744_v28 = vpop.f32.mrb[19].mxu0  ;;  %v2792_v30 = vpop.f32.mrb[19].mxu1 }
 0x2cc   : > { %v1013_v31 = vadd.f32 %v2742_v23, %v644_v19  ;;  %v1029_v32 = vadd.f32 %v2790_v24, %v660_v21  ;;  %v2745_v33 = vadd.f32 %v2744_v28, %v2743_v25  ;;  %v2793_v34 = vadd.f32 %v2792_v30, %v2791_v26  ;;  %v651_v23 = vld [vmem:[#allocation2 + $0x78] sm:$0xff] }
 0x2cd   : > { %v667_v25 = vld [vmem:[#allocation2 + $0xf8] sm:$0xff] }
 0x2ce   : > { %1045 = vst [vmem:[#allocation2 + $0x40] sm:$0xff] %v1013_v31  ;;  %1061 = vst [vmem:[#allocation2 + $0xc0] sm:$0xff] %v1029_v32  ;;  %v1014_v35 = vadd.f32 %v2745_v33, %v645_v27  ;;  %v1030_v36 = vadd.f32 %v2793_v34, %v661_v29  ;;  %v1107_v33 = vld [vmem:[%s4429_s22 + $0x10] sm:$0xff] (!%p2638_p2)  ;;  %v1105_v34 = vld [vmem:[%s4429_s22] sm:$0xff] (!%p2638_p2) }
 0x2d0   : > { %1046 = vst [vmem:[#allocation2 + $0x48] sm:$0xff] %v1014_v35  ;;  %1062 = vst [vmem:[#allocation2 + $0xc8] sm:$0xff] %v1030_v36  ;;  %v2746_v37 = vpop.f32.mrb[20].mxu0  ;;  %v2794_v38 = vpop.f32.mrb[20].mxu1  ;;  %v3845_v35 = vmov (!%p2638_p2), 0   ;;  %v1108_v36 = vld [vmem:[%s4429_s22 + $0x18] sm:$0xff] (!%p2638_p2) }
 0x2d1   : > { %v2747_v40 = vpop.f32.mrb[21].mxu0  ;;  %v2795_v42 = vpop.f32.mrb[21].mxu1  ;;  %3314 = vset.pattern.permute.xlu1 (!%p2638_p2), %v3845_v35  ;;  %3313 = vset.pattern.permute.xlu0 (!%p2638_p2), %v3845_v35 }
 0x2d2   : > { %v2748_v43 = vadd.f32 %v2747_v40, %v2746_v37  ;;  %v2796_v44 = vadd.f32 %v2795_v42, %v2794_v38  ;;  %v2749_v45 = vpop.f32.mrb[22].mxu0  ;;  %v2797_v46 = vpop.f32.mrb[22].mxu1  ;;  %1149 = vperm.xlu1 (!%p2638_p2), %3314, %v1107_v33   ;;  %1139 = vperm.xlu0 (!%p2638_p2), %3313, %v1105_v34   ;;  %v1106_v37 = vld [vmem:[%s4429_s22 + $0x8] sm:$0xff] (!%p2638_p2)  ;;  %v1112_v40 = vld [vmem:[%s4429_s22 + $0x38] sm:$0xff] (!%p2638_p2)  ;;  %v3315_v42 = vld [vmem:[#allocation11 + $0x40] sm:$0xff] (!%p2638_p2)  }
 0x2d3   : > { %v2750_v48 = vpop.f32.mrb[23].mxu0  ;;  %v2798_v50 = vpop.f32.mrb[23].mxu1  ;;  %v1110_v38 = vld [vmem:[%s4429_s22 + $0x28] sm:$0xff] (!%p2638_p2)  ;;  %2812 = vmatprep.subr.bf16.mxu0 (!%p2638_p2), %v3315_v42 }
 0x2d4   : > { %v1015_v51 = vadd.f32 %v2748_v43, %v646_v39  ;;  %v1031_v52 = vadd.f32 %v2796_v44, %v662_v41  ;;  %v2751_v53 = vadd.f32 %v2750_v48, %v2749_v45  ;;  %v2799_v54 = vadd.f32 %v2798_v50, %v2797_v46  ;;  %v1109_v39 = vld [vmem:[%s4429_s22 + $0x20] sm:$0xff] (!%p2638_p2)  ;;  %v1111_v41 = vld [vmem:[%s4429_s22 + $0x30] sm:$0xff] (!%p2638_p2)  ;;  %v1114_v44 = vld [vmem:[%s4429_s22 + $0x48] sm:$0xff] (!%p2638_p2) }
 0x2d5   : > { %v3316_v43 = vld [vmem:[#allocation11] sm:$0xff] (!%p2638_p2)   ;;  %v3317_v45 = vld [vmem:[#allocation11 + $0x48] sm:$0xff] (!%p2638_p2)   ;;  %v3319_v48 = vld [vmem:[#allocation11 + $0x50] sm:$0xff] (!%p2638_p2)  }
 0x2d6   : > { %1047 = vst [vmem:[#allocation2 + $0x50] sm:$0xff] %v1015_v51  ;;  %1063 = vst [vmem:[#allocation2 + $0xd0] sm:$0xff] %v1031_v52  ;;  %v1016_v55 = vadd.f32 %v2751_v53, %v647_v47  ;;  %v1032_v56 = vadd.f32 %v2799_v54, %v663_v49  ;;  %1154 = vperm.xlu1 (!%p2638_p2), %3314, %v1108_v36   ;;  %1144 = vperm.xlu0 (!%p2638_p2), %3313, %v1106_v37   ;;  %v1113_v46 = vld [vmem:[%s4429_s22 + $0x40] sm:$0xff] (!%p2638_p2)  ;;  %v3318_v47 = vld [vmem:[#allocation11 + $0x8] sm:$0xff] (!%p2638_p2)  }
 0x2d7   : > { %2813 = vmatpush3.bf16.msra.mxu0 (!%p2638_p2), %v3316_v43  ;;  %v1116_v49 = vld [vmem:[%s4429_s22 + $0x58] sm:$0xff] (!%p2638_p2)  ;;  %v1115_v50 = vld [vmem:[%s4429_s22 + $0x50] sm:$0xff] (!%p2638_p2)  ;;  %v1118_v53 = vld [vmem:[%s4429_s22 + $0x68] sm:$0xff] (!%p2638_p2) }
 0x2d8   : > { %1048 = vst [vmem:[#allocation2 + $0x58] sm:$0xff] %v1016_v55  ;;  %1064 = vst [vmem:[#allocation2 + $0xd8] sm:$0xff] %v1032_v56  ;;  %v2752_v57 = vpop.f32.mrb[24].mxu0  ;;  %v2800_v58 = vpop.f32.mrb[24].mxu1  ;;  %2814 = vmatprep.subr.bf16.mxu0 (!%p2638_p2), %v3317_v45  ;;  %v3320_v51 = vld [vmem:[#allocation11 + $0x10] sm:$0xff] (!%p2638_p2)   ;;  %v3321_v52 = vld [vmem:[#allocation11 + $0x58] sm:$0xff] (!%p2638_p2)  }
 0x2d9   : > { %v2753_v60 = vpop.f32.mrb[25].mxu0  ;;  %v2801_v62 = vpop.f32.mrb[25].mxu1  ;;  %v1117_v54 = vld [vmem:[%s4429_s22 + $0x60] sm:$0xff] (!%p2638_p2)  ;;  %v3322_v55 = vld [vmem:[#allocation11 + $0x18] sm:$0xff] (!%p2638_p2)   ;;  %v3333_v36 = vld [vmem:[%s4422_s1 + $0x10] sm:$0xff] (!%p2638_p2)  }
 0x2da   : > { %v2754_v63 = vadd.f32 %v2753_v60, %v2752_v57  ;;  %v2802_v0 = vadd.f32 %v2801_v62, %v2800_v58  ;;  %v2755_v1 = vpop.f32.mrb[26].mxu0  ;;  %v2803_v2 = vpop.f32.mrb[26].mxu1  ;;  %1164 = vperm.xlu1 (!%p2638_p2), %3314, %v1110_v38   ;;  %1159 = vperm.xlu0 (!%p2638_p2), %3313, %v1109_v39   ;;  %v3323_v56 = vld [vmem:[#allocation11 + $0x60] sm:$0xff] (!%p2638_p2)   ;;  %v1120_v57 = vld [vmem:[%s4429_s22 + $0x78] sm:$0xff] (!%p2638_p2)  ;;  %v1119_v58 = vld [vmem:[%s4429_s22 + $0x70] sm:$0xff] (!%p2638_p2) }
 0x2db   : > { %v2756_v4 = vpop.f32.mrb[27].mxu0  ;;  %v2804_v6 = vpop.f32.mrb[27].mxu1  ;;  %2815 = vmatpush3.bf16.msra.mxu0 (!%p2638_p2), %v3318_v47  ;;  %v3325_v60 = vld [vmem:[#allocation11 + $0x68] sm:$0xff] (!%p2638_p2)   ;;  %v1080_v47 = vld [vmem:[#allocation2 + $0x38] sm:$0xff] (!%p2638_p2) }
 0x2dc   : > { %v1017_v7 = vadd.f32 %v2754_v63, %v648_v59  ;;  %v1033_v8 = vadd.f32 %v2802_v0, %v664_v61  ;;  %v2757_v9 = vadd.f32 %v2756_v4, %v2755_v1  ;;  %v2805_v10 = vadd.f32 %v2804_v6, %v2803_v2  ;;  %2816 = vmatprep.subr.bf16.mxu0 (!%p2638_p2), %v3319_v48  ;;  %v3324_v59 = vld [vmem:[#allocation11 + $0x20] sm:$0xff] (!%p2638_p2)   ;;  %v1122_v62 = vld [vmem:[%s4429_s22 + $0x88] sm:$0xff] (!%p2638_p2)  ;;  %v3327_v1 = vld [vmem:[#allocation11 + $0x70] sm:$0xff] (!%p2638_p2)  }
 0x2dd   : > { %v3331_v61 = vld [vmem:[%s4422_s1] sm:$0xff] (!%p2638_p2)   ;;  %v3326_v0 = vld [vmem:[#allocation11 + $0x28] sm:$0xff] (!%p2638_p2)   ;;  %v1124_v2 = vld [vmem:[%s4429_s22 + $0x98] sm:$0xff] (!%p2638_p2) }
 0x2de   : > { %1049 = vst [vmem:[#allocation2 + $0x60] sm:$0xff] %v1017_v7  ;;  %1065 = vst [vmem:[#allocation2 + $0xe0] sm:$0xff] %v1033_v8  ;;  %v1018_v11 = vadd.f32 %v2757_v9, %v649_v3  ;;  %v1034_v12 = vadd.f32 %v2805_v10, %v665_v5  ;;  %1174 = vperm.xlu1 (!%p2638_p2), %3314, %v1112_v40   ;;  %1169 = vperm.xlu0 (!%p2638_p2), %3313, %v1111_v41   ;;  %v1121_v63 = vld [vmem:[%s4429_s22 + $0x80] sm:$0xff] (!%p2638_p2)  ;;  %v1123_v3 = vld [vmem:[%s4429_s22 + $0x90] sm:$0xff] (!%p2638_p2) }
 0x2df   : > { %2817 = vmatpush3.bf16.msra.mxu0 (!%p2638_p2), %v3320_v51  ;;  %1640 = vmatprep.mubr.bf16.mxu0 (!%p2638_p2), %v3331_v61  ;;  %v3328_v4 = vld [vmem:[#allocation11 + $0x30] sm:$0xff] (!%p2638_p2)   ;;  %v3329_v5 = vld [vmem:[#allocation11 + $0x78] sm:$0xff] (!%p2638_p2)   ;;  %v1126_v6 = vld [vmem:[%s4429_s22 + $0xa8] sm:$0xff] (!%p2638_p2) }
 0x2e0   : > { %1050 = vst [vmem:[#allocation2 + $0x68] sm:$0xff] %v1018_v11  ;;  %1066 = vst [vmem:[#allocation2 + $0xe8] sm:$0xff] %v1034_v12  ;;  %v2758_v13 = vpop.f32.mrb[28].mxu0  ;;  %v2806_v14 = vpop.f32.mrb[28].mxu1  ;;  %2818 = vmatprep.subr.bf16.mxu0 (!%p2638_p2), %v3321_v52  ;;  %v1125_v7 = vld [vmem:[%s4429_s22 + $0xa0] sm:$0xff] (!%p2638_p2)  ;;  %v3330_v8 = vld [vmem:[#allocation11 + $0x38] sm:$0xff] (!%p2638_p2)  }
 0x2e1   : > { %v2759_v16 = vpop.f32.mrb[29].mxu0  ;;  %v2807_v18 = vpop.f32.mrb[29].mxu1  ;;  %v1128_v9 = vld [vmem:[%s4429_s22 + $0xb8] sm:$0xff] (!%p2638_p2)  ;;  %v1127_v10 = vld [vmem:[%s4429_s22 + $0xb0] sm:$0xff] (!%p2638_p2)  ;;  %v1130_v11 = vld [vmem:[%s4429_s22 + $0xc8] sm:$0xff] (!%p2638_p2) }
 0x2e2   : > { %v2760_v19 = vadd.f32 %v2759_v16, %v2758_v13  ;;  %v2808_v20 = vadd.f32 %v2807_v18, %v2806_v14  ;;  %v2761_v21 = vpop.f32.mrb[30].mxu0  ;;  %v2809_v22 = vpop.f32.mrb[30].mxu1  ;;  %1072 = sbr.rel (%p2638_p2) target bundleno = 1641 (0x669), region = 108  ;;  %1184 = vperm.xlu1 (!%p2638_p2), %3314, %v1114_v44   ;;  %1179 = vperm.xlu0 (!%p2638_p2), %3313, %v1113_v46   ;;  %v1129_v12 = vld [vmem:[%s4429_s22 + $0xc0] sm:$0xff] (!%p2638_p2)  ;;  %v1132_v13 = vld [vmem:[%s4429_s22 + $0xd8] sm:$0xff] (!%p2638_p2)  ;;  %v1131_v14 = vld [vmem:[%s4429_s22 + $0xd0] sm:$0xff] (!%p2638_p2) }
 0x2e3   : > { %v2762_v24 = vpop.f32.mrb[31].mxu0  ;;  %v2810_v26 = vpop.f32.mrb[31].mxu1  ;;  %2819 = vmatpush3.bf16.msra.mxu0 (!%p2638_p2), %v3322_v55  ;;  %v1133_v16 = vld [vmem:[%s4429_s22 + $0xe0] sm:$0xff] (!%p2638_p2)  ;;  %v1135_v18 = vld [vmem:[%s4429_s22 + $0xf0] sm:$0xff] (!%p2638_p2)  ;;  %v1078_v39 = vld [vmem:[#allocation2 + $0x28] sm:$0xff] (!%p2638_p2) }
 0x2e4   : > { %v1019_v27 = vadd.f32 %v2760_v19, %v650_v15  ;;  %v1035_v28 = vadd.f32 %v2808_v20, %v666_v17  ;;  %v2763_v29 = vadd.f32 %v2762_v24, %v2761_v21  ;;  %v2811_v30 = vadd.f32 %v2810_v26, %v2809_v22  ;;  %2820 = vmatprep.subr.bf16.mxu0 (!%p2638_p2), %v3323_v56  ;;  %v1134_v15 = vld [vmem:[%s4429_s22 + $0xe8] sm:$0xff] (!%p2638_p2)  ;;  %v1136_v17 = vld [vmem:[%s4429_s22 + $0xf8] sm:$0xff] (!%p2638_p2)  ;;  %v1073_v22 = vld [vmem:[#allocation2] sm:$0xff] (!%p2638_p2) }
 0x2e5   : > { %v3347_v20 = vld [vmem:[#allocation14] sm:$0xff] (!%p2638_p2)   ;;  %v3348_v21 = vld [vmem:[#allocation14 + $0x8] sm:$0xff] (!%p2638_p2)   ;;  %v3334_v44 = vld [vmem:[%s4422_s1 + $0x18] sm:$0xff] (!%p2638_p2)  }
 0x2e6   : > { %1051 = vst [vmem:[#allocation2 + $0x70] sm:$0xff] %v1019_v27  ;;  %1067 = vst [vmem:[#allocation2 + $0xf0] sm:$0xff] %v1035_v28  ;;  %v1020_v31 = vadd.f32 %v2763_v29, %v651_v23  ;;  %v1036_v32 = vadd.f32 %v2811_v30, %v667_v25  ;;  %1194 = vperm.xlu1 (!%p2638_p2), %3314, %v1116_v49   ;;  %1189 = vperm.xlu0 (!%p2638_p2), %3313, %v1115_v50   ;;  %v1074_v23 = vld [vmem:[#allocation2 + $0x8] sm:$0xff] (!%p2638_p2)  ;;  %v3349_v28 = vld [vmem:[#allocation14 + $0x10] sm:$0xff] (!%p2638_p2)  }
 0x2e7   : > { %2821 = vmatpush3.bf16.msra.mxu0 (!%p2638_p2), %v3324_v59  ;;  %2972 = vmatprep.subr.bf16.mxu1 (!%p2638_p2), %v3347_v20  ;;  %v3332_v29 = vld [vmem:[%s4422_s1 + $0x8] sm:$0xff] (!%p2638_p2)   ;;  %v1077_v41 = vld [vmem:[#allocation2 + $0x20] sm:$0xff] (!%p2638_p2)  ;;  %v1079_v49 = vld [vmem:[#allocation2 + $0x30] sm:$0xff] (!%p2638_p2) }
 0x2e8   : > { %1052 = vst [vmem:[#allocation2 + $0x78] sm:$0xff] %v1020_v31  ;;  %1068 = vst [vmem:[#allocation2 + $0xf8] sm:$0xff] %v1036_v32  ;;  %2822 = vmatprep.subr.bf16.mxu0 (!%p2638_p2), %v3325_v60  ;;  %2973 = vmatpush3.bf16.msra.mxu1 (!%p2638_p2), %v3347_v20  ;;  %v1075_v31 = vld [vmem:[#allocation2 + $0x10] sm:$0xff] (!%p2638_p2)  ;;  %v1076_v32 = vld [vmem:[#allocation2 + $0x18] sm:$0xff] (!%p2638_p2) }
 0x2e9   : > { %2974 = vmatprep.subr.bf16.mxu1 %v3348_v21  ;;  %v3335_v52 = vld [vmem:[%s4422_s1 + $0x20] sm:$0xff]   ;;  %v1082_v55 = vld [vmem:[#allocation2 + $0x48] sm:$0xff] }
 0x2ea   : > { %1204 = vperm.xlu1 %3314, %v1118_v53   ;;  %1199 = vperm.xlu0 %3313, %v1117_v54   ;;  %v3336_v60 = vld [vmem:[%s4422_s1 + $0x28] sm:$0xff]   ;;  %v3339_v20 = vld [vmem:[%s4422_s1 + $0x40] sm:$0xff]  }
 0x2eb   : > { %2823 = vmatpush3.bf16.msra.mxu0 %v3326_v0 }
 0x2ec   : > { %2824 = vmatprep.subr.bf16.mxu0 %v3327_v1  ;;  %2975 = vmatpush3.bf16.msra.mxu1 %v3348_v21  ;;  %v1083_v1 = vld [vmem:[#allocation2 + $0x50] sm:$0xff] }
 0x2ed   : > { %2976 = vmatprep.subr.bf16.mxu1 %v3349_v28 }
 0x2ee   : > { %1214 = vperm.xlu1 %3314, %v1120_v57   ;;  %1209 = vperm.xlu0 %3313, %v1119_v58   ;;  %v1081_v57 = vld [vmem:[#allocation2 + $0x40] sm:$0xff] }
 0x2ef   : > { %2825 = vmatpush3.bf16.msra.mxu0 %v3328_v4  ;;  %v3337_v4 = vld [vmem:[%s4422_s1 + $0x30] sm:$0xff]  }
 0x2f0   : > { %2826 = vmatprep.subr.bf16.mxu0 %v3329_v5  ;;  %2977 = vmatpush3.bf16.msra.mxu1 %v3349_v28  ;;  %v3340_v28 = vld [vmem:[%s4422_s1 + $0x48] sm:$0xff]  }
 0x2f2   : > { %1224 = vperm.xlu1 %3314, %v1122_v62   ;;  %1219 = vperm.xlu0 %3313, %v1121_v63   ;;  %v1084_v63 = vld [vmem:[#allocation2 + $0x58] sm:$0xff] }
 0x2f3   : > { %2827 = vmatpush3.bf16.msra.mxu0 %v3330_v8 }
 0x2f6   : > { %1234 = vperm.xlu1 %3314, %v1124_v2   ;;  %1229 = vperm.xlu0 %3313, %v1123_v3  }
 0x2fa   : > { %1244 = vperm.xlu1 %3314, %v1126_v6   ;;  %1239 = vperm.xlu0 %3313, %v1125_v7   ;;  %v1086_v7 = vld [vmem:[#allocation2 + $0x68] sm:$0xff] }
 0x2fe   : > { %1254 = vperm.xlu1 %3314, %v1128_v9   ;;  %1249 = vperm.xlu0 %3313, %v1127_v10   ;;  %v1085_v9 = vld [vmem:[#allocation2 + $0x60] sm:$0xff] }
 0x302   : > { %1264 = vperm.xlu1 %3314, %v1130_v11   ;;  %1259 = vperm.xlu0 %3313, %v1129_v12   ;;  %v3338_v12 = vld [vmem:[%s4422_s1 + $0x38] sm:$0xff]  }
 0x306   : > { %1274 = vperm.xlu1 %3314, %v1132_v13   ;;  %1269 = vperm.xlu0 %3313, %v1131_v14  }
 0x30a   : > { %1284 = vperm.xlu1 %3314, %v1134_v15   ;;  %1279 = vperm.xlu0 %3313, %v1133_v16   ;;  %v1088_v15 = vld [vmem:[#allocation2 + $0x78] sm:$0xff] }
 0x30e   : > { %1294 = vperm.xlu1 %3314, %v1136_v17   ;;  %1289 = vperm.xlu0 %3313, %v1135_v18   ;;  %v1087_v17 = vld [vmem:[#allocation2 + $0x70] sm:$0xff] }
 0x351   : > { %v1140_v19 = vpop.permute.xlu0 %1139  ;;  %v1150_v24 = vpop.permute.xlu1 %1149 }
 0x352   : > { %v1297_v26 = vmul.f32 %v1140_v19, %v1073_v22  ;;  %v1299_v34 = vmul.f32 %v1150_v24, %v1075_v31  ;;  %v1092_v31 = vld [vmem:[#allocation2 + $0x98] sm:$0xff] }
 0x355   : > { %v1145_v25 = vpop.permute.xlu0 %1144  ;;  %v1155_v33 = vpop.permute.xlu1 %1154 }
 0x356   : > { %v1298_v27 = vmul.f32 %v1145_v25, %v1074_v23  ;;  %v1300_v35 = vmul.f32 %v1155_v33, %v1076_v32  ;;  %v1090_v23 = vld [vmem:[#allocation2 + $0x88] sm:$0xff]  ;;  %v1089_v25 = vld [vmem:[#allocation2 + $0x80] sm:$0xff]  ;;  %v1091_v33 = vld [vmem:[#allocation2 + $0x90] sm:$0xff] }
 0x358   : > { %v1329_v30 = vpack.c.bf16 %v1298_v27, %v1297_v26  ;;  %v1330_v37 = vpack.c.bf16 %v1300_v35, %v1299_v34 }
 0x359   : > { %v1165_v38 = vpop.permute.xlu1 %1164  ;;  %v1160_v40 = vpop.permute.xlu0 %1159 }
 0x35a   : > { %1641 = vmatmul.mubr.bf16.vlgmr.msra.gmra.mrb[0].mxu0 %v1329_v30  ;;  %v1302_v42 = vmul.f32 %v1165_v38, %v1078_v39  ;;  %v1301_v43 = vmul.f32 %v1160_v40, %v1077_v41  ;;  %v1094_v39 = vld [vmem:[#allocation2 + $0xa8] sm:$0xff]  ;;  %v1093_v41 = vld [vmem:[#allocation2 + $0xa0] sm:$0xff] }
 0x35b   : > { %1648 = vmatprep.mubr.bf16.mxu0 %v3332_v29 }
 0x35c   : > { %v1331_v45 = vpack.c.bf16 %v1302_v42, %v1301_v43 }
 0x35d   : > { %v1175_v46 = vpop.permute.xlu1 %1174  ;;  %v1170_v48 = vpop.permute.xlu0 %1169 }
 0x35e   : > { %v1304_v50 = vmul.f32 %v1175_v46, %v1080_v47  ;;  %v1303_v51 = vmul.f32 %v1170_v48, %v1079_v49  ;;  %v1096_v47 = vld [vmem:[#allocation2 + $0xb8] sm:$0xff]  ;;  %v1095_v49 = vld [vmem:[#allocation2 + $0xb0] sm:$0xff] }
 0x360   : > { %v1332_v53 = vpack.c.bf16 %v1304_v50, %v1303_v51  ;;  %v3350_v50 = vld [vmem:[#allocation14 + $0x18] sm:$0xff]  }
 0x361   : > { %v1185_v54 = vpop.permute.xlu1 %1184  ;;  %v1180_v56 = vpop.permute.xlu0 %1179  ;;  %2978 = vmatprep.subr.bf16.mxu1 %v3350_v50 }
 0x362   : > { %1649 = vmatmul.mubr.bf16.gmra.mrb[4].mxu0 %v1330_v37  ;;  %v1306_v58 = vmul.f32 %v1185_v54, %v1082_v55  ;;  %v1305_v59 = vmul.f32 %v1180_v56, %v1081_v57  ;;  %2979 = vmatpush3.bf16.msra.mxu1 %v3350_v50  ;;  %v3351_v54 = vld [vmem:[#allocation14 + $0x20] sm:$0xff]  }
 0x363   : > { %1656 = vmatprep.mubr.bf16.mxu0 %v3333_v36  ;;  %v3341_v36 = vld [vmem:[%s4422_s1 + $0x50] sm:$0xff]   ;;  %v1098_v57 = vld [vmem:[#allocation2 + $0xc8] sm:$0xff]  ;;  %2980 = vmatprep.subr.bf16.mxu1 %v3351_v54 }
 0x364   : > { %v1333_v61 = vpack.c.bf16 %v1306_v58, %v1305_v59  ;;  %v1097_v59 = vld [vmem:[#allocation2 + $0xc0] sm:$0xff] }
 0x365   : > { %v1195_v62 = vpop.permute.xlu1 %1194  ;;  %v1190_v0 = vpop.permute.xlu0 %1189 }
 0x366   : > { %v1308_v2 = vmul.f32 %v1195_v62, %v1084_v63  ;;  %v1307_v3 = vmul.f32 %v1190_v0, %v1083_v1  ;;  %2981 = vmatpush3.bf16.msra.mxu1 %v3351_v54  ;;  %v3344_v63 = vld [vmem:[%s4422_s1 + $0x68] sm:$0xff]   ;;  %v3353_v0 = vld [vmem:[#allocation14 + $0x30] sm:$0xff]  }
 0x367   : > { %v3356_v54 = vld [vmem:[#allocation17 + $0x8] sm:$0xff]  }
 0x368   : > { %v1334_v5 = vpack.c.bf16 %v1308_v2, %v1307_v3  ;;  %v1100_v3 = vld [vmem:[#allocation2 + $0xd8] sm:$0xff] }
 0x369   : > { %v1205_v6 = vpop.permute.xlu1 %1204  ;;  %v1200_v8 = vpop.permute.xlu0 %1199 }
 0x36a   : > { %1657 = vmatmul.mubr.bf16.gmra.mrb[8].mxu0 %v1331_v45  ;;  %v1310_v10 = vmul.f32 %v1205_v6, %v1086_v7  ;;  %v1309_v11 = vmul.f32 %v1200_v8, %v1085_v9  ;;  %v3354_v6 = vld [vmem:[#allocation14 + $0x38] sm:$0xff]   ;;  %v3345_v9 = vld [vmem:[%s4422_s1 + $0x70] sm:$0xff]  }
 0x36b   : > { %1664 = vmatprep.mubr.bf16.mxu0 %v3334_v44  ;;  %v3342_v44 = vld [vmem:[%s4422_s1 + $0x58] sm:$0xff]  }
 0x36c   : > { %v1335_v13 = vpack.c.bf16 %v1310_v10, %v1309_v11 }
 0x36d   : > { %v1215_v14 = vpop.permute.xlu1 %1214  ;;  %v1210_v16 = vpop.permute.xlu0 %1209 }
 0x36e   : > { %v1312_v18 = vmul.f32 %v1215_v14, %v1088_v15  ;;  %v1311_v19 = vmul.f32 %v1210_v16, %v1087_v17  ;;  %v1101_v14 = vld [vmem:[#allocation2 + $0xe0] sm:$0xff]  ;;  %v3346_v17 = vld [vmem:[%s4422_s1 + $0x78] sm:$0xff]  }
 0x370   : > { %v1336_v21 = vpack.c.bf16 %v1312_v18, %v1311_v19 }
 0x371   : > { %v1225_v22 = vpop.permute.xlu1 %1224  ;;  %v1220_v24 = vpop.permute.xlu0 %1219 }
 0x372   : > { %1665 = vmatmul.mubr.bf16.gmra.mrb[12].mxu0 %v1332_v53  ;;  %v1314_v26 = vmul.f32 %v1225_v22, %v1090_v23  ;;  %v1313_v27 = vmul.f32 %v1220_v24, %v1089_v25  ;;  %v3343_v53 = vld [vmem:[%s4422_s1 + $0x60] sm:$0xff]   ;;  %v1103_v22 = vld [vmem:[#allocation2 + $0xf0] sm:$0xff] }
 0x373   : > { %1672 = vmatprep.mubr.bf16.mxu0 %v3335_v52 }
 0x374   : > { %v1337_v29 = vpack.c.bf16 %v1314_v26, %v1313_v27 }
 0x375   : > { %v1235_v30 = vpop.permute.xlu1 %1234  ;;  %v1230_v32 = vpop.permute.xlu0 %1229 }
 0x376   : > { %v1316_v34 = vmul.f32 %v1235_v30, %v1092_v31  ;;  %v1315_v35 = vmul.f32 %v1230_v32, %v1091_v33 }
 0x378   : > { %v1338_v37 = vpack.c.bf16 %v1316_v34, %v1315_v35  ;;  %v3355_v34 = vld [vmem:[#allocation17] sm:$0xff]  }
 0x379   : > { %v1245_v38 = vpop.permute.xlu1 %1244  ;;  %v1240_v40 = vpop.permute.xlu0 %1239 }
 0x37a   : > { %1673 = vmatmul.mubr.bf16.gmra.mrb[16].mxu0 %v1333_v61  ;;  %v1318_v42 = vmul.f32 %v1245_v38, %v1094_v39  ;;  %v1317_v43 = vmul.f32 %v1240_v40, %v1093_v41 }
 0x37b   : > { %1680 = vmatprep.mubr.bf16.mxu0 %v3336_v60  ;;  %v3352_v60 = vld [vmem:[#allocation14 + $0x28] sm:$0xff]  }
 0x37c   : > { %v1339_v45 = vpack.c.bf16 %v1318_v42, %v1317_v43  ;;  %2982 = vmatprep.subr.bf16.mxu1 %v3352_v60 }
 0x37d   : > { %v1255_v46 = vpop.permute.xlu1 %1254  ;;  %v1250_v48 = vpop.permute.xlu0 %1249  ;;  %2983 = vmatpush3.bf16.msra.mxu1 %v3352_v60 }
 0x37e   : > { %v1320_v51 = vmul.f32 %v1255_v46, %v1096_v47  ;;  %v1319_v52 = vmul.f32 %v1250_v48, %v1095_v49  ;;  %2984 = vmatprep.subr.bf16.mxu1 %v3353_v0 }
 0x380   : > { %v1340_v55 = vpack.c.bf16 %v1320_v51, %v1319_v52 }
 0x381   : > { %v1265_v56 = vpop.permute.xlu1 %1264  ;;  %v1260_v58 = vpop.permute.xlu0 %1259  ;;  %2985 = vmatpush3.bf16.msra.mxu1 %v3353_v0 }
 0x382   : > { %1681 = vmatmul.mubr.bf16.gmra.mrb[20].mxu0 %v1334_v5  ;;  %v1322_v61 = vmul.f32 %v1265_v56, %v1098_v57  ;;  %v1321_v62 = vmul.f32 %v1260_v58, %v1097_v59  ;;  %v1099_v5 = vld [vmem:[#allocation2 + $0xd0] sm:$0xff]  ;;  %2986 = vmatprep.subr.bf16.mxu1 %v3354_v6 }
 0x383   : > { %1688 = vmatprep.mubr.bf16.mxu0 %v3337_v4  ;;  %v3357_v59 = vld [vmem:[#allocation17 + $0x10] sm:$0xff]  }
 0x384   : > { %v1341_v1 = vpack.c.bf16 %v1322_v61, %v1321_v62 }
 0x385   : > { %v1275_v2 = vpop.permute.xlu1 %1274  ;;  %v1270_v4 = vpop.permute.xlu0 %1269  ;;  %2987 = vmatpush3.bf16.msra.mxu1 %v3354_v6 }
 0x386   : > { %v1324_v7 = vmul.f32 %v1275_v2, %v1100_v3  ;;  %v1323_v8 = vmul.f32 %v1270_v4, %v1099_v5  ;;  %3020 = vmatprep.subr.bf16.mxu1 %v3355_v34  ;;  %v3358_v3 = vld [vmem:[#allocation17 + $0x18] sm:$0xff]  }
 0x388   : > { %v1342_v10 = vpack.c.bf16 %v1324_v7, %v1323_v8  ;;  %v3359_v8 = vld [vmem:[#allocation17 + $0x20] sm:$0xff]  }
 0x389   : > { %v1285_v11 = vpop.permute.xlu1 %1284 }
 0x38a   : > { %1689 = vmatmul.mubr.bf16.gmra.mrb[24].mxu0 %v1335_v13  ;;  %v1280_v13 = vpop.permute.xlu0 %1279 }
 0x38b   : > { %1696 = vmatprep.mubr.bf16.mxu0 %v3338_v12  ;;  %v1102_v12 = vld [vmem:[#allocation2 + $0xe8] sm:$0xff]  ;;  %v1325_v16 = vmul.f32 %v1280_v13, %v1101_v14 }
 0x38c   : > { %v1326_v15 = vmul.f32 %v1285_v11, %v1102_v12 }
 0x38d   : > { %v1295_v19 = vpop.permute.xlu1 %1294 }
 0x38e   : > { %v1343_v18 = vpack.c.bf16 %v1326_v15, %v1325_v16  ;;  %v3360_v16 = vld [vmem:[#allocation17 + $0x28] sm:$0xff]  }
 0x392   : > { %1697 = vmatmul.mubr.bf16.gmra.mrb[28].mxu0 %v1336_v21  ;;  %v1290_v21 = vpop.permute.xlu0 %1289 }
 0x393   : > { %1704 = vmatprep.mubr.bf16.mxu0 %v3339_v20  ;;  %v1104_v20 = vld [vmem:[#allocation2 + $0xf8] sm:$0xff]  ;;  %v1327_v24 = vmul.f32 %v1290_v21, %v1103_v22 }
 0x394   : > { %v1328_v23 = vmul.f32 %v1295_v19, %v1104_v20 }
 0x396   : > { %v1344_v25 = vpack.c.bf16 %v1328_v23, %v1327_v24 }
 0x39a   : > { %1705 = vmatmul.mubr.bf16.gmra.mrb[32].mxu0 %v1337_v29 }
 0x39b   : > { %1712 = vmatprep.mubr.bf16.mxu0 %v3340_v28  ;;  %v4535_v28 = vld [vmem:[#allocation12] ss:$0 sm:$0xff] }
 0x3a2   : > { %1713 = vmatmul.mubr.bf16.gmra.mrb[36].mxu0 %v1338_v37 }
 0x3a3   : > { %1720 = vmatprep.mubr.bf16.mxu0 %v3341_v36 }
 0x3aa   : > { %1721 = vmatmul.mubr.bf16.gmra.mrb[40].mxu0 %v1339_v45 }
 0x3ab   : > { %1728 = vmatprep.mubr.bf16.mxu0 %v3342_v44 }
 0x3b2   : > { %1729 = vmatmul.mubr.bf16.gmra.mrb[44].mxu0 %v1340_v55 }
 0x3b3   : > { %1736 = vmatprep.mubr.bf16.mxu0 %v3343_v53 }
 0x3ba   : > { %1737 = vmatmul.mubr.bf16.gmra.mrb[48].mxu0 %v1341_v1 }
 0x3bb   : > { %1744 = vmatprep.mubr.bf16.mxu0 %v3344_v63 }
 0x3c2   : > { %1745 = vmatmul.mubr.bf16.gmra.mrb[52].mxu0 %v1342_v10 }
 0x3c3   : > { %1752 = vmatprep.mubr.bf16.mxu0 %v3345_v9 }
 0x3ca   : > { %1753 = vmatmul.mubr.bf16.gmra.mrb[56].mxu0 %v1343_v18 }
 0x3cb   : > { %1760 = vmatprep.mubr.bf16.mxu0 %v3346_v17 }
 0x3d2   : > { %1761 = vmatmul.mubr.bf16.gmra.mrb[60].mxu0 %v1344_v25 }
 0x42d   : > { %v2828_v26 = vpop.f32.mrb[0].mxu0 }
 0x42e   : > { %v2829_v27 = vpop.f32.mrb[1].mxu0 }
 0x42f   : > { %v2830_v29 = vadd.f32 %v2829_v27, %v2828_v26  ;;  %v2831_v30 = vpop.f32.mrb[2].mxu0 }
 0x430   : > { %v2832_v31 = vpop.f32.mrb[3].mxu0 }
 0x431   : > { %v2833_v32 = vadd.f32 %v2832_v31, %v2831_v30  ;;  %v1643_v33 = vadd.f32 %v2830_v29, %v4535_v28 }
 0x433   : > { %v1646_v35 = vadd.f32 %v2833_v32, %v4535_v28  ;;  %v1769_v37 = vmax.f32 %v1643_v33, 0.0 }
 0x435   : > { %v2834_v36 = vpop.f32.mrb[4].mxu0  ;;  %v1770_v38 = vmax.f32 %v1646_v35, 0.0 }
 0x436   : > { %v2835_v39 = vpop.f32.mrb[5].mxu0 }
 0x437   : > { %v2836_v40 = vadd.f32 %v2835_v39, %v2834_v36  ;;  %v2837_v41 = vpop.f32.mrb[6].mxu0  ;;  %v1801_v42 = vpack.c.bf16 %v1770_v38, %v1769_v37 }
 0x438   : > { %v2838_v43 = vpop.f32.mrb[7].mxu0 }
 0x439   : > { %v1651_v44 = vadd.f32 %v2836_v40, %v4535_v28  ;;  %v2839_v45 = vadd.f32 %v2838_v43, %v2837_v41  ;;  %2988 = vmatprep.mubr.bf16.mxu1 %v1801_v42 }
 0x43b   : > { %v1654_v46 = vadd.f32 %v2839_v45, %v4535_v28  ;;  %v1771_v47 = vmax.f32 %v1651_v44, 0.0 }
 0x43d   : > { %v1772_v48 = vmax.f32 %v1654_v46, 0.0  ;;  %v2840_v49 = vpop.f32.mrb[8].mxu0 }
 0x43e   : > { %v2841_v50 = vpop.f32.mrb[9].mxu0 }
 0x43f   : > { %v2842_v51 = vadd.f32 %v2841_v50, %v2840_v49  ;;  %v2843_v52 = vpop.f32.mrb[10].mxu0  ;;  %v1802_v53 = vpack.c.bf16 %v1772_v48, %v1771_v47 }
 0x440   : > { %v2844_v55 = vpop.f32.mrb[11].mxu0 }
 0x441   : > { %v1659_v56 = vadd.f32 %v2842_v51, %v4535_v28  ;;  %v2845_v57 = vadd.f32 %v2844_v55, %v2843_v52  ;;  %2989 = vmatmul.mubr.bf16.vlgmr.msra.gmra.mrb[0].mxu1 %v1802_v53 }
 0x442   : > { %3021 = vmatpush3.bf16.msra.mxu1 %v3355_v34 }
 0x443   : > { %v1662_v58 = vadd.f32 %v2845_v57, %v4535_v28  ;;  %3022 = vmatprep.subr.bf16.mxu1 %v3356_v54  ;;  %v1773_v60 = vmax.f32 %v1659_v56, 0.0 }
 0x445   : > { %v1774_v61 = vmax.f32 %v1662_v58, 0.0  ;;  %v2846_v62 = vpop.f32.mrb[12].mxu0 }
 0x446   : > { %v2847_v63 = vpop.f32.mrb[13].mxu0  ;;  %3023 = vmatpush3.bf16.msra.mxu1 %v3356_v54 }
 0x447   : > { %v2848_v0 = vadd.f32 %v2847_v63, %v2846_v62  ;;  %v2849_v1 = vpop.f32.mrb[14].mxu0  ;;  %v1803_v2 = vpack.c.bf16 %v1774_v61, %v1773_v60  ;;  %3024 = vmatprep.subr.bf16.mxu1 %v3357_v59 }
 0x448   : > { %v2850_v4 = vpop.f32.mrb[15].mxu0 }
 0x449   : > { %v1667_v5 = vadd.f32 %v2848_v0, %v4535_v28  ;;  %v2851_v6 = vadd.f32 %v2850_v4, %v2849_v1  ;;  %2992 = vmatprep.mubr.bf16.mxu1 %v1803_v2 }
 0x44a   : > { %3025 = vmatpush3.bf16.msra.mxu1 %v3357_v59 }
 0x44b   : > { %v1670_v7 = vadd.f32 %v2851_v6, %v4535_v28  ;;  %3026 = vmatprep.subr.bf16.mxu1 %v3358_v3  ;;  %v1775_v9 = vmax.f32 %v1667_v5, 0.0 }
 0x44d   : > { %v1776_v10 = vmax.f32 %v1670_v7, 0.0  ;;  %v2852_v11 = vpop.f32.mrb[16].mxu0 }
 0x44e   : > { %v2853_v12 = vpop.f32.mrb[17].mxu0  ;;  %3027 = vmatpush3.bf16.msra.mxu1 %v3358_v3 }
 0x44f   : > { %v2854_v13 = vadd.f32 %v2853_v12, %v2852_v11  ;;  %v2855_v14 = vpop.f32.mrb[18].mxu0  ;;  %v1804_v15 = vpack.c.bf16 %v1776_v10, %v1775_v9  ;;  %3028 = vmatprep.subr.bf16.mxu1 %v3359_v8 }
 0x450   : > { %v2856_v17 = vpop.f32.mrb[19].mxu0 }
 0x451   : > { %v1675_v18 = vadd.f32 %v2854_v13, %v4535_v28  ;;  %v2857_v19 = vadd.f32 %v2856_v17, %v2855_v14  ;;  %2993 = vmatmul.mubr.bf16.gmra.mrb[4].mxu1 %v1804_v15 }
 0x452   : > { %3029 = vmatpush3.bf16.msra.mxu1 %v3359_v8 }
 0x453   : > { %v1678_v20 = vadd.f32 %v2857_v19, %v4535_v28  ;;  %3030 = vmatprep.subr.bf16.mxu1 %v3360_v16  ;;  %v1777_v21 = vmax.f32 %v1675_v18, 0.0 }
 0x455   : > { %v1778_v22 = vmax.f32 %v1678_v20, 0.0  ;;  %v2858_v23 = vpop.f32.mrb[20].mxu0 }
 0x456   : > { %v2859_v24 = vpop.f32.mrb[21].mxu0  ;;  %3031 = vmatpush3.bf16.msra.mxu1 %v3360_v16 }
 0x457   : > { %v2860_v25 = vadd.f32 %v2859_v24, %v2858_v23  ;;  %v2861_v26 = vpop.f32.mrb[22].mxu0  ;;  %v1805_v27 = vpack.c.bf16 %v1778_v22, %v1777_v21 }
 0x458   : > { %v2862_v29 = vpop.f32.mrb[23].mxu0 }
 0x459   : > { %v1683_v30 = vadd.f32 %v2860_v25, %v4535_v28  ;;  %v2863_v31 = vadd.f32 %v2862_v29, %v2861_v26  ;;  %2996 = vmatprep.mubr.bf16.mxu1 %v1805_v27 }
 0x45b   : > { %v1686_v32 = vadd.f32 %v2863_v31, %v4535_v28  ;;  %v1779_v33 = vmax.f32 %v1683_v30, 0.0 }
 0x45d   : > { %v1780_v34 = vmax.f32 %v1686_v32, 0.0  ;;  %v2864_v35 = vpop.f32.mrb[24].mxu0 }
 0x45e   : > { %v2865_v36 = vpop.f32.mrb[25].mxu0 }
 0x45f   : > { %v2866_v37 = vadd.f32 %v2865_v36, %v2864_v35  ;;  %v2867_v38 = vpop.f32.mrb[26].mxu0  ;;  %v1806_v39 = vpack.c.bf16 %v1780_v34, %v1779_v33 }
 0x460   : > { %v2868_v40 = vpop.f32.mrb[27].mxu0 }
 0x461   : > { %v1691_v41 = vadd.f32 %v2866_v37, %v4535_v28  ;;  %v2869_v42 = vadd.f32 %v2868_v40, %v2867_v38  ;;  %2997 = vmatmul.mubr.bf16.gmra.mrb[8].mxu1 %v1806_v39 }
 0x463   : > { %v1694_v43 = vadd.f32 %v2869_v42, %v4535_v28  ;;  %v1781_v44 = vmax.f32 %v1691_v41, 0.0 }
 0x465   : > { %v1782_v45 = vmax.f32 %v1694_v43, 0.0  ;;  %v2870_v46 = vpop.f32.mrb[28].mxu0 }
 0x466   : > { %v2871_v47 = vpop.f32.mrb[29].mxu0 }
 0x467   : > { %v2872_v48 = vadd.f32 %v2871_v47, %v2870_v46  ;;  %v2873_v49 = vpop.f32.mrb[30].mxu0  ;;  %v1807_v50 = vpack.c.bf16 %v1782_v45, %v1781_v44 }
 0x468   : > { %v2874_v51 = vpop.f32.mrb[31].mxu0 }
 0x469   : > { %v1699_v52 = vadd.f32 %v2872_v48, %v4535_v28  ;;  %v2875_v53 = vadd.f32 %v2874_v51, %v2873_v49  ;;  %3000 = vmatprep.mubr.bf16.mxu1 %v1807_v50  ;;  %v3361_v50 = vld [vmem:[#allocation17 + $0x30] sm:$0xff]  }
 0x46a   : > { %3032 = vmatprep.subr.bf16.mxu1 %v3361_v50 }
 0x46b   : > { %v1702_v54 = vadd.f32 %v2875_v53, %v4535_v28  ;;  %v1783_v55 = vmax.f32 %v1699_v52, 0.0  ;;  %3033 = vmatpush3.bf16.msra.mxu1 %v3361_v50 }
 0x46d   : > { %v1784_v56 = vmax.f32 %v1702_v54, 0.0  ;;  %v2876_v57 = vpop.f32.mrb[32].mxu0 }
 0x46e   : > { %v2877_v58 = vpop.f32.mrb[33].mxu0 }
 0x46f   : > { %v2878_v59 = vadd.f32 %v2877_v58, %v2876_v57  ;;  %v2879_v60 = vpop.f32.mrb[34].mxu0  ;;  %v1808_v61 = vpack.c.bf16 %v1784_v56, %v1783_v55  ;;  %v3362_v58 = vld [vmem:[#allocation17 + $0x38] sm:$0xff]  }
 0x470   : > { %v2880_v62 = vpop.f32.mrb[35].mxu0  ;;  %3034 = vmatprep.subr.bf16.mxu1 %v3362_v58 }
 0x471   : > { %v1707_v63 = vadd.f32 %v2878_v59, %v4535_v28  ;;  %v2881_v0 = vadd.f32 %v2880_v62, %v2879_v60  ;;  %3001 = vmatmul.mubr.bf16.gmra.mrb[12].mxu1 %v1808_v61 }
 0x472   : > { %3035 = vmatpush3.bf16.msra.mxu1 %v3362_v58 }
 0x473   : > { %v1710_v1 = vadd.f32 %v2881_v0, %v4535_v28  ;;  %v1785_v2 = vmax.f32 %v1707_v63, 0.0 }
 0x475   : > { %v1786_v3 = vmax.f32 %v1710_v1, 0.0  ;;  %v2882_v4 = vpop.f32.mrb[36].mxu0 }
 0x476   : > { %v2883_v5 = vpop.f32.mrb[37].mxu0 }
 0x477   : > { %v2884_v6 = vadd.f32 %v2883_v5, %v2882_v4  ;;  %v2885_v7 = vpop.f32.mrb[38].mxu0  ;;  %v1809_v8 = vpack.c.bf16 %v1786_v3, %v1785_v2 }
 0x478   : > { %v2886_v9 = vpop.f32.mrb[39].mxu0 }
 0x479   : > { %v1715_v10 = vadd.f32 %v2884_v6, %v4535_v28  ;;  %v2887_v11 = vadd.f32 %v2886_v9, %v2885_v7  ;;  %3004 = vmatprep.mubr.bf16.mxu1 %v1809_v8 }
 0x47b   : > { %v1718_v12 = vadd.f32 %v2887_v11, %v4535_v28  ;;  %v1787_v13 = vmax.f32 %v1715_v10, 0.0 }
 0x47d   : > { %v1788_v14 = vmax.f32 %v1718_v12, 0.0  ;;  %v2888_v15 = vpop.f32.mrb[40].mxu0 }
 0x47e   : > { %v2889_v16 = vpop.f32.mrb[41].mxu0 }
 0x47f   : > { %v2890_v17 = vadd.f32 %v2889_v16, %v2888_v15  ;;  %v2891_v18 = vpop.f32.mrb[42].mxu0  ;;  %v1810_v19 = vpack.c.bf16 %v1788_v14, %v1787_v13 }
 0x480   : > { %v2892_v20 = vpop.f32.mrb[43].mxu0 }
 0x481   : > { %v1723_v21 = vadd.f32 %v2890_v17, %v4535_v28  ;;  %v2893_v22 = vadd.f32 %v2892_v20, %v2891_v18  ;;  %3005 = vmatmul.mubr.bf16.gmra.mrb[16].mxu1 %v1810_v19 }
 0x483   : > { %v1726_v23 = vadd.f32 %v2893_v22, %v4535_v28  ;;  %v1789_v24 = vmax.f32 %v1723_v21, 0.0  ;;  %v4569_v21 = vld [vmem:[#allocation15] ss:$0 sm:$0xff] }
 0x485   : > { %v1790_v25 = vmax.f32 %v1726_v23, 0.0  ;;  %v2894_v26 = vpop.f32.mrb[44].mxu0 }
 0x486   : > { %v2895_v27 = vpop.f32.mrb[45].mxu0 }
 0x487   : > { %v2896_v29 = vadd.f32 %v2895_v27, %v2894_v26  ;;  %v2897_v30 = vpop.f32.mrb[46].mxu0  ;;  %v1811_v31 = vpack.c.bf16 %v1790_v25, %v1789_v24 }
 0x488   : > { %v2898_v32 = vpop.f32.mrb[47].mxu0 }
 0x489   : > { %v1731_v33 = vadd.f32 %v2896_v29, %v4535_v28  ;;  %v2899_v34 = vadd.f32 %v2898_v32, %v2897_v30  ;;  %3008 = vmatprep.mubr.bf16.mxu1 %v1811_v31 }
 0x48b   : > { %v1734_v35 = vadd.f32 %v2899_v34, %v4535_v28  ;;  %v1791_v36 = vmax.f32 %v1731_v33, 0.0 }
 0x48d   : > { %v1792_v37 = vmax.f32 %v1734_v35, 0.0  ;;  %v2900_v38 = vpop.f32.mrb[48].mxu0 }
 0x48e   : > { %v2901_v39 = vpop.f32.mrb[49].mxu0 }
 0x48f   : > { %v2902_v40 = vadd.f32 %v2901_v39, %v2900_v38  ;;  %v2903_v41 = vpop.f32.mrb[50].mxu0  ;;  %v1812_v42 = vpack.c.bf16 %v1792_v37, %v1791_v36 }
 0x490   : > { %v2904_v43 = vpop.f32.mrb[51].mxu0 }
 0x491   : > { %v1739_v44 = vadd.f32 %v2902_v40, %v4535_v28  ;;  %v2905_v45 = vadd.f32 %v2904_v43, %v2903_v41  ;;  %3009 = vmatmul.mubr.bf16.gmra.mrb[20].mxu1 %v1812_v42 }
 0x493   : > { %v1742_v46 = vadd.f32 %v2905_v45, %v4535_v28  ;;  %v1793_v47 = vmax.f32 %v1739_v44, 0.0 }
 0x495   : > { %v1794_v48 = vmax.f32 %v1742_v46, 0.0  ;;  %v2906_v49 = vpop.f32.mrb[52].mxu0 }
 0x496   : > { %v2907_v51 = vpop.f32.mrb[53].mxu0 }
 0x497   : > { %v2908_v52 = vadd.f32 %v2907_v51, %v2906_v49  ;;  %v2909_v53 = vpop.f32.mrb[54].mxu0  ;;  %v1813_v54 = vpack.c.bf16 %v1794_v48, %v1793_v47 }
 0x498   : > { %v2910_v55 = vpop.f32.mrb[55].mxu0 }
 0x499   : > { %v1747_v56 = vadd.f32 %v2908_v52, %v4535_v28  ;;  %v2911_v57 = vadd.f32 %v2910_v55, %v2909_v53  ;;  %3012 = vmatprep.mubr.bf16.mxu1 %v1813_v54 }
 0x49b   : > { %v1750_v59 = vadd.f32 %v2911_v57, %v4535_v28  ;;  %v1795_v60 = vmax.f32 %v1747_v56, 0.0 }
 0x49d   : > { %v1796_v61 = vmax.f32 %v1750_v59, 0.0  ;;  %v2912_v62 = vpop.f32.mrb[56].mxu0 }
 0x49e   : > { %v2913_v63 = vpop.f32.mrb[57].mxu0 }
 0x49f   : > { %v2914_v0 = vadd.f32 %v2913_v63, %v2912_v62  ;;  %v2915_v1 = vpop.f32.mrb[58].mxu0  ;;  %v1814_v2 = vpack.c.bf16 %v1796_v61, %v1795_v60 }
 0x4a0   : > { %v2916_v3 = vpop.f32.mrb[59].mxu0 }
 0x4a1   : > { %v1755_v4 = vadd.f32 %v2914_v0, %v4535_v28  ;;  %v2917_v5 = vadd.f32 %v2916_v3, %v2915_v1  ;;  %3013 = vmatmul.mubr.bf16.gmra.mrb[24].mxu1 %v1814_v2 }
 0x4a3   : > { %v1758_v6 = vadd.f32 %v2917_v5, %v4535_v28  ;;  %v1797_v7 = vmax.f32 %v1755_v4, 0.0 }
 0x4a5   : > { %v1798_v8 = vmax.f32 %v1758_v6, 0.0  ;;  %v2918_v9 = vpop.f32.mrb[60].mxu0 }
 0x4a6   : > { %v2919_v10 = vpop.f32.mrb[61].mxu0 }
 0x4a7   : > { %v2920_v11 = vadd.f32 %v2919_v10, %v2918_v9  ;;  %v2921_v12 = vpop.f32.mrb[62].mxu0  ;;  %v1815_v13 = vpack.c.bf16 %v1798_v8, %v1797_v7 }
 0x4a8   : > { %v2922_v14 = vpop.f32.mrb[63].mxu0 }
 0x4a9   : > { %v1763_v15 = vadd.f32 %v2920_v11, %v4535_v28  ;;  %v2923_v16 = vadd.f32 %v2922_v14, %v2921_v12  ;;  %3016 = vmatprep.mubr.bf16.mxu1 %v1815_v13 }
 0x4ab   : > { %v1766_v17 = vadd.f32 %v2923_v16, %v4535_v28  ;;  %v1799_v18 = vmax.f32 %v1763_v15, 0.0 }
 0x4ad   : > { %v1800_v19 = vmax.f32 %v1766_v17, 0.0 }
 0x4af   : > { %v1816_v20 = vpack.c.bf16 %v1800_v19, %v1799_v18 }
 0x4b1   : > { %3017 = vmatmul.mubr.bf16.gmra.mrb[28].mxu1 %v1816_v20 }
 0x514   : > { %v2990_v22 = vpop.f32.mrb[0].mxu1 }
 0x515   : > { %v1931_v23 = vadd.f32 %v2990_v22, %v4569_v21  ;;  %v1922_v24 = vpop.f32.mrb[1].mxu1 }
 0x516   : > { %v1923_v25 = vadd.f32 %v4569_v21, %v1922_v24  ;;  %v2991_v26 = vpop.f32.mrb[2].mxu1 }
 0x517   : > { %v1934_v27 = vadd.f32 %v2991_v26, %v4569_v21  ;;  %v1925_v29 = vpop.f32.mrb[3].mxu1  ;;  %v2051_v31 = vmax.f32 %v1931_v23, 0.0 }
 0x518   : > { %v1926_v30 = vadd.f32 %v4569_v21, %v1925_v29  ;;  %v2049_v32 = vmax.f32 %v1923_v25, 0.0 }
 0x519   : > { %v2052_v28 = vmax.f32 %v1934_v27, 0.0 }
 0x51a   : > { %v2050_v33 = vmax.f32 %v1926_v30, 0.0 }
 0x51b   : > { %v2082_v34 = vpack.c.bf16 %v2052_v28, %v2051_v31 }
 0x51c   : > { %v2081_v35 = vpack.c.bf16 %v2050_v33, %v2049_v32 }
 0x51e   : > { %3036 = vmatprep.mubr.bf16.mxu1 %v2081_v35 }
 0x51f   : > { %3037 = vmatmul.mubr.bf16.vlgmr.msra.gmra.mrb[32].mxu1 %v2082_v34 }
 0x524   : > { %v2994_v36 = vpop.f32.mrb[4].mxu1 }
 0x525   : > { %v1947_v37 = vadd.f32 %v2994_v36, %v4569_v21  ;;  %v1938_v38 = vpop.f32.mrb[5].mxu1 }
 0x526   : > { %v1939_v39 = vadd.f32 %v4569_v21, %v1938_v38  ;;  %v2995_v40 = vpop.f32.mrb[6].mxu1 }
 0x527   : > { %v1950_v41 = vadd.f32 %v2995_v40, %v4569_v21  ;;  %v1941_v42 = vpop.f32.mrb[7].mxu1  ;;  %v2055_v44 = vmax.f32 %v1947_v37, 0.0 }
 0x528   : > { %v1942_v43 = vadd.f32 %v4569_v21, %v1941_v42  ;;  %v2053_v46 = vmax.f32 %v1939_v39, 0.0 }
 0x529   : > { %v2056_v45 = vmax.f32 %v1950_v41, 0.0 }
 0x52a   : > { %v2054_v47 = vmax.f32 %v1942_v43, 0.0 }
 0x52b   : > { %v2084_v48 = vpack.c.bf16 %v2056_v45, %v2055_v44 }
 0x52c   : > { %v2083_v49 = vpack.c.bf16 %v2054_v47, %v2053_v46 }
 0x52e   : > { %3040 = vmatprep.mubr.bf16.mxu1 %v2083_v49 }
 0x52f   : > { %3041 = vmatmul.mubr.bf16.gmra.mrb[36].mxu1 %v2084_v48 }
 0x534   : > { %v2998_v50 = vpop.f32.mrb[8].mxu1 }
 0x535   : > { %v1963_v51 = vadd.f32 %v2998_v50, %v4569_v21  ;;  %v1954_v52 = vpop.f32.mrb[9].mxu1 }
 0x536   : > { %v1955_v53 = vadd.f32 %v4569_v21, %v1954_v52  ;;  %v2999_v54 = vpop.f32.mrb[10].mxu1 }
 0x537   : > { %v1966_v55 = vadd.f32 %v2999_v54, %v4569_v21  ;;  %v1957_v56 = vpop.f32.mrb[11].mxu1  ;;  %v2059_v58 = vmax.f32 %v1963_v51, 0.0 }
 0x538   : > { %v1958_v57 = vadd.f32 %v4569_v21, %v1957_v56  ;;  %v2057_v60 = vmax.f32 %v1955_v53, 0.0 }
 0x539   : > { %v2060_v59 = vmax.f32 %v1966_v55, 0.0 }
 0x53a   : > { %v2058_v61 = vmax.f32 %v1958_v57, 0.0 }
 0x53b   : > { %v2086_v62 = vpack.c.bf16 %v2060_v59, %v2059_v58 }
 0x53c   : > { %v2085_v63 = vpack.c.bf16 %v2058_v61, %v2057_v60 }
 0x53e   : > { %3044 = vmatprep.mubr.bf16.mxu1 %v2085_v63 }
 0x53f   : > { %3045 = vmatmul.mubr.bf16.gmra.mrb[40].mxu1 %v2086_v62 }
 0x544   : > { %v3002_v0 = vpop.f32.mrb[12].mxu1 }
 0x545   : > { %v1979_v1 = vadd.f32 %v3002_v0, %v4569_v21  ;;  %v1970_v2 = vpop.f32.mrb[13].mxu1 }
 0x546   : > { %v1971_v3 = vadd.f32 %v4569_v21, %v1970_v2  ;;  %v3003_v4 = vpop.f32.mrb[14].mxu1 }
 0x547   : > { %v1982_v5 = vadd.f32 %v3003_v4, %v4569_v21  ;;  %v1973_v6 = vpop.f32.mrb[15].mxu1  ;;  %v2063_v8 = vmax.f32 %v1979_v1, 0.0 }
 0x548   : > { %v1974_v7 = vadd.f32 %v4569_v21, %v1973_v6  ;;  %v2061_v10 = vmax.f32 %v1971_v3, 0.0 }
 0x549   : > { %v2064_v9 = vmax.f32 %v1982_v5, 0.0 }
 0x54a   : > { %v2062_v11 = vmax.f32 %v1974_v7, 0.0  ;;  %v4603_v7 = vld [vmem:[#allocation18] ss:$0 sm:$0xff] }
 0x54b   : > { %v2088_v12 = vpack.c.bf16 %v2064_v9, %v2063_v8 }
 0x54c   : > { %v2087_v13 = vpack.c.bf16 %v2062_v11, %v2061_v10 }
 0x54e   : > { %3048 = vmatprep.mubr.bf16.mxu1 %v2087_v13 }
 0x54f   : > { %3049 = vmatmul.mubr.bf16.gmra.mrb[44].mxu1 %v2088_v12 }
 0x554   : > { %v3006_v14 = vpop.f32.mrb[16].mxu1 }
 0x555   : > { %v1995_v15 = vadd.f32 %v3006_v14, %v4569_v21  ;;  %v1986_v16 = vpop.f32.mrb[17].mxu1 }
 0x556   : > { %v1987_v17 = vadd.f32 %v4569_v21, %v1986_v16  ;;  %v3007_v18 = vpop.f32.mrb[18].mxu1 }
 0x557   : > { %v1998_v19 = vadd.f32 %v3007_v18, %v4569_v21  ;;  %v1989_v20 = vpop.f32.mrb[19].mxu1  ;;  %v2067_v23 = vmax.f32 %v1995_v15, 0.0 }
 0x558   : > { %v1990_v22 = vadd.f32 %v4569_v21, %v1989_v20  ;;  %v2065_v25 = vmax.f32 %v1987_v17, 0.0 }
 0x559   : > { %v2068_v24 = vmax.f32 %v1998_v19, 0.0 }
 0x55a   : > { %v2066_v26 = vmax.f32 %v1990_v22, 0.0 }
 0x55b   : > { %v2090_v27 = vpack.c.bf16 %v2068_v24, %v2067_v23 }
 0x55c   : > { %v2089_v29 = vpack.c.bf16 %v2066_v26, %v2065_v25 }
 0x55e   : > { %3052 = vmatprep.mubr.bf16.mxu1 %v2089_v29 }
 0x55f   : > { %3053 = vmatmul.mubr.bf16.gmra.mrb[48].mxu1 %v2090_v27 }
 0x564   : > { %v3010_v30 = vpop.f32.mrb[20].mxu1 }
 0x565   : > { %v2011_v31 = vadd.f32 %v3010_v30, %v4569_v21  ;;  %v2002_v28 = vpop.f32.mrb[21].mxu1 }
 0x566   : > { %v2003_v32 = vadd.f32 %v4569_v21, %v2002_v28  ;;  %v3011_v33 = vpop.f32.mrb[22].mxu1 }
 0x567   : > { %v2014_v34 = vadd.f32 %v3011_v33, %v4569_v21  ;;  %v2005_v35 = vpop.f32.mrb[23].mxu1  ;;  %v2071_v37 = vmax.f32 %v2011_v31, 0.0 }
 0x568   : > { %v2006_v36 = vadd.f32 %v4569_v21, %v2005_v35  ;;  %v2069_v39 = vmax.f32 %v2003_v32, 0.0 }
 0x569   : > { %v2072_v38 = vmax.f32 %v2014_v34, 0.0 }
 0x56a   : > { %v2070_v40 = vmax.f32 %v2006_v36, 0.0 }
 0x56b   : > { %v2092_v41 = vpack.c.bf16 %v2072_v38, %v2071_v37 }
 0x56c   : > { %v2091_v42 = vpack.c.bf16 %v2070_v40, %v2069_v39 }
 0x56e   : > { %3056 = vmatprep.mubr.bf16.mxu1 %v2091_v42 }
 0x56f   : > { %3057 = vmatmul.mubr.bf16.gmra.mrb[52].mxu1 %v2092_v41 }
 0x574   : > { %v3014_v43 = vpop.f32.mrb[24].mxu1 }
 0x575   : > { %v2027_v44 = vadd.f32 %v3014_v43, %v4569_v21  ;;  %v2018_v45 = vpop.f32.mrb[25].mxu1 }
 0x576   : > { %v2019_v46 = vadd.f32 %v4569_v21, %v2018_v45  ;;  %v3015_v47 = vpop.f32.mrb[26].mxu1 }
 0x577   : > { %v2030_v48 = vadd.f32 %v3015_v47, %v4569_v21  ;;  %v2021_v49 = vpop.f32.mrb[27].mxu1  ;;  %v2075_v51 = vmax.f32 %v2027_v44, 0.0 }
 0x578   : > { %v2022_v50 = vadd.f32 %v4569_v21, %v2021_v49  ;;  %v2073_v53 = vmax.f32 %v2019_v46, 0.0 }
 0x579   : > { %v2076_v52 = vmax.f32 %v2030_v48, 0.0 }
 0x57a   : > { %v2074_v54 = vmax.f32 %v2022_v50, 0.0 }
 0x57b   : > { %v2094_v55 = vpack.c.bf16 %v2076_v52, %v2075_v51 }
 0x57c   : > { %v2093_v56 = vpack.c.bf16 %v2074_v54, %v2073_v53 }
 0x57e   : > { %3060 = vmatprep.mubr.bf16.mxu1 %v2093_v56 }
 0x57f   : > { %3061 = vmatmul.mubr.bf16.gmra.mrb[56].mxu1 %v2094_v55 }
 0x584   : > { %v3018_v57 = vpop.f32.mrb[28].mxu1 }
 0x585   : > { %v2043_v58 = vadd.f32 %v3018_v57, %v4569_v21  ;;  %v2034_v59 = vpop.f32.mrb[29].mxu1 }
 0x586   : > { %v2035_v60 = vadd.f32 %v4569_v21, %v2034_v59  ;;  %v3019_v61 = vpop.f32.mrb[30].mxu1 }
 0x587   : > { %v2046_v62 = vadd.f32 %v3019_v61, %v4569_v21  ;;  %v2037_v63 = vpop.f32.mrb[31].mxu1  ;;  %v2079_v1 = vmax.f32 %v2043_v58, 0.0 }
 0x588   : > { %v2038_v0 = vadd.f32 %v4569_v21, %v2037_v63  ;;  %v2077_v3 = vmax.f32 %v2035_v60, 0.0 }
 0x589   : > { %v2080_v2 = vmax.f32 %v2046_v62, 0.0 }
 0x58a   : > { %v2078_v4 = vmax.f32 %v2038_v0, 0.0 }
 0x58b   : > { %v2096_v5 = vpack.c.bf16 %v2080_v2, %v2079_v1 }
 0x58c   : > { %v2095_v6 = vpack.c.bf16 %v2078_v4, %v2077_v3 }
 0x58e   : > { %3064 = vmatprep.mubr.bf16.mxu1 %v2095_v6 }
 0x58f   : > { %3065 = vmatmul.mubr.bf16.gmra.mrb[60].mxu1 %v2096_v5 }
 0x5f2   : > { %v3038_v8 = vpop.f32.mrb[32].mxu1 }
 0x5f3   : > { %v2211_v9 = vadd.f32 %v3038_v8, %v4603_v7  ;;  %v2202_v10 = vpop.f32.mrb[33].mxu1 }
 0x5f4   : > { %v2203_v21 = vadd.f32 %v4603_v7, %v2202_v10  ;;  %v3039_v11 = vpop.f32.mrb[34].mxu1 }
 0x5f5   : > { %2331 = vst [vmem:[%s4451_s6 + $0x10] sm:$0xff] %v2211_v9  ;;  %v2214_v12 = vadd.f32 %v3039_v11, %v4603_v7  ;;  %v2205_v13 = vpop.f32.mrb[35].mxu1 }
 0x5f6   : > { %2329 = vst [vmem:[%s4451_s6] sm:$0xff] %v2203_v21  ;;  %v2206_v14 = vadd.f32 %v4603_v7, %v2205_v13 }
 0x5f7   : > { %2332 = vst [vmem:[%s4451_s6 + $0x18] sm:$0xff] %v2214_v12 }
 0x5f8   : > { %2330 = vst [vmem:[%s4451_s6 + $0x8] sm:$0xff] %v2206_v14 }
 0x602   : > { %v3042_v15 = vpop.f32.mrb[36].mxu1 }
 0x603   : > { %v2227_v16 = vadd.f32 %v3042_v15, %v4603_v7  ;;  %v2218_v17 = vpop.f32.mrb[37].mxu1 }
 0x604   : > { %v2219_v18 = vadd.f32 %v4603_v7, %v2218_v17  ;;  %v3043_v19 = vpop.f32.mrb[38].mxu1 }
 0x605   : > { %2335 = vst [vmem:[%s4451_s6 + $0x30] sm:$0xff] %v2227_v16  ;;  %v2230_v20 = vadd.f32 %v3043_v19, %v4603_v7  ;;  %v2221_v22 = vpop.f32.mrb[39].mxu1 }
 0x606   : > { %2333 = vst [vmem:[%s4451_s6 + $0x20] sm:$0xff] %v2219_v18  ;;  %v2222_v23 = vadd.f32 %v4603_v7, %v2221_v22 }
 0x607   : > { %2336 = vst [vmem:[%s4451_s6 + $0x38] sm:$0xff] %v2230_v20 }
 0x608   : > { %2334 = vst [vmem:[%s4451_s6 + $0x28] sm:$0xff] %v2222_v23 }
 0x612   : > { %v3046_v24 = vpop.f32.mrb[40].mxu1 }
 0x613   : > { %v2243_v25 = vadd.f32 %v3046_v24, %v4603_v7  ;;  %v2234_v26 = vpop.f32.mrb[41].mxu1 }
 0x614   : > { %v2235_v27 = vadd.f32 %v4603_v7, %v2234_v26  ;;  %v3047_v29 = vpop.f32.mrb[42].mxu1 }
 0x615   : > { %2339 = vst [vmem:[%s4451_s6 + $0x50] sm:$0xff] %v2243_v25  ;;  %v2246_v30 = vadd.f32 %v3047_v29, %v4603_v7  ;;  %v2237_v31 = vpop.f32.mrb[43].mxu1 }
 0x616   : > { %2337 = vst [vmem:[%s4451_s6 + $0x40] sm:$0xff] %v2235_v27  ;;  %v2238_v28 = vadd.f32 %v4603_v7, %v2237_v31 }
 0x617   : > { %2340 = vst [vmem:[%s4451_s6 + $0x58] sm:$0xff] %v2246_v30 }
 0x618   : > { %2338 = vst [vmem:[%s4451_s6 + $0x48] sm:$0xff] %v2238_v28 }
 0x622   : > { %v3050_v32 = vpop.f32.mrb[44].mxu1 }
 0x623   : > { %v2259_v33 = vadd.f32 %v3050_v32, %v4603_v7  ;;  %v2250_v34 = vpop.f32.mrb[45].mxu1 }
 0x624   : > { %v2251_v35 = vadd.f32 %v4603_v7, %v2250_v34  ;;  %v3051_v36 = vpop.f32.mrb[46].mxu1 }
 0x625   : > { %2343 = vst [vmem:[%s4451_s6 + $0x70] sm:$0xff] %v2259_v33  ;;  %v2262_v37 = vadd.f32 %v3051_v36, %v4603_v7  ;;  %v2253_v38 = vpop.f32.mrb[47].mxu1 }
 0x626   : > { %2341 = vst [vmem:[%s4451_s6 + $0x60] sm:$0xff] %v2251_v35  ;;  %v2254_v39 = vadd.f32 %v4603_v7, %v2253_v38 }
 0x627   : > { %2344 = vst [vmem:[%s4451_s6 + $0x78] sm:$0xff] %v2262_v37 }
 0x628   : > { %2342 = vst [vmem:[%s4451_s6 + $0x68] sm:$0xff] %v2254_v39 }
 0x632   : > { %v3054_v40 = vpop.f32.mrb[48].mxu1 }
 0x633   : > { %v2275_v41 = vadd.f32 %v3054_v40, %v4603_v7  ;;  %v2266_v42 = vpop.f32.mrb[49].mxu1 }
 0x634   : > { %v2267_v43 = vadd.f32 %v4603_v7, %v2266_v42  ;;  %v3055_v44 = vpop.f32.mrb[50].mxu1 }
 0x635   : > { %2347 = vst [vmem:[%s4451_s6 + $0x90] sm:$0xff] %v2275_v41  ;;  %v2278_v45 = vadd.f32 %v3055_v44, %v4603_v7  ;;  %v2269_v46 = vpop.f32.mrb[51].mxu1 }
 0x636   : > { %2345 = vst [vmem:[%s4451_s6 + $0x80] sm:$0xff] %v2267_v43  ;;  %v2270_v47 = vadd.f32 %v4603_v7, %v2269_v46 }
 0x637   : > { %2348 = vst [vmem:[%s4451_s6 + $0x98] sm:$0xff] %v2278_v45 }
 0x638   : > { %2346 = vst [vmem:[%s4451_s6 + $0x88] sm:$0xff] %v2270_v47 }
 0x642   : > { %v3058_v48 = vpop.f32.mrb[52].mxu1 }
 0x643   : > { %v2291_v49 = vadd.f32 %v3058_v48, %v4603_v7  ;;  %v2282_v50 = vpop.f32.mrb[53].mxu1 }
 0x644   : > { %v2283_v51 = vadd.f32 %v4603_v7, %v2282_v50  ;;  %v3059_v52 = vpop.f32.mrb[54].mxu1 }
 0x645   : > { %2351 = vst [vmem:[%s4451_s6 + $0xb0] sm:$0xff] %v2291_v49  ;;  %v2294_v53 = vadd.f32 %v3059_v52, %v4603_v7  ;;  %v2285_v54 = vpop.f32.mrb[55].mxu1 }
 0x646   : > { %2349 = vst [vmem:[%s4451_s6 + $0xa0] sm:$0xff] %v2283_v51  ;;  %v2286_v55 = vadd.f32 %v4603_v7, %v2285_v54 }
 0x647   : > { %2352 = vst [vmem:[%s4451_s6 + $0xb8] sm:$0xff] %v2294_v53 }
 0x648   : > { %2350 = vst [vmem:[%s4451_s6 + $0xa8] sm:$0xff] %v2286_v55 }
 0x652   : > { %v3062_v56 = vpop.f32.mrb[56].mxu1 }
 0x653   : > { %v2307_v57 = vadd.f32 %v3062_v56, %v4603_v7  ;;  %v2298_v58 = vpop.f32.mrb[57].mxu1 }
 0x654   : > { %v2299_v59 = vadd.f32 %v4603_v7, %v2298_v58  ;;  %v3063_v60 = vpop.f32.mrb[58].mxu1 }
 0x655   : > { %2355 = vst [vmem:[%s4451_s6 + $0xd0] sm:$0xff] %v2307_v57  ;;  %v2310_v61 = vadd.f32 %v3063_v60, %v4603_v7  ;;  %v2301_v62 = vpop.f32.mrb[59].mxu1 }
 0x656   : > { %2353 = vst [vmem:[%s4451_s6 + $0xc0] sm:$0xff] %v2299_v59  ;;  %v2302_v63 = vadd.f32 %v4603_v7, %v2301_v62 }
 0x657   : > { %2356 = vst [vmem:[%s4451_s6 + $0xd8] sm:$0xff] %v2310_v61 }
 0x658   : > { %2354 = vst [vmem:[%s4451_s6 + $0xc8] sm:$0xff] %v2302_v63 }
 0x662   : > { %v3066_v0 = vpop.f32.mrb[60].mxu1 }
 0x663   : > { %v2323_v1 = vadd.f32 %v3066_v0, %v4603_v7  ;;  %v2314_v2 = vpop.f32.mrb[61].mxu1 }
 0x664   : > { %v2315_v3 = vadd.f32 %v4603_v7, %v2314_v2  ;;  %v3067_v4 = vpop.f32.mrb[62].mxu1 }
 0x665   : > { %2359 = vst [vmem:[%s4451_s6 + $0xf0] sm:$0xff] %v2323_v1  ;;  %v2326_v5 = vadd.f32 %v3067_v4, %v4603_v7  ;;  %v2317_v6 = vpop.f32.mrb[63].mxu1 }
 0x666   : > { %2357 = vst [vmem:[%s4451_s6 + $0xe0] sm:$0xff] %v2315_v3  ;;  %v2318_v8 = vadd.f32 %v4603_v7, %v2317_v6 }
 0x667   : > { %2360 = vst [vmem:[%s4451_s6 + $0xf8] sm:$0xff] %v2326_v5 }
 0x668   : > { %2358 = vst [vmem:[%s4451_s6 + $0xe8] sm:$0xff] %v2318_v8 }
 0x669 PF: > { %s4875_s5 = sld [smem:[#allocation36_spill]]  ;;  %s4876_s29 = sld [smem:[#allocation52_spill]] }
 0x66a   : > { %s2375_s3 = sshll.u32 %s4451_s6, 4  ;;  %s2362_s12 = scalar_lea.sflag [#allocation5], %s4419_s10  ;;  %s4676_s3 = int_to_ptr.vmem [resolvable:$true] %s2375_s3 }
 0x66b   : > { %s3651_s16 = scalar_lea.vmem %s4676_s3, 4096  ;;  %p4877_p0 = scmp.ne.s32.totalorder %s4850_s14, 0 }
 0x66c   : > { %p3652_p7 = scmp.ne.s32.totalorder %s4676_s3, %s3651_s16  ;;  %s3846_s20 = smov [#allocation20]  }
 0x66d   : > { %s3655_s0 = sshll.u32 %s3846_s20, 4  ;;  %s3656_s0 = int_to_ptr.vmem [resolvable:$false] %s3655_s0 }
 0x66e   : > { %p3653_p5 = pnand %p3652_p7, %p4877_p0  ;;  %s3657_s8 = scalar_lea.vmem %s3656_s0, 8192 }
 0x66f   : > { %s2699_s9 = sshll.u32 %s4875_s5, 12  ;;  %p3658_p12 = scmp.lt.s32.totalorder %s4676_s3, %s3656_s0 }
 0x670   : > { %s4673_s19 = scalar_lea.hbm %s4876_s29, %s2699_s9  ;;  %p3654_p1 = pneg %p3653_p5 }
 0x671   : > { %p3659_p11 = scmp.lt.s32.totalorder %s3657_s8, %s3651_s16 }
 0x673   : > { %p3660_p3 = por %p3659_p11, %p3658_p12 }
 0x675   : > { %p3661_p9 = pnand %p3660_p3, %p3654_p1 }
 0x677   : > { %3664 = shalt.err (!%p3661_p9)
}
 0x678   : > { %s3665_s15 = scalar_lea.hbm %s4673_s19, 4096  ;;  %s3669_s24 = scalar_lea.hbm %s4876_s29, 8192 }
 0x679   : > { %p3666_p10 = scmp.ne.s32.totalorder %s4673_s19, %s3665_s15  ;;  %p3670_p4 = scmp.lt.u32.totalorder %s4673_s19, %s4876_s29 }
 0x67a   : > { %p3671_p6 = scmp.lt.u32.totalorder %s3669_s24, %s3665_s15  ;;  %p3673_p7 = scmp.lt.u32.totalorder %s3665_s15, %s4673_s19 }
 0x67b   : > { %p3667_p8 = pnand %p3666_p10, %p4877_p0 }
 0x67c   : > { %p3672_p2 = por %p3671_p6, %p3670_p4 }
 0x67d   : > { %p3668_p13 = pneg %p3667_p8 }
 0x67e   : > { %p3674_p5 = por %p3673_p7, %p3672_p2 }
 0x680   : > { %p3675_p1 = pnand %p3674_p5, %p3668_p13 }
 0x682   : > { %3678 = shalt.err (!%p3675_p1)
}
 0x683   : > { %s3847_s30 = smov 128   ;;  %s3848_s27 = smov 8  }
 0x684   : > { %3116 = dma.vmem_to_hbm [thread:$0]  (%p4877_p0), %s4676_s3, 4096, %s4673_s19, %s2362_s12, %s3847_s30, %s3847_s30, %s3848_s27  }
 0x685 PF: > { %s4878_s5 = sld [smem:[#allocation30_spill]]  ;;  %p3167_p12 = scmp.ge.s32.totalorder %s3825_s26, 2 }
 0x686   : > { %p4879_p11 = scmp.ne.s32.totalorder %s4851_s4, 0 }
 0x688   : > { %p3151_p3 = pnand %p3167_p12, %p4879_p11 }
 0x68b   : > { %s2390_s9 = sand.u32 1, %s4878_s5  }
 0x68c   : > { %s2391_s13 = scalar_lea.sflag [#allocation5], %s2390_s9 }
 0x68d   : > { %3768 = dma.done.wait (!%p3151_p3), %s2391_s13, 4096  }
 0x68e   : > { %3770 = vsyncadd (!%p3151_p3), %s2391_s13, 4294963200  ;;  %s35_s26 = sadd.s32 1, %s3825_s26   ;;  %s4881_s13 = sld [smem:[#allocation31_spill]] }
 0x68f   : > { %p4707_p9 = scmp.ge.s32.totalorder %s35_s26, 6   ;;  %s4882_s14 = sld [smem:[#allocation32_spill]] }
 0x690   : > { %s4883_s10 = sld [smem:[#allocation41_spill]]  ;;  %s4884_s19 = sld [smem:[#allocation34_spill]] }
 0x691   : > { %s4885_s22 = sld [smem:[#allocation37_spill]]  ;;  %s4886_s24 = sld [smem:[#allocation39_spill]] }
 0x692   : > { %s4887_s4 = sld [smem:[#allocation40_spill]]  ;;  %s4888_s15 = smov %s4295_s7 }
 0x693   : > { %s4889_s16 = smov %s3789_s17  ;;  %s4890_s17 = smov %s3793_s18 }
 0x694   : > { %s4892_s20 = smov %s3805_s21  ;;  %s4893_s21 = smov %s4232_s11 }
 0x695   : > { %s4894_s23 = smov %s3821_s25  ;;  %34 = sbr.rel (!%p4707_p9) target bundleno = 29 (0x1d), region = 174 }
 0x696   : > { %s4891_s18 = smov %s4883_s10 }
 0x698   : > { %s4895_s25 = smov %s4887_s4 }
 0x69c   :  { %2396 = vsyncpa [#allocation4], 1 }
 0x69d   :  { %2398 = vsyncpa [#allocation4 + $0x1], 1 }
 0x69e   :  { %2399 = vsyncpa [#allocation7], 1 }
 0x69f   :  { %2401 = vsyncpa [#allocation7 + $0x1], 1 }
 0x6a0   :  { %2402 = vsyncpa [#allocation10], 1 }
 0x6a1   :  { %2404 = vsyncpa [#allocation10 + $0x1], 1 }
 0x6a2   :  { %2405 = vsyncpa [#allocation13], 1 }
 0x6a3   :  { %2406 = vsyncpa [#allocation16], 1 }
 0x6a4   :  { %2407 = vsyncpa [#allocation19], 1 }
 0x6a5   :  { %2408 = vsyncpa [#allocation5], 1 }
 0x6a6   :  { %2410 = vsyncpa [#allocation5 + $0x1], 1 }

</bundles_post_ra>
